<compile_context>
chip_gen: v6e
topology: v6e:2x2x1
jax: 0.10.0
libtpu: 0.0.40
codegen_flags: <defaults>
</compile_context>

<pallas_src>
import functools

import jax
import jax.numpy as jnp
from jax import lax
from jax.experimental import pallas as pl
from jax.experimental.pallas import tpu as pltpu


def _sigmoid(v):
    # exp + reciprocal both go to the EUP slot (frees VALU).
    return pl.reciprocal(1.0 + jnp.exp(-v), approx=False)


def _ssa_kernel(x_ref, w1a_ref, w2a_ref, w1m_ref, w2m_ref, xcol_ref,
                wsp_ref, bn_ref, o_ref, *, H, W):
    # x_ref/o_ref : (1, C, H*W) VMEM blocks (lane-dense)
    # w1*         : (r, C) VMEM,  w2*: (C, r) VMEM
    # xcol_ref    : (1, H*W) int32 VMEM -- column index (p mod W) per position
    # wsp_ref     : SMEM (98,)  -- 7x7x2 conv weights with BN scale folded in
    # bn_ref      : SMEM (1,)   -- folded BN shift
    C = x_ref.shape[1]
    HW = H * W

    xf = x_ref[0].astype(jnp.float32)                          # (C, HW)

    # ---- channel attention: fused lane-axis pools + VPU MLPs ----------------
    avg_c = jnp.sum(xf, axis=1) * (1.0 / HW)                   # (C,)
    max_c = jnp.max(xf, axis=1)                                # (C,)

    ha = jnp.maximum(jnp.sum(w1a_ref[...] * avg_c[None, :], axis=1), 0.0)  # (r,)
    oa = jnp.sum(w2a_ref[...] * ha[None, :], axis=1)                        # (C,)
    hm = jnp.maximum(jnp.sum(w1m_ref[...] * max_c[None, :], axis=1), 0.0)
    om = jnp.sum(w2m_ref[...] * hm[None, :], axis=1)

    cmask = _sigmoid(oa + om)[:, None]                         # (C, 1)

    # ---- spatial attention: channel mean/max maps (no out0 materialization) --
    scaled = xf * cmask                                        # short-lived value
    mean_map = jnp.sum(scaled, axis=0, keepdims=True) * (1.0 / C)   # (1, HW)
    max_map = jnp.max(scaled, axis=0, keepdims=True)                 # (1, HW)

    # ---- 7x7 "same" conv (2 -> 1 ch) in the flat domain via XLU rolls --------
    p = lax.broadcasted_iota(jnp.int32, (1, HW), 1)            # flat position
    xcol = xcol_ref[...]                                       # p mod W
    # Row / column validity masks implementing the conv's zero padding.
    yv = [(p >= (3 - dy) * W) & (p < (H + 3 - dy) * W) for dy in range(7)]
    xv = [(xcol >= (3 - dx)) & (xcol < (W + 3 - dx)) for dx in range(7)]

    # BN shift initialises one partial accumulator (no separate bias add);
    # four independent partials keep ILP over the 98-tap FMA chain.
    accs = [jnp.full((1, HW), bn_ref[0], jnp.float32),
            jnp.zeros((1, HW), jnp.float32),
            jnp.zeros((1, HW), jnp.float32),
            jnp.zeros((1, HW), jnp.float32)]
    maps = (mean_map, max_map)
    tap = 0
    for c in range(2):
        m = maps[c]
        for dy in range(7):
            row_off = (dy - 3) * W
            for dx in range(7):
                off = row_off + (dx - 3)                       # flat source offset
                src = m if off == 0 else pltpu.roll(m, shift=(-off) % HW, axis=1)
                val = jnp.where(yv[dy] & xv[dx], src, 0.0)
                accs[tap & 3] = accs[tap & 3] + wsp_ref[c * 49 + dy * 7 + dx] * val
                tap += 1
    smask = _sigmoid((accs[0] + accs[1]) + (accs[2] + accs[3]))  # (1, HW)

    # ---- single fused, lane-dense output store -------------------------------
    o_ref[0] = (xf * (cmask * smask)).astype(o_ref.dtype)


def spatial_scaling_attention(x, w1a, w2a, w1m, w2m, conv_w,
                              bn_gamma, bn_beta, bn_mean, bn_var, eps=1e-5):
    """SpatialScalingAttention forward.  NCHW in / NCHW out (input dtype kept)."""
    B, C, H, W = x.shape
    HW = H * W
    r = w1a.shape[0]
    assert w1a.shape == (r, C) and w2a.shape == (C, r)
    assert w1m.shape == (r, C) and w2m.shape == (C, r)
    assert conv_w.shape == (1, 2, 7, 7)

    # Fold eval-mode BatchNorm (single channel) into the conv: y = conv*s + t
    s = bn_gamma[0] / jnp.sqrt(bn_var[0] + eps)
    t = bn_beta[0] - bn_mean[0] * s
    wsp_flat = (conv_w[0].astype(jnp.float32) * s).reshape(2 * 7 * 7)   # (98,)
    t_arr = jnp.reshape(t, (1,)).astype(jnp.float32)

    x_flat = x.reshape(B, C, HW)                     # free, lane-dense view
    xcol = (jnp.arange(HW, dtype=jnp.int32) % W).reshape(1, HW)

    w1a = w1a.astype(jnp.float32)
    w2a = w2a.astype(jnp.float32)
    w1m = w1m.astype(jnp.float32)
    w2m = w2m.astype(jnp.float32)

    flops_per_b = (7 * C * HW          # pools, gating, maps, final rescale
                   + 4 * 2 * 49 * HW   # conv taps (mul+add) + masking
                   + 8 * C * r)        # tiny MLPs
    cost = pl.CostEstimate(
        flops=int(B * flops_per_b),
        transcendentals=int(B * (C + HW)),
        bytes_accessed=int(2 * B * C * HW * x.dtype.itemsize))

    block_bytes = C * HW * x.dtype.itemsize
    vmem_limit = int(min(32 * 1024 * 1024,
                         max(8 * 1024 * 1024, 6 * block_bytes + 2 * 1024 * 1024)))

    kernel = functools.partial(_ssa_kernel, H=H, W=W)

    out_flat = pl.pallas_call(
        kernel,
        out_shape=jax.ShapeDtypeStruct((B, C, HW), x.dtype),
        grid_spec=pltpu.PrefetchScalarGridSpec(
            num_scalar_prefetch=0,
            grid=(B,),
            in_specs=[
                pl.BlockSpec((1, C, HW), lambda b: (b, 0, 0)),
                pl.BlockSpec((r, C), lambda b: (0, 0)),
                pl.BlockSpec((C, r), lambda b: (0, 0)),
                pl.BlockSpec((r, C), lambda b: (0, 0)),
                pl.BlockSpec((C, r), lambda b: (0, 0)),
                pl.BlockSpec((1, HW), lambda b: (0, 0)),
                pl.BlockSpec(memory_space=pltpu.MemorySpace.SMEM),
                pl.BlockSpec(memory_space=pltpu.MemorySpace.SMEM),
            ],
            out_specs=pl.BlockSpec((1, C, HW), lambda b: (b, 0, 0)),
        ),
        compiler_params=pltpu.CompilerParams(
            dimension_semantics=("parallel",),
            vmem_limit_bytes=vmem_limit),
        cost_estimate=cost,
    )(x_flat, w1a, w2a, w1m, w2m, xcol, wsp_flat, t_arr)
    return out_flat.reshape(B, C, H, W)


if __name__ == "__main__":
    key = jax.random.PRNGKey(0)
    ks = jax.random.split(key, 8)

    B, C, H, W = 2, 4, 16, 16
    r = max(1, C // 8)
    eps = 1e-5

    x = jax.random.normal(ks[0], (B, C, H, W), jnp.float32)
    b1 = 1.0 / (C ** 0.5)
    w1a = jax.random.uniform(ks[1], (r, C), jnp.float32, -b1, b1)
    w1m = jax.random.uniform(ks[2], (r, C), jnp.float32, -b1, b1)
    b2 = 1.0 / (r ** 0.5)
    w2a = jax.random.uniform(ks[3], (C, r), jnp.float32, -b2, b2)
    w2m = jax.random.uniform(ks[4], (C, r), jnp.float32, -b2, b2)
    bc = 1.0 / ((2 * 7 * 7) ** 0.5)
    conv_w = jax.random.uniform(ks[5], (1, 2, 7, 7), jnp.float32, -bc, bc)
    bn_gamma = 1.0 + 0.1 * jax.random.normal(ks[6], (1,), jnp.float32)
    bn_beta = 0.1 * jax.random.normal(ks[7], (1,), jnp.float32)
    bn_mean = jnp.array([0.05], jnp.float32)
    bn_var = jnp.array([0.9], jnp.float32)

    out = jax.block_until_ready(spatial_scaling_attention(
        x, w1a, w2a, w1m, w2m, conv_w, bn_gamma, bn_beta, bn_mean, bn_var, eps))

    # ---- plain-JAX reference (same math, eval-mode BN) -----------------------
    avg = jnp.mean(x, axis=(2, 3))                        # (B, C)
    mx = jnp.max(x, axis=(2, 3))                          # (B, C)
    a = jnp.maximum(avg @ w1a.T, 0.0) @ w2a.T
    m = jnp.maximum(mx @ w1m.T, 0.0) @ w2m.T
    cmask = jax.nn.sigmoid(a + m)[:, :, None, None]
    ref0 = x * cmask
    mean_map = jnp.mean(ref0, axis=1, keepdims=True)
    max_map = jnp.max(ref0, axis=1, keepdims=True)
    sp_in = jnp.concatenate([mean_map, max_map], axis=1)  # (B, 2, H, W)
    conv = jax.lax.conv_general_dilated(
        sp_in, conv_w, window_strides=(1, 1), padding=((3, 3), (3, 3)),
        dimension_numbers=("NCHW", "OIHW", "NCHW"))
    s_ref = bn_gamma[0] / jnp.sqrt(bn_var[0] + eps)
    t_ref = bn_beta[0] - bn_mean[0] * s_ref
    smask = jax.nn.sigmoid(conv * s_ref + t_ref)
    ref = ref0 * smask

    assert out.shape == (B, C, H, W), out.shape
    err = float(jnp.max(jnp.abs(out - ref)))
    assert jnp.allclose(out, ref, atol=1e-4, rtol=1e-4), err
    print("KERNEL_OK")
</pallas_src>

<mosaic_0001>
module attributes {stable_mosaic.version = 11 : i64} {
  func.func @_ssa_kernel(%arg0: i32, %arg1: memref<1x4x256xf32, #tpu.memory_space<vmem>>, %arg2: memref<1x4xf32, #tpu.memory_space<vmem>>, %arg3: memref<4x1xf32, #tpu.memory_space<vmem>>, %arg4: memref<1x4xf32, #tpu.memory_space<vmem>>, %arg5: memref<4x1xf32, #tpu.memory_space<vmem>>, %arg6: memref<1x256xi32, #tpu.memory_space<vmem>>, %arg7: memref<98xf32, #tpu.memory_space<smem>>, %arg8: memref<1xf32, #tpu.memory_space<smem>>, %arg9: memref<1x4x256xf32, #tpu.memory_space<vmem>>) attributes {dimension_semantics = [#tpu.dimension_semantics<parallel>], iteration_bounds = array<i64: 2>, scalar_prefetch = 0 : i64, scratch_operands = 0 : i64, tpu.core_type = #tpu.core_type<tc>, window_params = [{transform_indices = @transform_0, window_bounds = array<i64: 1, 4, 256>}, {pipeline_mode = #tpu.pipeline_mode<synchronous>, transform_indices = @transform_1, window_bounds = array<i64: 1, 4>}, {pipeline_mode = #tpu.pipeline_mode<synchronous>, transform_indices = @transform_2, window_bounds = array<i64: 4, 1>}, {pipeline_mode = #tpu.pipeline_mode<synchronous>, transform_indices = @transform_3, window_bounds = array<i64: 1, 4>}, {pipeline_mode = #tpu.pipeline_mode<synchronous>, transform_indices = @transform_4, window_bounds = array<i64: 4, 1>}, {pipeline_mode = #tpu.pipeline_mode<synchronous>, transform_indices = @transform_5, window_bounds = array<i64: 1, 256>}, {transform_indices = @transform_6, window_bounds = array<i64: 98>}, {transform_indices = @transform_7, window_bounds = array<i64: 1>}, {transform_indices = @transform_8, window_bounds = array<i64: 1, 4, 256>}]} {
    %c0 = arith.constant 0 : index
    %c0_0 = arith.constant 0 : index
    %c0_1 = arith.constant 0 : index
    %0 = vector.load %arg1[%c0, %c0_0, %c0_1] : memref<1x4x256xf32, #tpu.memory_space<vmem>>, vector<1x4x256xf32>
    %1 = vector.shape_cast %0 : vector<1x4x256xf32> to vector<4x256xf32>
    %cst = arith.constant dense<0.000000e+00> : vector<4xf32>
    %2 = vector.multi_reduction <add>, %1, %cst [1] : vector<4x256xf32> to vector<4xf32>
    %cst_2 = arith.constant 3.906250e-03 : f32
    %3 = vector.broadcast %cst_2 : f32 to vector<4xf32>
    %4 = arith.mulf %2, %3 : vector<4xf32>
    %cst_3 = arith.constant dense<0xFF800000> : vector<4xf32>
    %5 = vector.multi_reduction <maximumf>, %1, %cst_3 [1] : vector<4x256xf32> to vector<4xf32>
    %c0_4 = arith.constant 0 : index
    %c0_5 = arith.constant 0 : index
    %6 = vector.load %arg2[%c0_4, %c0_5] : memref<1x4xf32, #tpu.memory_space<vmem>>, vector<1x4xf32>
    %7 = vector.shape_cast %4 : vector<4xf32> to vector<1x4xf32>
    %8 = arith.mulf %6, %7 : vector<1x4xf32>
    %cst_6 = arith.constant dense<0.000000e+00> : vector<1xf32>
    %9 = vector.multi_reduction <add>, %8, %cst_6 [1] : vector<1x4xf32> to vector<1xf32>
    %cst_7 = arith.constant 0.000000e+00 : f32
    %10 = vector.broadcast %cst_7 : f32 to vector<1xf32>
    %11 = arith.maximumf %9, %10 : vector<1xf32>
    %c0_8 = arith.constant 0 : index
    %c0_9 = arith.constant 0 : index
    %12 = vector.load %arg3[%c0_8, %c0_9] : memref<4x1xf32, #tpu.memory_space<vmem>>, vector<4x1xf32>
    %13 = vector.shape_cast %11 : vector<1xf32> to vector<1x1xf32>
    %14 = vector.broadcast %13 : vector<1x1xf32> to vector<4x1xf32>
    %15 = arith.mulf %12, %14 : vector<4x1xf32>
    %cst_10 = arith.constant dense<0.000000e+00> : vector<4xf32>
    %16 = vector.multi_reduction <add>, %15, %cst_10 [1] : vector<4x1xf32> to vector<4xf32>
    %c0_11 = arith.constant 0 : index
    %c0_12 = arith.constant 0 : index
    %17 = vector.load %arg4[%c0_11, %c0_12] : memref<1x4xf32, #tpu.memory_space<vmem>>, vector<1x4xf32>
    %18 = vector.shape_cast %5 : vector<4xf32> to vector<1x4xf32>
    %19 = arith.mulf %17, %18 : vector<1x4xf32>
    %cst_13 = arith.constant dense<0.000000e+00> : vector<1xf32>
    %20 = vector.multi_reduction <add>, %19, %cst_13 [1] : vector<1x4xf32> to vector<1xf32>
    %cst_14 = arith.constant 0.000000e+00 : f32
    %21 = vector.broadcast %cst_14 : f32 to vector<1xf32>
    %22 = arith.maximumf %20, %21 : vector<1xf32>
    %c0_15 = arith.constant 0 : index
    %c0_16 = arith.constant 0 : index
    %23 = vector.load %arg5[%c0_15, %c0_16] : memref<4x1xf32, #tpu.memory_space<vmem>>, vector<4x1xf32>
    %24 = vector.shape_cast %22 : vector<1xf32> to vector<1x1xf32>
    %25 = vector.broadcast %24 : vector<1x1xf32> to vector<4x1xf32>
    %26 = arith.mulf %23, %25 : vector<4x1xf32>
    %cst_17 = arith.constant dense<0.000000e+00> : vector<4xf32>
    %27 = vector.multi_reduction <add>, %26, %cst_17 [1] : vector<4x1xf32> to vector<4xf32>
    %28 = arith.addf %16, %27 : vector<4xf32>
    %cst_18 = arith.constant 0.000000e+00 : f32
    %29 = vector.broadcast %cst_18 : f32 to vector<4xf32>
    %30 = arith.subf %29, %28 : vector<4xf32>
    %31 = math.exp %30 : vector<4xf32>
    %cst_19 = arith.constant 1.000000e+00 : f32
    %32 = vector.broadcast %cst_19 : f32 to vector<4xf32>
    %33 = arith.addf %32, %31 : vector<4xf32>
    %34 = tpu.reciprocal %33 : vector<4xf32> -> vector<4xf32>
    %35 = vector.shape_cast %34 : vector<4xf32> to vector<4x1xf32>
    %36 = vector.broadcast %35 : vector<4x1xf32> to vector<4x256xf32>
    %37 = arith.mulf %1, %36 : vector<4x256xf32>
    %cst_20 = arith.constant dense<0.000000e+00> : vector<256xf32>
    %38 = vector.multi_reduction <add>, %37, %cst_20 [0] : vector<4x256xf32> to vector<256xf32>
    %39 = vector.shape_cast %38 : vector<256xf32> to vector<1x256xf32>
    %cst_21 = arith.constant 2.500000e-01 : f32
    %40 = vector.broadcast %cst_21 : f32 to vector<1x256xf32>
    %41 = arith.mulf %39, %40 : vector<1x256xf32>
    %cst_22 = arith.constant dense<0xFF800000> : vector<256xf32>
    %42 = vector.multi_reduction <maximumf>, %37, %cst_22 [0] : vector<4x256xf32> to vector<256xf32>
    %43 = vector.shape_cast %42 : vector<256xf32> to vector<1x256xf32>
    %44 = tpu.iota {dimensions = array<i32: 1>} : vector<1x256xi32>
    %c0_23 = arith.constant 0 : index
    %c0_24 = arith.constant 0 : index
    %45 = vector.load %arg6[%c0_23, %c0_24] : memref<1x256xi32, #tpu.memory_space<vmem>>, vector<1x256xi32>
    %c48_i32 = arith.constant 48 : i32
    %46 = vector.broadcast %c48_i32 : i32 to vector<1x256xi32>
    %47 = arith.cmpi sge, %44, %46 : vector<1x256xi32>
    %c304_i32 = arith.constant 304 : i32
    %48 = vector.broadcast %c304_i32 : i32 to vector<1x256xi32>
    %49 = arith.cmpi slt, %44, %48 : vector<1x256xi32>
    %50 = arith.andi %47, %49 : vector<1x256xi1>
    %c32_i32 = arith.constant 32 : i32
    %51 = vector.broadcast %c32_i32 : i32 to vector<1x256xi32>
    %52 = arith.cmpi sge, %44, %51 : vector<1x256xi32>
    %c288_i32 = arith.constant 288 : i32
    %53 = vector.broadcast %c288_i32 : i32 to vector<1x256xi32>
    %54 = arith.cmpi slt, %44, %53 : vector<1x256xi32>
    %55 = arith.andi %52, %54 : vector<1x256xi1>
    %c16_i32 = arith.constant 16 : i32
    %56 = vector.broadcast %c16_i32 : i32 to vector<1x256xi32>
    %57 = arith.cmpi sge, %44, %56 : vector<1x256xi32>
    %c272_i32 = arith.constant 272 : i32
    %58 = vector.broadcast %c272_i32 : i32 to vector<1x256xi32>
    %59 = arith.cmpi slt, %44, %58 : vector<1x256xi32>
    %60 = arith.andi %57, %59 : vector<1x256xi1>
    %c0_i32 = arith.constant 0 : i32
    %61 = vector.broadcast %c0_i32 : i32 to vector<1x256xi32>
    %62 = arith.cmpi sge, %44, %61 : vector<1x256xi32>
    %c256_i32 = arith.constant 256 : i32
    %63 = vector.broadcast %c256_i32 : i32 to vector<1x256xi32>
    %64 = arith.cmpi slt, %44, %63 : vector<1x256xi32>
    %65 = arith.andi %62, %64 : vector<1x256xi1>
    %c-16_i32 = arith.constant -16 : i32
    %66 = vector.broadcast %c-16_i32 : i32 to vector<1x256xi32>
    %67 = arith.cmpi sge, %44, %66 : vector<1x256xi32>
    %c240_i32 = arith.constant 240 : i32
    %68 = vector.broadcast %c240_i32 : i32 to vector<1x256xi32>
    %69 = arith.cmpi slt, %44, %68 : vector<1x256xi32>
    %70 = arith.andi %67, %69 : vector<1x256xi1>
    %c-32_i32 = arith.constant -32 : i32
    %71 = vector.broadcast %c-32_i32 : i32 to vector<1x256xi32>
    %72 = arith.cmpi sge, %44, %71 : vector<1x256xi32>
    %c224_i32 = arith.constant 224 : i32
    %73 = vector.broadcast %c224_i32 : i32 to vector<1x256xi32>
    %74 = arith.cmpi slt, %44, %73 : vector<1x256xi32>
    %75 = arith.andi %72, %74 : vector<1x256xi1>
    %c-48_i32 = arith.constant -48 : i32
    %76 = vector.broadcast %c-48_i32 : i32 to vector<1x256xi32>
    %77 = arith.cmpi sge, %44, %76 : vector<1x256xi32>
    %c208_i32 = arith.constant 208 : i32
    %78 = vector.broadcast %c208_i32 : i32 to vector<1x256xi32>
    %79 = arith.cmpi slt, %44, %78 : vector<1x256xi32>
    %80 = arith.andi %77, %79 : vector<1x256xi1>
    %c3_i32 = arith.constant 3 : i32
    %81 = vector.broadcast %c3_i32 : i32 to vector<1x256xi32>
    %82 = arith.cmpi sge, %45, %81 : vector<1x256xi32>
    %c19_i32 = arith.constant 19 : i32
    %83 = vector.broadcast %c19_i32 : i32 to vector<1x256xi32>
    %84 = arith.cmpi slt, %45, %83 : vector<1x256xi32>
    %85 = arith.andi %82, %84 : vector<1x256xi1>
    %c2_i32 = arith.constant 2 : i32
    %86 = vector.broadcast %c2_i32 : i32 to vector<1x256xi32>
    %87 = arith.cmpi sge, %45, %86 : vector<1x256xi32>
    %c18_i32 = arith.constant 18 : i32
    %88 = vector.broadcast %c18_i32 : i32 to vector<1x256xi32>
    %89 = arith.cmpi slt, %45, %88 : vector<1x256xi32>
    %90 = arith.andi %87, %89 : vector<1x256xi1>
    %c1_i32 = arith.constant 1 : i32
    %91 = vector.broadcast %c1_i32 : i32 to vector<1x256xi32>
    %92 = arith.cmpi sge, %45, %91 : vector<1x256xi32>
    %c17_i32 = arith.constant 17 : i32
    %93 = vector.broadcast %c17_i32 : i32 to vector<1x256xi32>
    %94 = arith.cmpi slt, %45, %93 : vector<1x256xi32>
    %95 = arith.andi %92, %94 : vector<1x256xi1>
    %c0_i32_25 = arith.constant 0 : i32
    %96 = vector.broadcast %c0_i32_25 : i32 to vector<1x256xi32>
    %97 = arith.cmpi sge, %45, %96 : vector<1x256xi32>
    %c16_i32_26 = arith.constant 16 : i32
    %98 = vector.broadcast %c16_i32_26 : i32 to vector<1x256xi32>
    %99 = arith.cmpi slt, %45, %98 : vector<1x256xi32>
    %100 = arith.andi %97, %99 : vector<1x256xi1>
    %c-1_i32 = arith.constant -1 : i32
    %101 = vector.broadcast %c-1_i32 : i32 to vector<1x256xi32>
    %102 = arith.cmpi sge, %45, %101 : vector<1x256xi32>
    %c15_i32 = arith.constant 15 : i32
    %103 = vector.broadcast %c15_i32 : i32 to vector<1x256xi32>
    %104 = arith.cmpi slt, %45, %103 : vector<1x256xi32>
    %105 = arith.andi %102, %104 : vector<1x256xi1>
    %c-2_i32 = arith.constant -2 : i32
    %106 = vector.broadcast %c-2_i32 : i32 to vector<1x256xi32>
    %107 = arith.cmpi sge, %45, %106 : vector<1x256xi32>
    %c14_i32 = arith.constant 14 : i32
    %108 = vector.broadcast %c14_i32 : i32 to vector<1x256xi32>
    %109 = arith.cmpi slt, %45, %108 : vector<1x256xi32>
    %110 = arith.andi %107, %109 : vector<1x256xi1>
    %c-3_i32 = arith.constant -3 : i32
    %111 = vector.broadcast %c-3_i32 : i32 to vector<1x256xi32>
    %112 = arith.cmpi sge, %45, %111 : vector<1x256xi32>
    %c13_i32 = arith.constant 13 : i32
    %113 = vector.broadcast %c13_i32 : i32 to vector<1x256xi32>
    %114 = arith.cmpi slt, %45, %113 : vector<1x256xi32>
    %115 = arith.andi %112, %114 : vector<1x256xi1>
    %c0_27 = arith.constant 0 : index
    %116 = memref.load %arg8[%c0_27] : memref<1xf32, #tpu.memory_space<smem>>
    %117 = vector.broadcast %116 : f32 to vector<1x256xf32>
    %cst_28 = arith.constant 0.000000e+00 : f32
    %118 = vector.broadcast %cst_28 : f32 to vector<1x256xf32>
    %cst_29 = arith.constant 0.000000e+00 : f32
    %119 = vector.broadcast %cst_29 : f32 to vector<1x256xf32>
    %cst_30 = arith.constant 0.000000e+00 : f32
    %120 = vector.broadcast %cst_30 : f32 to vector<1x256xf32>
    %c51_i32 = arith.constant 51 : i32
    %121 = tpu.dynamic_rotate %41 by %c51_i32 dim 1 : vector<1x256xf32>, i32 -> vector<1x256xf32>
    %122 = arith.andi %50, %85 : vector<1x256xi1>
    %cst_31 = arith.constant 0.000000e+00 : f32
    %123 = vector.broadcast %cst_31 : f32 to vector<1x256xf32>
    %124 = arith.select %122, %121, %123 : vector<1x256xi1>, vector<1x256xf32>
    %c0_32 = arith.constant 0 : index
    %125 = memref.load %arg7[%c0_32] : memref<98xf32, #tpu.memory_space<smem>>
    %126 = vector.broadcast %125 : f32 to vector<1x256xf32>
    %127 = arith.mulf %126, %124 : vector<1x256xf32>
    %128 = arith.addf %117, %127 : vector<1x256xf32>
    %c50_i32 = arith.constant 50 : i32
    %129 = tpu.dynamic_rotate %41 by %c50_i32 dim 1 : vector<1x256xf32>, i32 -> vector<1x256xf32>
    %130 = arith.andi %50, %90 : vector<1x256xi1>
    %cst_33 = arith.constant 0.000000e+00 : f32
    %131 = vector.broadcast %cst_33 : f32 to vector<1x256xf32>
    %132 = arith.select %130, %129, %131 : vector<1x256xi1>, vector<1x256xf32>
    %c1 = arith.constant 1 : index
    %133 = memref.load %arg7[%c1] : memref<98xf32, #tpu.memory_space<smem>>
    %134 = vector.broadcast %133 : f32 to vector<1x256xf32>
    %135 = arith.mulf %134, %132 : vector<1x256xf32>
    %136 = arith.addf %118, %135 : vector<1x256xf32>
    %c49_i32 = arith.constant 49 : i32
    %137 = tpu.dynamic_rotate %41 by %c49_i32 dim 1 : vector<1x256xf32>, i32 -> vector<1x256xf32>
    %138 = arith.andi %50, %95 : vector<1x256xi1>
    %cst_34 = arith.constant 0.000000e+00 : f32
    %139 = vector.broadcast %cst_34 : f32 to vector<1x256xf32>
    %140 = arith.select %138, %137, %139 : vector<1x256xi1>, vector<1x256xf32>
    %c2 = arith.constant 2 : index
    %141 = memref.load %arg7[%c2] : memref<98xf32, #tpu.memory_space<smem>>
    %142 = vector.broadcast %141 : f32 to vector<1x256xf32>
    %143 = arith.mulf %142, %140 : vector<1x256xf32>
    %144 = arith.addf %119, %143 : vector<1x256xf32>
    %c48_i32_35 = arith.constant 48 : i32
    %145 = tpu.dynamic_rotate %41 by %c48_i32_35 dim 1 : vector<1x256xf32>, i32 -> vector<1x256xf32>
    %146 = arith.andi %50, %100 : vector<1x256xi1>
    %cst_36 = arith.constant 0.000000e+00 : f32
    %147 = vector.broadcast %cst_36 : f32 to vector<1x256xf32>
    %148 = arith.select %146, %145, %147 : vector<1x256xi1>, vector<1x256xf32>
    %c3 = arith.constant 3 : index
    %149 = memref.load %arg7[%c3] : memref<98xf32, #tpu.memory_space<smem>>
    %150 = vector.broadcast %149 : f32 to vector<1x256xf32>
    %151 = arith.mulf %150, %148 : vector<1x256xf32>
    %152 = arith.addf %120, %151 : vector<1x256xf32>
    %c47_i32 = arith.constant 47 : i32
    %153 = tpu.dynamic_rotate %41 by %c47_i32 dim 1 : vector<1x256xf32>, i32 -> vector<1x256xf32>
    %154 = arith.andi %50, %105 : vector<1x256xi1>
    %cst_37 = arith.constant 0.000000e+00 : f32
    %155 = vector.broadcast %cst_37 : f32 to vector<1x256xf32>
    %156 = arith.select %154, %153, %155 : vector<1x256xi1>, vector<1x256xf32>
    %c4 = arith.constant 4 : index
    %157 = memref.load %arg7[%c4] : memref<98xf32, #tpu.memory_space<smem>>
    %158 = vector.broadcast %157 : f32 to vector<1x256xf32>
    %159 = arith.mulf %158, %156 : vector<1x256xf32>
    %160 = arith.addf %128, %159 : vector<1x256xf32>
    %c46_i32 = arith.constant 46 : i32
    %161 = tpu.dynamic_rotate %41 by %c46_i32 dim 1 : vector<1x256xf32>, i32 -> vector<1x256xf32>
    %162 = arith.andi %50, %110 : vector<1x256xi1>
    %cst_38 = arith.constant 0.000000e+00 : f32
    %163 = vector.broadcast %cst_38 : f32 to vector<1x256xf32>
    %164 = arith.select %162, %161, %163 : vector<1x256xi1>, vector<1x256xf32>
    %c5 = arith.constant 5 : index
    %165 = memref.load %arg7[%c5] : memref<98xf32, #tpu.memory_space<smem>>
    %166 = vector.broadcast %165 : f32 to vector<1x256xf32>
    %167 = arith.mulf %166, %164 : vector<1x256xf32>
    %168 = arith.addf %136, %167 : vector<1x256xf32>
    %c45_i32 = arith.constant 45 : i32
    %169 = tpu.dynamic_rotate %41 by %c45_i32 dim 1 : vector<1x256xf32>, i32 -> vector<1x256xf32>
    %170 = arith.andi %50, %115 : vector<1x256xi1>
    %cst_39 = arith.constant 0.000000e+00 : f32
    %171 = vector.broadcast %cst_39 : f32 to vector<1x256xf32>
    %172 = arith.select %170, %169, %171 : vector<1x256xi1>, vector<1x256xf32>
    %c6 = arith.constant 6 : index
    %173 = memref.load %arg7[%c6] : memref<98xf32, #tpu.memory_space<smem>>
    %174 = vector.broadcast %173 : f32 to vector<1x256xf32>
    %175 = arith.mulf %174, %172 : vector<1x256xf32>
    %176 = arith.addf %144, %175 : vector<1x256xf32>
    %c35_i32 = arith.constant 35 : i32
    %177 = tpu.dynamic_rotate %41 by %c35_i32 dim 1 : vector<1x256xf32>, i32 -> vector<1x256xf32>
    %178 = arith.andi %55, %85 : vector<1x256xi1>
    %cst_40 = arith.constant 0.000000e+00 : f32
    %179 = vector.broadcast %cst_40 : f32 to vector<1x256xf32>
    %180 = arith.select %178, %177, %179 : vector<1x256xi1>, vector<1x256xf32>
    %c7 = arith.constant 7 : index
    %181 = memref.load %arg7[%c7] : memref<98xf32, #tpu.memory_space<smem>>
    %182 = vector.broadcast %181 : f32 to vector<1x256xf32>
    %183 = arith.mulf %182, %180 : vector<1x256xf32>
    %184 = arith.addf %152, %183 : vector<1x256xf32>
    %c34_i32 = arith.constant 34 : i32
    %185 = tpu.dynamic_rotate %41 by %c34_i32 dim 1 : vector<1x256xf32>, i32 -> vector<1x256xf32>
    %186 = arith.andi %55, %90 : vector<1x256xi1>
    %cst_41 = arith.constant 0.000000e+00 : f32
    %187 = vector.broadcast %cst_41 : f32 to vector<1x256xf32>
    %188 = arith.select %186, %185, %187 : vector<1x256xi1>, vector<1x256xf32>
    %c8 = arith.constant 8 : index
    %189 = memref.load %arg7[%c8] : memref<98xf32, #tpu.memory_space<smem>>
    %190 = vector.broadcast %189 : f32 to vector<1x256xf32>
    %191 = arith.mulf %190, %188 : vector<1x256xf32>
    %192 = arith.addf %160, %191 : vector<1x256xf32>
    %c33_i32 = arith.constant 33 : i32
    %193 = tpu.dynamic_rotate %41 by %c33_i32 dim 1 : vector<1x256xf32>, i32 -> vector<1x256xf32>
    %194 = arith.andi %55, %95 : vector<1x256xi1>
    %cst_42 = arith.constant 0.000000e+00 : f32
    %195 = vector.broadcast %cst_42 : f32 to vector<1x256xf32>
    %196 = arith.select %194, %193, %195 : vector<1x256xi1>, vector<1x256xf32>
    %c9 = arith.constant 9 : index
    %197 = memref.load %arg7[%c9] : memref<98xf32, #tpu.memory_space<smem>>
    %198 = vector.broadcast %197 : f32 to vector<1x256xf32>
    %199 = arith.mulf %198, %196 : vector<1x256xf32>
    %200 = arith.addf %168, %199 : vector<1x256xf32>
    %c32_i32_43 = arith.constant 32 : i32
    %201 = tpu.dynamic_rotate %41 by %c32_i32_43 dim 1 : vector<1x256xf32>, i32 -> vector<1x256xf32>
    %202 = arith.andi %55, %100 : vector<1x256xi1>
    %cst_44 = arith.constant 0.000000e+00 : f32
    %203 = vector.broadcast %cst_44 : f32 to vector<1x256xf32>
    %204 = arith.select %202, %201, %203 : vector<1x256xi1>, vector<1x256xf32>
    %c10 = arith.constant 10 : index
    %205 = memref.load %arg7[%c10] : memref<98xf32, #tpu.memory_space<smem>>
    %206 = vector.broadcast %205 : f32 to vector<1x256xf32>
    %207 = arith.mulf %206, %204 : vector<1x256xf32>
    %208 = arith.addf %176, %207 : vector<1x256xf32>
    %c31_i32 = arith.constant 31 : i32
    %209 = tpu.dynamic_rotate %41 by %c31_i32 dim 1 : vector<1x256xf32>, i32 -> vector<1x256xf32>
    %210 = arith.andi %55, %105 : vector<1x256xi1>
    %cst_45 = arith.constant 0.000000e+00 : f32
    %211 = vector.broadcast %cst_45 : f32 to vector<1x256xf32>
    %212 = arith.select %210, %209, %211 : vector<1x256xi1>, vector<1x256xf32>
    %c11 = arith.constant 11 : index
    %213 = memref.load %arg7[%c11] : memref<98xf32, #tpu.memory_space<smem>>
    %214 = vector.broadcast %213 : f32 to vector<1x256xf32>
    %215 = arith.mulf %214, %212 : vector<1x256xf32>
    %216 = arith.addf %184, %215 : vector<1x256xf32>
    %c30_i32 = arith.constant 30 : i32
    %217 = tpu.dynamic_rotate %41 by %c30_i32 dim 1 : vector<1x256xf32>, i32 -> vector<1x256xf32>
    %218 = arith.andi %55, %110 : vector<1x256xi1>
    %cst_46 = arith.constant 0.000000e+00 : f32
    %219 = vector.broadcast %cst_46 : f32 to vector<1x256xf32>
    %220 = arith.select %218, %217, %219 : vector<1x256xi1>, vector<1x256xf32>
    %c12 = arith.constant 12 : index
    %221 = memref.load %arg7[%c12] : memref<98xf32, #tpu.memory_space<smem>>
    %222 = vector.broadcast %221 : f32 to vector<1x256xf32>
    %223 = arith.mulf %222, %220 : vector<1x256xf32>
    %224 = arith.addf %192, %223 : vector<1x256xf32>
    %c29_i32 = arith.constant 29 : i32
    %225 = tpu.dynamic_rotate %41 by %c29_i32 dim 1 : vector<1x256xf32>, i32 -> vector<1x256xf32>
    %226 = arith.andi %55, %115 : vector<1x256xi1>
    %cst_47 = arith.constant 0.000000e+00 : f32
    %227 = vector.broadcast %cst_47 : f32 to vector<1x256xf32>
    %228 = arith.select %226, %225, %227 : vector<1x256xi1>, vector<1x256xf32>
    %c13 = arith.constant 13 : index
    %229 = memref.load %arg7[%c13] : memref<98xf32, #tpu.memory_space<smem>>
    %230 = vector.broadcast %229 : f32 to vector<1x256xf32>
    %231 = arith.mulf %230, %228 : vector<1x256xf32>
    %232 = arith.addf %200, %231 : vector<1x256xf32>
    %c19_i32_48 = arith.constant 19 : i32
    %233 = tpu.dynamic_rotate %41 by %c19_i32_48 dim 1 : vector<1x256xf32>, i32 -> vector<1x256xf32>
    %234 = arith.andi %60, %85 : vector<1x256xi1>
    %cst_49 = arith.constant 0.000000e+00 : f32
    %235 = vector.broadcast %cst_49 : f32 to vector<1x256xf32>
    %236 = arith.select %234, %233, %235 : vector<1x256xi1>, vector<1x256xf32>
    %c14 = arith.constant 14 : index
    %237 = memref.load %arg7[%c14] : memref<98xf32, #tpu.memory_space<smem>>
    %238 = vector.broadcast %237 : f32 to vector<1x256xf32>
    %239 = arith.mulf %238, %236 : vector<1x256xf32>
    %240 = arith.addf %208, %239 : vector<1x256xf32>
    %c18_i32_50 = arith.constant 18 : i32
    %241 = tpu.dynamic_rotate %41 by %c18_i32_50 dim 1 : vector<1x256xf32>, i32 -> vector<1x256xf32>
    %242 = arith.andi %60, %90 : vector<1x256xi1>
    %cst_51 = arith.constant 0.000000e+00 : f32
    %243 = vector.broadcast %cst_51 : f32 to vector<1x256xf32>
    %244 = arith.select %242, %241, %243 : vector<1x256xi1>, vector<1x256xf32>
    %c15 = arith.constant 15 : index
    %245 = memref.load %arg7[%c15] : memref<98xf32, #tpu.memory_space<smem>>
    %246 = vector.broadcast %245 : f32 to vector<1x256xf32>
    %247 = arith.mulf %246, %244 : vector<1x256xf32>
    %248 = arith.addf %216, %247 : vector<1x256xf32>
    %c17_i32_52 = arith.constant 17 : i32
    %249 = tpu.dynamic_rotate %41 by %c17_i32_52 dim 1 : vector<1x256xf32>, i32 -> vector<1x256xf32>
    %250 = arith.andi %60, %95 : vector<1x256xi1>
    %cst_53 = arith.constant 0.000000e+00 : f32
    %251 = vector.broadcast %cst_53 : f32 to vector<1x256xf32>
    %252 = arith.select %250, %249, %251 : vector<1x256xi1>, vector<1x256xf32>
    %c16 = arith.constant 16 : index
    %253 = memref.load %arg7[%c16] : memref<98xf32, #tpu.memory_space<smem>>
    %254 = vector.broadcast %253 : f32 to vector<1x256xf32>
    %255 = arith.mulf %254, %252 : vector<1x256xf32>
    %256 = arith.addf %224, %255 : vector<1x256xf32>
    %c16_i32_54 = arith.constant 16 : i32
    %257 = tpu.dynamic_rotate %41 by %c16_i32_54 dim 1 : vector<1x256xf32>, i32 -> vector<1x256xf32>
    %258 = arith.andi %60, %100 : vector<1x256xi1>
    %cst_55 = arith.constant 0.000000e+00 : f32
    %259 = vector.broadcast %cst_55 : f32 to vector<1x256xf32>
    %260 = arith.select %258, %257, %259 : vector<1x256xi1>, vector<1x256xf32>
    %c17 = arith.constant 17 : index
    %261 = memref.load %arg7[%c17] : memref<98xf32, #tpu.memory_space<smem>>
    %262 = vector.broadcast %261 : f32 to vector<1x256xf32>
    %263 = arith.mulf %262, %260 : vector<1x256xf32>
    %264 = arith.addf %232, %263 : vector<1x256xf32>
    %c15_i32_56 = arith.constant 15 : i32
    %265 = tpu.dynamic_rotate %41 by %c15_i32_56 dim 1 : vector<1x256xf32>, i32 -> vector<1x256xf32>
    %266 = arith.andi %60, %105 : vector<1x256xi1>
    %cst_57 = arith.constant 0.000000e+00 : f32
    %267 = vector.broadcast %cst_57 : f32 to vector<1x256xf32>
    %268 = arith.select %266, %265, %267 : vector<1x256xi1>, vector<1x256xf32>
    %c18 = arith.constant 18 : index
    %269 = memref.load %arg7[%c18] : memref<98xf32, #tpu.memory_space<smem>>
    %270 = vector.broadcast %269 : f32 to vector<1x256xf32>
    %271 = arith.mulf %270, %268 : vector<1x256xf32>
    %272 = arith.addf %240, %271 : vector<1x256xf32>
    %c14_i32_58 = arith.constant 14 : i32
    %273 = tpu.dynamic_rotate %41 by %c14_i32_58 dim 1 : vector<1x256xf32>, i32 -> vector<1x256xf32>
    %274 = arith.andi %60, %110 : vector<1x256xi1>
    %cst_59 = arith.constant 0.000000e+00 : f32
    %275 = vector.broadcast %cst_59 : f32 to vector<1x256xf32>
    %276 = arith.select %274, %273, %275 : vector<1x256xi1>, vector<1x256xf32>
    %c19 = arith.constant 19 : index
    %277 = memref.load %arg7[%c19] : memref<98xf32, #tpu.memory_space<smem>>
    %278 = vector.broadcast %277 : f32 to vector<1x256xf32>
    %279 = arith.mulf %278, %276 : vector<1x256xf32>
    %280 = arith.addf %248, %279 : vector<1x256xf32>
    %c13_i32_60 = arith.constant 13 : i32
    %281 = tpu.dynamic_rotate %41 by %c13_i32_60 dim 1 : vector<1x256xf32>, i32 -> vector<1x256xf32>
    %282 = arith.andi %60, %115 : vector<1x256xi1>
    %cst_61 = arith.constant 0.000000e+00 : f32
    %283 = vector.broadcast %cst_61 : f32 to vector<1x256xf32>
    %284 = arith.select %282, %281, %283 : vector<1x256xi1>, vector<1x256xf32>
    %c20 = arith.constant 20 : index
    %285 = memref.load %arg7[%c20] : memref<98xf32, #tpu.memory_space<smem>>
    %286 = vector.broadcast %285 : f32 to vector<1x256xf32>
    %287 = arith.mulf %286, %284 : vector<1x256xf32>
    %288 = arith.addf %256, %287 : vector<1x256xf32>
    %c3_i32_62 = arith.constant 3 : i32
    %289 = tpu.dynamic_rotate %41 by %c3_i32_62 dim 1 : vector<1x256xf32>, i32 -> vector<1x256xf32>
    %290 = arith.andi %65, %85 : vector<1x256xi1>
    %cst_63 = arith.constant 0.000000e+00 : f32
    %291 = vector.broadcast %cst_63 : f32 to vector<1x256xf32>
    %292 = arith.select %290, %289, %291 : vector<1x256xi1>, vector<1x256xf32>
    %c21 = arith.constant 21 : index
    %293 = memref.load %arg7[%c21] : memref<98xf32, #tpu.memory_space<smem>>
    %294 = vector.broadcast %293 : f32 to vector<1x256xf32>
    %295 = arith.mulf %294, %292 : vector<1x256xf32>
    %296 = arith.addf %264, %295 : vector<1x256xf32>
    %c2_i32_64 = arith.constant 2 : i32
    %297 = tpu.dynamic_rotate %41 by %c2_i32_64 dim 1 : vector<1x256xf32>, i32 -> vector<1x256xf32>
    %298 = arith.andi %65, %90 : vector<1x256xi1>
    %cst_65 = arith.constant 0.000000e+00 : f32
    %299 = vector.broadcast %cst_65 : f32 to vector<1x256xf32>
    %300 = arith.select %298, %297, %299 : vector<1x256xi1>, vector<1x256xf32>
    %c22 = arith.constant 22 : index
    %301 = memref.load %arg7[%c22] : memref<98xf32, #tpu.memory_space<smem>>
    %302 = vector.broadcast %301 : f32 to vector<1x256xf32>
    %303 = arith.mulf %302, %300 : vector<1x256xf32>
    %304 = arith.addf %272, %303 : vector<1x256xf32>
    %c1_i32_66 = arith.constant 1 : i32
    %305 = tpu.dynamic_rotate %41 by %c1_i32_66 dim 1 : vector<1x256xf32>, i32 -> vector<1x256xf32>
    %306 = arith.andi %65, %95 : vector<1x256xi1>
    %cst_67 = arith.constant 0.000000e+00 : f32
    %307 = vector.broadcast %cst_67 : f32 to vector<1x256xf32>
    %308 = arith.select %306, %305, %307 : vector<1x256xi1>, vector<1x256xf32>
    %c23 = arith.constant 23 : index
    %309 = memref.load %arg7[%c23] : memref<98xf32, #tpu.memory_space<smem>>
    %310 = vector.broadcast %309 : f32 to vector<1x256xf32>
    %311 = arith.mulf %310, %308 : vector<1x256xf32>
    %312 = arith.addf %280, %311 : vector<1x256xf32>
    %313 = arith.andi %65, %100 : vector<1x256xi1>
    %cst_68 = arith.constant 0.000000e+00 : f32
    %314 = vector.broadcast %cst_68 : f32 to vector<1x256xf32>
    %315 = arith.select %313, %41, %314 : vector<1x256xi1>, vector<1x256xf32>
    %c24 = arith.constant 24 : index
    %316 = memref.load %arg7[%c24] : memref<98xf32, #tpu.memory_space<smem>>
    %317 = vector.broadcast %316 : f32 to vector<1x256xf32>
    %318 = arith.mulf %317, %315 : vector<1x256xf32>
    %319 = arith.addf %288, %318 : vector<1x256xf32>
    %c255_i32 = arith.constant 255 : i32
    %320 = tpu.dynamic_rotate %41 by %c255_i32 dim 1 : vector<1x256xf32>, i32 -> vector<1x256xf32>
    %321 = arith.andi %65, %105 : vector<1x256xi1>
    %cst_69 = arith.constant 0.000000e+00 : f32
    %322 = vector.broadcast %cst_69 : f32 to vector<1x256xf32>
    %323 = arith.select %321, %320, %322 : vector<1x256xi1>, vector<1x256xf32>
    %c25 = arith.constant 25 : index
    %324 = memref.load %arg7[%c25] : memref<98xf32, #tpu.memory_space<smem>>
    %325 = vector.broadcast %324 : f32 to vector<1x256xf32>
    %326 = arith.mulf %325, %323 : vector<1x256xf32>
    %327 = arith.addf %296, %326 : vector<1x256xf32>
    %c254_i32 = arith.constant 254 : i32
    %328 = tpu.dynamic_rotate %41 by %c254_i32 dim 1 : vector<1x256xf32>, i32 -> vector<1x256xf32>
    %329 = arith.andi %65, %110 : vector<1x256xi1>
    %cst_70 = arith.constant 0.000000e+00 : f32
    %330 = vector.broadcast %cst_70 : f32 to vector<1x256xf32>
    %331 = arith.select %329, %328, %330 : vector<1x256xi1>, vector<1x256xf32>
    %c26 = arith.constant 26 : index
    %332 = memref.load %arg7[%c26] : memref<98xf32, #tpu.memory_space<smem>>
    %333 = vector.broadcast %332 : f32 to vector<1x256xf32>
    %334 = arith.mulf %333, %331 : vector<1x256xf32>
    %335 = arith.addf %304, %334 : vector<1x256xf32>
    %c253_i32 = arith.constant 253 : i32
    %336 = tpu.dynamic_rotate %41 by %c253_i32 dim 1 : vector<1x256xf32>, i32 -> vector<1x256xf32>
    %337 = arith.andi %65, %115 : vector<1x256xi1>
    %cst_71 = arith.constant 0.000000e+00 : f32
    %338 = vector.broadcast %cst_71 : f32 to vector<1x256xf32>
    %339 = arith.select %337, %336, %338 : vector<1x256xi1>, vector<1x256xf32>
    %c27 = arith.constant 27 : index
    %340 = memref.load %arg7[%c27] : memref<98xf32, #tpu.memory_space<smem>>
    %341 = vector.broadcast %340 : f32 to vector<1x256xf32>
    %342 = arith.mulf %341, %339 : vector<1x256xf32>
    %343 = arith.addf %312, %342 : vector<1x256xf32>
    %c243_i32 = arith.constant 243 : i32
    %344 = tpu.dynamic_rotate %41 by %c243_i32 dim 1 : vector<1x256xf32>, i32 -> vector<1x256xf32>
    %345 = arith.andi %70, %85 : vector<1x256xi1>
    %cst_72 = arith.constant 0.000000e+00 : f32
    %346 = vector.broadcast %cst_72 : f32 to vector<1x256xf32>
    %347 = arith.select %345, %344, %346 : vector<1x256xi1>, vector<1x256xf32>
    %c28 = arith.constant 28 : index
    %348 = memref.load %arg7[%c28] : memref<98xf32, #tpu.memory_space<smem>>
    %349 = vector.broadcast %348 : f32 to vector<1x256xf32>
    %350 = arith.mulf %349, %347 : vector<1x256xf32>
    %351 = arith.addf %319, %350 : vector<1x256xf32>
    %c242_i32 = arith.constant 242 : i32
    %352 = tpu.dynamic_rotate %41 by %c242_i32 dim 1 : vector<1x256xf32>, i32 -> vector<1x256xf32>
    %353 = arith.andi %70, %90 : vector<1x256xi1>
    %cst_73 = arith.constant 0.000000e+00 : f32
    %354 = vector.broadcast %cst_73 : f32 to vector<1x256xf32>
    %355 = arith.select %353, %352, %354 : vector<1x256xi1>, vector<1x256xf32>
    %c29 = arith.constant 29 : index
    %356 = memref.load %arg7[%c29] : memref<98xf32, #tpu.memory_space<smem>>
    %357 = vector.broadcast %356 : f32 to vector<1x256xf32>
    %358 = arith.mulf %357, %355 : vector<1x256xf32>
    %359 = arith.addf %327, %358 : vector<1x256xf32>
    %c241_i32 = arith.constant 241 : i32
    %360 = tpu.dynamic_rotate %41 by %c241_i32 dim 1 : vector<1x256xf32>, i32 -> vector<1x256xf32>
    %361 = arith.andi %70, %95 : vector<1x256xi1>
    %cst_74 = arith.constant 0.000000e+00 : f32
    %362 = vector.broadcast %cst_74 : f32 to vector<1x256xf32>
    %363 = arith.select %361, %360, %362 : vector<1x256xi1>, vector<1x256xf32>
    %c30 = arith.constant 30 : index
    %364 = memref.load %arg7[%c30] : memref<98xf32, #tpu.memory_space<smem>>
    %365 = vector.broadcast %364 : f32 to vector<1x256xf32>
    %366 = arith.mulf %365, %363 : vector<1x256xf32>
    %367 = arith.addf %335, %366 : vector<1x256xf32>
    %c240_i32_75 = arith.constant 240 : i32
    %368 = tpu.dynamic_rotate %41 by %c240_i32_75 dim 1 : vector<1x256xf32>, i32 -> vector<1x256xf32>
    %369 = arith.andi %70, %100 : vector<1x256xi1>
    %cst_76 = arith.constant 0.000000e+00 : f32
    %370 = vector.broadcast %cst_76 : f32 to vector<1x256xf32>
    %371 = arith.select %369, %368, %370 : vector<1x256xi1>, vector<1x256xf32>
    %c31 = arith.constant 31 : index
    %372 = memref.load %arg7[%c31] : memref<98xf32, #tpu.memory_space<smem>>
    %373 = vector.broadcast %372 : f32 to vector<1x256xf32>
    %374 = arith.mulf %373, %371 : vector<1x256xf32>
    %375 = arith.addf %343, %374 : vector<1x256xf32>
    %c239_i32 = arith.constant 239 : i32
    %376 = tpu.dynamic_rotate %41 by %c239_i32 dim 1 : vector<1x256xf32>, i32 -> vector<1x256xf32>
    %377 = arith.andi %70, %105 : vector<1x256xi1>
    %cst_77 = arith.constant 0.000000e+00 : f32
    %378 = vector.broadcast %cst_77 : f32 to vector<1x256xf32>
    %379 = arith.select %377, %376, %378 : vector<1x256xi1>, vector<1x256xf32>
    %c32 = arith.constant 32 : index
    %380 = memref.load %arg7[%c32] : memref<98xf32, #tpu.memory_space<smem>>
    %381 = vector.broadcast %380 : f32 to vector<1x256xf32>
    %382 = arith.mulf %381, %379 : vector<1x256xf32>
    %383 = arith.addf %351, %382 : vector<1x256xf32>
    %c238_i32 = arith.constant 238 : i32
    %384 = tpu.dynamic_rotate %41 by %c238_i32 dim 1 : vector<1x256xf32>, i32 -> vector<1x256xf32>
    %385 = arith.andi %70, %110 : vector<1x256xi1>
    %cst_78 = arith.constant 0.000000e+00 : f32
    %386 = vector.broadcast %cst_78 : f32 to vector<1x256xf32>
    %387 = arith.select %385, %384, %386 : vector<1x256xi1>, vector<1x256xf32>
    %c33 = arith.constant 33 : index
    %388 = memref.load %arg7[%c33] : memref<98xf32, #tpu.memory_space<smem>>
    %389 = vector.broadcast %388 : f32 to vector<1x256xf32>
    %390 = arith.mulf %389, %387 : vector<1x256xf32>
    %391 = arith.addf %359, %390 : vector<1x256xf32>
    %c237_i32 = arith.constant 237 : i32
    %392 = tpu.dynamic_rotate %41 by %c237_i32 dim 1 : vector<1x256xf32>, i32 -> vector<1x256xf32>
    %393 = arith.andi %70, %115 : vector<1x256xi1>
    %cst_79 = arith.constant 0.000000e+00 : f32
    %394 = vector.broadcast %cst_79 : f32 to vector<1x256xf32>
    %395 = arith.select %393, %392, %394 : vector<1x256xi1>, vector<1x256xf32>
    %c34 = arith.constant 34 : index
    %396 = memref.load %arg7[%c34] : memref<98xf32, #tpu.memory_space<smem>>
    %397 = vector.broadcast %396 : f32 to vector<1x256xf32>
    %398 = arith.mulf %397, %395 : vector<1x256xf32>
    %399 = arith.addf %367, %398 : vector<1x256xf32>
    %c227_i32 = arith.constant 227 : i32
    %400 = tpu.dynamic_rotate %41 by %c227_i32 dim 1 : vector<1x256xf32>, i32 -> vector<1x256xf32>
    %401 = arith.andi %75, %85 : vector<1x256xi1>
    %cst_80 = arith.constant 0.000000e+00 : f32
    %402 = vector.broadcast %cst_80 : f32 to vector<1x256xf32>
    %403 = arith.select %401, %400, %402 : vector<1x256xi1>, vector<1x256xf32>
    %c35 = arith.constant 35 : index
    %404 = memref.load %arg7[%c35] : memref<98xf32, #tpu.memory_space<smem>>
    %405 = vector.broadcast %404 : f32 to vector<1x256xf32>
    %406 = arith.mulf %405, %403 : vector<1x256xf32>
    %407 = arith.addf %375, %406 : vector<1x256xf32>
    %c226_i32 = arith.constant 226 : i32
    %408 = tpu.dynamic_rotate %41 by %c226_i32 dim 1 : vector<1x256xf32>, i32 -> vector<1x256xf32>
    %409 = arith.andi %75, %90 : vector<1x256xi1>
    %cst_81 = arith.constant 0.000000e+00 : f32
    %410 = vector.broadcast %cst_81 : f32 to vector<1x256xf32>
    %411 = arith.select %409, %408, %410 : vector<1x256xi1>, vector<1x256xf32>
    %c36 = arith.constant 36 : index
    %412 = memref.load %arg7[%c36] : memref<98xf32, #tpu.memory_space<smem>>
    %413 = vector.broadcast %412 : f32 to vector<1x256xf32>
    %414 = arith.mulf %413, %411 : vector<1x256xf32>
    %415 = arith.addf %383, %414 : vector<1x256xf32>
    %c225_i32 = arith.constant 225 : i32
    %416 = tpu.dynamic_rotate %41 by %c225_i32 dim 1 : vector<1x256xf32>, i32 -> vector<1x256xf32>
    %417 = arith.andi %75, %95 : vector<1x256xi1>
    %cst_82 = arith.constant 0.000000e+00 : f32
    %418 = vector.broadcast %cst_82 : f32 to vector<1x256xf32>
    %419 = arith.select %417, %416, %418 : vector<1x256xi1>, vector<1x256xf32>
    %c37 = arith.constant 37 : index
    %420 = memref.load %arg7[%c37] : memref<98xf32, #tpu.memory_space<smem>>
    %421 = vector.broadcast %420 : f32 to vector<1x256xf32>
    %422 = arith.mulf %421, %419 : vector<1x256xf32>
    %423 = arith.addf %391, %422 : vector<1x256xf32>
    %c224_i32_83 = arith.constant 224 : i32
    %424 = tpu.dynamic_rotate %41 by %c224_i32_83 dim 1 : vector<1x256xf32>, i32 -> vector<1x256xf32>
    %425 = arith.andi %75, %100 : vector<1x256xi1>
    %cst_84 = arith.constant 0.000000e+00 : f32
    %426 = vector.broadcast %cst_84 : f32 to vector<1x256xf32>
    %427 = arith.select %425, %424, %426 : vector<1x256xi1>, vector<1x256xf32>
    %c38 = arith.constant 38 : index
    %428 = memref.load %arg7[%c38] : memref<98xf32, #tpu.memory_space<smem>>
    %429 = vector.broadcast %428 : f32 to vector<1x256xf32>
    %430 = arith.mulf %429, %427 : vector<1x256xf32>
    %431 = arith.addf %399, %430 : vector<1x256xf32>
    %c223_i32 = arith.constant 223 : i32
    %432 = tpu.dynamic_rotate %41 by %c223_i32 dim 1 : vector<1x256xf32>, i32 -> vector<1x256xf32>
    %433 = arith.andi %75, %105 : vector<1x256xi1>
    %cst_85 = arith.constant 0.000000e+00 : f32
    %434 = vector.broadcast %cst_85 : f32 to vector<1x256xf32>
    %435 = arith.select %433, %432, %434 : vector<1x256xi1>, vector<1x256xf32>
    %c39 = arith.constant 39 : index
    %436 = memref.load %arg7[%c39] : memref<98xf32, #tpu.memory_space<smem>>
    %437 = vector.broadcast %436 : f32 to vector<1x256xf32>
    %438 = arith.mulf %437, %435 : vector<1x256xf32>
    %439 = arith.addf %407, %438 : vector<1x256xf32>
    %c222_i32 = arith.constant 222 : i32
    %440 = tpu.dynamic_rotate %41 by %c222_i32 dim 1 : vector<1x256xf32>, i32 -> vector<1x256xf32>
    %441 = arith.andi %75, %110 : vector<1x256xi1>
    %cst_86 = arith.constant 0.000000e+00 : f32
    %442 = vector.broadcast %cst_86 : f32 to vector<1x256xf32>
    %443 = arith.select %441, %440, %442 : vector<1x256xi1>, vector<1x256xf32>
    %c40 = arith.constant 40 : index
    %444 = memref.load %arg7[%c40] : memref<98xf32, #tpu.memory_space<smem>>
    %445 = vector.broadcast %444 : f32 to vector<1x256xf32>
    %446 = arith.mulf %445, %443 : vector<1x256xf32>
    %447 = arith.addf %415, %446 : vector<1x256xf32>
    %c221_i32 = arith.constant 221 : i32
    %448 = tpu.dynamic_rotate %41 by %c221_i32 dim 1 : vector<1x256xf32>, i32 -> vector<1x256xf32>
    %449 = arith.andi %75, %115 : vector<1x256xi1>
    %cst_87 = arith.constant 0.000000e+00 : f32
    %450 = vector.broadcast %cst_87 : f32 to vector<1x256xf32>
    %451 = arith.select %449, %448, %450 : vector<1x256xi1>, vector<1x256xf32>
    %c41 = arith.constant 41 : index
    %452 = memref.load %arg7[%c41] : memref<98xf32, #tpu.memory_space<smem>>
    %453 = vector.broadcast %452 : f32 to vector<1x256xf32>
    %454 = arith.mulf %453, %451 : vector<1x256xf32>
    %455 = arith.addf %423, %454 : vector<1x256xf32>
    %c211_i32 = arith.constant 211 : i32
    %456 = tpu.dynamic_rotate %41 by %c211_i32 dim 1 : vector<1x256xf32>, i32 -> vector<1x256xf32>
    %457 = arith.andi %80, %85 : vector<1x256xi1>
    %cst_88 = arith.constant 0.000000e+00 : f32
    %458 = vector.broadcast %cst_88 : f32 to vector<1x256xf32>
    %459 = arith.select %457, %456, %458 : vector<1x256xi1>, vector<1x256xf32>
    %c42 = arith.constant 42 : index
    %460 = memref.load %arg7[%c42] : memref<98xf32, #tpu.memory_space<smem>>
    %461 = vector.broadcast %460 : f32 to vector<1x256xf32>
    %462 = arith.mulf %461, %459 : vector<1x256xf32>
    %463 = arith.addf %431, %462 : vector<1x256xf32>
    %c210_i32 = arith.constant 210 : i32
    %464 = tpu.dynamic_rotate %41 by %c210_i32 dim 1 : vector<1x256xf32>, i32 -> vector<1x256xf32>
    %465 = arith.andi %80, %90 : vector<1x256xi1>
    %cst_89 = arith.constant 0.000000e+00 : f32
    %466 = vector.broadcast %cst_89 : f32 to vector<1x256xf32>
    %467 = arith.select %465, %464, %466 : vector<1x256xi1>, vector<1x256xf32>
    %c43 = arith.constant 43 : index
    %468 = memref.load %arg7[%c43] : memref<98xf32, #tpu.memory_space<smem>>
    %469 = vector.broadcast %468 : f32 to vector<1x256xf32>
    %470 = arith.mulf %469, %467 : vector<1x256xf32>
    %471 = arith.addf %439, %470 : vector<1x256xf32>
    %c209_i32 = arith.constant 209 : i32
    %472 = tpu.dynamic_rotate %41 by %c209_i32 dim 1 : vector<1x256xf32>, i32 -> vector<1x256xf32>
    %473 = arith.andi %80, %95 : vector<1x256xi1>
    %cst_90 = arith.constant 0.000000e+00 : f32
    %474 = vector.broadcast %cst_90 : f32 to vector<1x256xf32>
    %475 = arith.select %473, %472, %474 : vector<1x256xi1>, vector<1x256xf32>
    %c44 = arith.constant 44 : index
    %476 = memref.load %arg7[%c44] : memref<98xf32, #tpu.memory_space<smem>>
    %477 = vector.broadcast %476 : f32 to vector<1x256xf32>
    %478 = arith.mulf %477, %475 : vector<1x256xf32>
    %479 = arith.addf %447, %478 : vector<1x256xf32>
    %c208_i32_91 = arith.constant 208 : i32
    %480 = tpu.dynamic_rotate %41 by %c208_i32_91 dim 1 : vector<1x256xf32>, i32 -> vector<1x256xf32>
    %481 = arith.andi %80, %100 : vector<1x256xi1>
    %cst_92 = arith.constant 0.000000e+00 : f32
    %482 = vector.broadcast %cst_92 : f32 to vector<1x256xf32>
    %483 = arith.select %481, %480, %482 : vector<1x256xi1>, vector<1x256xf32>
    %c45 = arith.constant 45 : index
    %484 = memref.load %arg7[%c45] : memref<98xf32, #tpu.memory_space<smem>>
    %485 = vector.broadcast %484 : f32 to vector<1x256xf32>
    %486 = arith.mulf %485, %483 : vector<1x256xf32>
    %487 = arith.addf %455, %486 : vector<1x256xf32>
    %c207_i32 = arith.constant 207 : i32
    %488 = tpu.dynamic_rotate %41 by %c207_i32 dim 1 : vector<1x256xf32>, i32 -> vector<1x256xf32>
    %489 = arith.andi %80, %105 : vector<1x256xi1>
    %cst_93 = arith.constant 0.000000e+00 : f32
    %490 = vector.broadcast %cst_93 : f32 to vector<1x256xf32>
    %491 = arith.select %489, %488, %490 : vector<1x256xi1>, vector<1x256xf32>
    %c46 = arith.constant 46 : index
    %492 = memref.load %arg7[%c46] : memref<98xf32, #tpu.memory_space<smem>>
    %493 = vector.broadcast %492 : f32 to vector<1x256xf32>
    %494 = arith.mulf %493, %491 : vector<1x256xf32>
    %495 = arith.addf %463, %494 : vector<1x256xf32>
    %c206_i32 = arith.constant 206 : i32
    %496 = tpu.dynamic_rotate %41 by %c206_i32 dim 1 : vector<1x256xf32>, i32 -> vector<1x256xf32>
    %497 = arith.andi %80, %110 : vector<1x256xi1>
    %cst_94 = arith.constant 0.000000e+00 : f32
    %498 = vector.broadcast %cst_94 : f32 to vector<1x256xf32>
    %499 = arith.select %497, %496, %498 : vector<1x256xi1>, vector<1x256xf32>
    %c47 = arith.constant 47 : index
    %500 = memref.load %arg7[%c47] : memref<98xf32, #tpu.memory_space<smem>>
    %501 = vector.broadcast %500 : f32 to vector<1x256xf32>
    %502 = arith.mulf %501, %499 : vector<1x256xf32>
    %503 = arith.addf %471, %502 : vector<1x256xf32>
    %c205_i32 = arith.constant 205 : i32
    %504 = tpu.dynamic_rotate %41 by %c205_i32 dim 1 : vector<1x256xf32>, i32 -> vector<1x256xf32>
    %505 = arith.andi %80, %115 : vector<1x256xi1>
    %cst_95 = arith.constant 0.000000e+00 : f32
    %506 = vector.broadcast %cst_95 : f32 to vector<1x256xf32>
    %507 = arith.select %505, %504, %506 : vector<1x256xi1>, vector<1x256xf32>
    %c48 = arith.constant 48 : index
    %508 = memref.load %arg7[%c48] : memref<98xf32, #tpu.memory_space<smem>>
    %509 = vector.broadcast %508 : f32 to vector<1x256xf32>
    %510 = arith.mulf %509, %507 : vector<1x256xf32>
    %511 = arith.addf %479, %510 : vector<1x256xf32>
    %c51_i32_96 = arith.constant 51 : i32
    %512 = tpu.dynamic_rotate %43 by %c51_i32_96 dim 1 : vector<1x256xf32>, i32 -> vector<1x256xf32>
    %513 = arith.andi %50, %85 : vector<1x256xi1>
    %cst_97 = arith.constant 0.000000e+00 : f32
    %514 = vector.broadcast %cst_97 : f32 to vector<1x256xf32>
    %515 = arith.select %513, %512, %514 : vector<1x256xi1>, vector<1x256xf32>
    %c49 = arith.constant 49 : index
    %516 = memref.load %arg7[%c49] : memref<98xf32, #tpu.memory_space<smem>>
    %517 = vector.broadcast %516 : f32 to vector<1x256xf32>
    %518 = arith.mulf %517, %515 : vector<1x256xf32>
    %519 = arith.addf %487, %518 : vector<1x256xf32>
    %c50_i32_98 = arith.constant 50 : i32
    %520 = tpu.dynamic_rotate %43 by %c50_i32_98 dim 1 : vector<1x256xf32>, i32 -> vector<1x256xf32>
    %521 = arith.andi %50, %90 : vector<1x256xi1>
    %cst_99 = arith.constant 0.000000e+00 : f32
    %522 = vector.broadcast %cst_99 : f32 to vector<1x256xf32>
    %523 = arith.select %521, %520, %522 : vector<1x256xi1>, vector<1x256xf32>
    %c50 = arith.constant 50 : index
    %524 = memref.load %arg7[%c50] : memref<98xf32, #tpu.memory_space<smem>>
    %525 = vector.broadcast %524 : f32 to vector<1x256xf32>
    %526 = arith.mulf %525, %523 : vector<1x256xf32>
    %527 = arith.addf %495, %526 : vector<1x256xf32>
    %c49_i32_100 = arith.constant 49 : i32
    %528 = tpu.dynamic_rotate %43 by %c49_i32_100 dim 1 : vector<1x256xf32>, i32 -> vector<1x256xf32>
    %529 = arith.andi %50, %95 : vector<1x256xi1>
    %cst_101 = arith.constant 0.000000e+00 : f32
    %530 = vector.broadcast %cst_101 : f32 to vector<1x256xf32>
    %531 = arith.select %529, %528, %530 : vector<1x256xi1>, vector<1x256xf32>
    %c51 = arith.constant 51 : index
    %532 = memref.load %arg7[%c51] : memref<98xf32, #tpu.memory_space<smem>>
    %533 = vector.broadcast %532 : f32 to vector<1x256xf32>
    %534 = arith.mulf %533, %531 : vector<1x256xf32>
    %535 = arith.addf %503, %534 : vector<1x256xf32>
    %c48_i32_102 = arith.constant 48 : i32
    %536 = tpu.dynamic_rotate %43 by %c48_i32_102 dim 1 : vector<1x256xf32>, i32 -> vector<1x256xf32>
    %537 = arith.andi %50, %100 : vector<1x256xi1>
    %cst_103 = arith.constant 0.000000e+00 : f32
    %538 = vector.broadcast %cst_103 : f32 to vector<1x256xf32>
    %539 = arith.select %537, %536, %538 : vector<1x256xi1>, vector<1x256xf32>
    %c52 = arith.constant 52 : index
    %540 = memref.load %arg7[%c52] : memref<98xf32, #tpu.memory_space<smem>>
    %541 = vector.broadcast %540 : f32 to vector<1x256xf32>
    %542 = arith.mulf %541, %539 : vector<1x256xf32>
    %543 = arith.addf %511, %542 : vector<1x256xf32>
    %c47_i32_104 = arith.constant 47 : i32
    %544 = tpu.dynamic_rotate %43 by %c47_i32_104 dim 1 : vector<1x256xf32>, i32 -> vector<1x256xf32>
    %545 = arith.andi %50, %105 : vector<1x256xi1>
    %cst_105 = arith.constant 0.000000e+00 : f32
    %546 = vector.broadcast %cst_105 : f32 to vector<1x256xf32>
    %547 = arith.select %545, %544, %546 : vector<1x256xi1>, vector<1x256xf32>
    %c53 = arith.constant 53 : index
    %548 = memref.load %arg7[%c53] : memref<98xf32, #tpu.memory_space<smem>>
    %549 = vector.broadcast %548 : f32 to vector<1x256xf32>
    %550 = arith.mulf %549, %547 : vector<1x256xf32>
    %551 = arith.addf %519, %550 : vector<1x256xf32>
    %c46_i32_106 = arith.constant 46 : i32
    %552 = tpu.dynamic_rotate %43 by %c46_i32_106 dim 1 : vector<1x256xf32>, i32 -> vector<1x256xf32>
    %553 = arith.andi %50, %110 : vector<1x256xi1>
    %cst_107 = arith.constant 0.000000e+00 : f32
    %554 = vector.broadcast %cst_107 : f32 to vector<1x256xf32>
    %555 = arith.select %553, %552, %554 : vector<1x256xi1>, vector<1x256xf32>
    %c54 = arith.constant 54 : index
    %556 = memref.load %arg7[%c54] : memref<98xf32, #tpu.memory_space<smem>>
    %557 = vector.broadcast %556 : f32 to vector<1x256xf32>
    %558 = arith.mulf %557, %555 : vector<1x256xf32>
    %559 = arith.addf %527, %558 : vector<1x256xf32>
    %c45_i32_108 = arith.constant 45 : i32
    %560 = tpu.dynamic_rotate %43 by %c45_i32_108 dim 1 : vector<1x256xf32>, i32 -> vector<1x256xf32>
    %561 = arith.andi %50, %115 : vector<1x256xi1>
    %cst_109 = arith.constant 0.000000e+00 : f32
    %562 = vector.broadcast %cst_109 : f32 to vector<1x256xf32>
    %563 = arith.select %561, %560, %562 : vector<1x256xi1>, vector<1x256xf32>
    %c55 = arith.constant 55 : index
    %564 = memref.load %arg7[%c55] : memref<98xf32, #tpu.memory_space<smem>>
    %565 = vector.broadcast %564 : f32 to vector<1x256xf32>
    %566 = arith.mulf %565, %563 : vector<1x256xf32>
    %567 = arith.addf %535, %566 : vector<1x256xf32>
    %c35_i32_110 = arith.constant 35 : i32
    %568 = tpu.dynamic_rotate %43 by %c35_i32_110 dim 1 : vector<1x256xf32>, i32 -> vector<1x256xf32>
    %569 = arith.andi %55, %85 : vector<1x256xi1>
    %cst_111 = arith.constant 0.000000e+00 : f32
    %570 = vector.broadcast %cst_111 : f32 to vector<1x256xf32>
    %571 = arith.select %569, %568, %570 : vector<1x256xi1>, vector<1x256xf32>
    %c56 = arith.constant 56 : index
    %572 = memref.load %arg7[%c56] : memref<98xf32, #tpu.memory_space<smem>>
    %573 = vector.broadcast %572 : f32 to vector<1x256xf32>
    %574 = arith.mulf %573, %571 : vector<1x256xf32>
    %575 = arith.addf %543, %574 : vector<1x256xf32>
    %c34_i32_112 = arith.constant 34 : i32
    %576 = tpu.dynamic_rotate %43 by %c34_i32_112 dim 1 : vector<1x256xf32>, i32 -> vector<1x256xf32>
    %577 = arith.andi %55, %90 : vector<1x256xi1>
    %cst_113 = arith.constant 0.000000e+00 : f32
    %578 = vector.broadcast %cst_113 : f32 to vector<1x256xf32>
    %579 = arith.select %577, %576, %578 : vector<1x256xi1>, vector<1x256xf32>
    %c57 = arith.constant 57 : index
    %580 = memref.load %arg7[%c57] : memref<98xf32, #tpu.memory_space<smem>>
    %581 = vector.broadcast %580 : f32 to vector<1x256xf32>
    %582 = arith.mulf %581, %579 : vector<1x256xf32>
    %583 = arith.addf %551, %582 : vector<1x256xf32>
    %c33_i32_114 = arith.constant 33 : i32
    %584 = tpu.dynamic_rotate %43 by %c33_i32_114 dim 1 : vector<1x256xf32>, i32 -> vector<1x256xf32>
    %585 = arith.andi %55, %95 : vector<1x256xi1>
    %cst_115 = arith.constant 0.000000e+00 : f32
    %586 = vector.broadcast %cst_115 : f32 to vector<1x256xf32>
    %587 = arith.select %585, %584, %586 : vector<1x256xi1>, vector<1x256xf32>
    %c58 = arith.constant 58 : index
    %588 = memref.load %arg7[%c58] : memref<98xf32, #tpu.memory_space<smem>>
    %589 = vector.broadcast %588 : f32 to vector<1x256xf32>
    %590 = arith.mulf %589, %587 : vector<1x256xf32>
    %591 = arith.addf %559, %590 : vector<1x256xf32>
    %c32_i32_116 = arith.constant 32 : i32
    %592 = tpu.dynamic_rotate %43 by %c32_i32_116 dim 1 : vector<1x256xf32>, i32 -> vector<1x256xf32>
    %593 = arith.andi %55, %100 : vector<1x256xi1>
    %cst_117 = arith.constant 0.000000e+00 : f32
    %594 = vector.broadcast %cst_117 : f32 to vector<1x256xf32>
    %595 = arith.select %593, %592, %594 : vector<1x256xi1>, vector<1x256xf32>
    %c59 = arith.constant 59 : index
    %596 = memref.load %arg7[%c59] : memref<98xf32, #tpu.memory_space<smem>>
    %597 = vector.broadcast %596 : f32 to vector<1x256xf32>
    %598 = arith.mulf %597, %595 : vector<1x256xf32>
    %599 = arith.addf %567, %598 : vector<1x256xf32>
    %c31_i32_118 = arith.constant 31 : i32
    %600 = tpu.dynamic_rotate %43 by %c31_i32_118 dim 1 : vector<1x256xf32>, i32 -> vector<1x256xf32>
    %601 = arith.andi %55, %105 : vector<1x256xi1>
    %cst_119 = arith.constant 0.000000e+00 : f32
    %602 = vector.broadcast %cst_119 : f32 to vector<1x256xf32>
    %603 = arith.select %601, %600, %602 : vector<1x256xi1>, vector<1x256xf32>
    %c60 = arith.constant 60 : index
    %604 = memref.load %arg7[%c60] : memref<98xf32, #tpu.memory_space<smem>>
    %605 = vector.broadcast %604 : f32 to vector<1x256xf32>
    %606 = arith.mulf %605, %603 : vector<1x256xf32>
    %607 = arith.addf %575, %606 : vector<1x256xf32>
    %c30_i32_120 = arith.constant 30 : i32
    %608 = tpu.dynamic_rotate %43 by %c30_i32_120 dim 1 : vector<1x256xf32>, i32 -> vector<1x256xf32>
    %609 = arith.andi %55, %110 : vector<1x256xi1>
    %cst_121 = arith.constant 0.000000e+00 : f32
    %610 = vector.broadcast %cst_121 : f32 to vector<1x256xf32>
    %611 = arith.select %609, %608, %610 : vector<1x256xi1>, vector<1x256xf32>
    %c61 = arith.constant 61 : index
    %612 = memref.load %arg7[%c61] : memref<98xf32, #tpu.memory_space<smem>>
    %613 = vector.broadcast %612 : f32 to vector<1x256xf32>
    %614 = arith.mulf %613, %611 : vector<1x256xf32>
    %615 = arith.addf %583, %614 : vector<1x256xf32>
    %c29_i32_122 = arith.constant 29 : i32
    %616 = tpu.dynamic_rotate %43 by %c29_i32_122 dim 1 : vector<1x256xf32>, i32 -> vector<1x256xf32>
    %617 = arith.andi %55, %115 : vector<1x256xi1>
    %cst_123 = arith.constant 0.000000e+00 : f32
    %618 = vector.broadcast %cst_123 : f32 to vector<1x256xf32>
    %619 = arith.select %617, %616, %618 : vector<1x256xi1>, vector<1x256xf32>
    %c62 = arith.constant 62 : index
    %620 = memref.load %arg7[%c62] : memref<98xf32, #tpu.memory_space<smem>>
    %621 = vector.broadcast %620 : f32 to vector<1x256xf32>
    %622 = arith.mulf %621, %619 : vector<1x256xf32>
    %623 = arith.addf %591, %622 : vector<1x256xf32>
    %c19_i32_124 = arith.constant 19 : i32
    %624 = tpu.dynamic_rotate %43 by %c19_i32_124 dim 1 : vector<1x256xf32>, i32 -> vector<1x256xf32>
    %625 = arith.andi %60, %85 : vector<1x256xi1>
    %cst_125 = arith.constant 0.000000e+00 : f32
    %626 = vector.broadcast %cst_125 : f32 to vector<1x256xf32>
    %627 = arith.select %625, %624, %626 : vector<1x256xi1>, vector<1x256xf32>
    %c63 = arith.constant 63 : index
    %628 = memref.load %arg7[%c63] : memref<98xf32, #tpu.memory_space<smem>>
    %629 = vector.broadcast %628 : f32 to vector<1x256xf32>
    %630 = arith.mulf %629, %627 : vector<1x256xf32>
    %631 = arith.addf %599, %630 : vector<1x256xf32>
    %c18_i32_126 = arith.constant 18 : i32
    %632 = tpu.dynamic_rotate %43 by %c18_i32_126 dim 1 : vector<1x256xf32>, i32 -> vector<1x256xf32>
    %633 = arith.andi %60, %90 : vector<1x256xi1>
    %cst_127 = arith.constant 0.000000e+00 : f32
    %634 = vector.broadcast %cst_127 : f32 to vector<1x256xf32>
    %635 = arith.select %633, %632, %634 : vector<1x256xi1>, vector<1x256xf32>
    %c64 = arith.constant 64 : index
    %636 = memref.load %arg7[%c64] : memref<98xf32, #tpu.memory_space<smem>>
    %637 = vector.broadcast %636 : f32 to vector<1x256xf32>
    %638 = arith.mulf %637, %635 : vector<1x256xf32>
    %639 = arith.addf %607, %638 : vector<1x256xf32>
    %c17_i32_128 = arith.constant 17 : i32
    %640 = tpu.dynamic_rotate %43 by %c17_i32_128 dim 1 : vector<1x256xf32>, i32 -> vector<1x256xf32>
    %641 = arith.andi %60, %95 : vector<1x256xi1>
    %cst_129 = arith.constant 0.000000e+00 : f32
    %642 = vector.broadcast %cst_129 : f32 to vector<1x256xf32>
    %643 = arith.select %641, %640, %642 : vector<1x256xi1>, vector<1x256xf32>
    %c65 = arith.constant 65 : index
    %644 = memref.load %arg7[%c65] : memref<98xf32, #tpu.memory_space<smem>>
    %645 = vector.broadcast %644 : f32 to vector<1x256xf32>
    %646 = arith.mulf %645, %643 : vector<1x256xf32>
    %647 = arith.addf %615, %646 : vector<1x256xf32>
    %c16_i32_130 = arith.constant 16 : i32
    %648 = tpu.dynamic_rotate %43 by %c16_i32_130 dim 1 : vector<1x256xf32>, i32 -> vector<1x256xf32>
    %649 = arith.andi %60, %100 : vector<1x256xi1>
    %cst_131 = arith.constant 0.000000e+00 : f32
    %650 = vector.broadcast %cst_131 : f32 to vector<1x256xf32>
    %651 = arith.select %649, %648, %650 : vector<1x256xi1>, vector<1x256xf32>
    %c66 = arith.constant 66 : index
    %652 = memref.load %arg7[%c66] : memref<98xf32, #tpu.memory_space<smem>>
    %653 = vector.broadcast %652 : f32 to vector<1x256xf32>
    %654 = arith.mulf %653, %651 : vector<1x256xf32>
    %655 = arith.addf %623, %654 : vector<1x256xf32>
    %c15_i32_132 = arith.constant 15 : i32
    %656 = tpu.dynamic_rotate %43 by %c15_i32_132 dim 1 : vector<1x256xf32>, i32 -> vector<1x256xf32>
    %657 = arith.andi %60, %105 : vector<1x256xi1>
    %cst_133 = arith.constant 0.000000e+00 : f32
    %658 = vector.broadcast %cst_133 : f32 to vector<1x256xf32>
    %659 = arith.select %657, %656, %658 : vector<1x256xi1>, vector<1x256xf32>
    %c67 = arith.constant 67 : index
    %660 = memref.load %arg7[%c67] : memref<98xf32, #tpu.memory_space<smem>>
    %661 = vector.broadcast %660 : f32 to vector<1x256xf32>
    %662 = arith.mulf %661, %659 : vector<1x256xf32>
    %663 = arith.addf %631, %662 : vector<1x256xf32>
    %c14_i32_134 = arith.constant 14 : i32
    %664 = tpu.dynamic_rotate %43 by %c14_i32_134 dim 1 : vector<1x256xf32>, i32 -> vector<1x256xf32>
    %665 = arith.andi %60, %110 : vector<1x256xi1>
    %cst_135 = arith.constant 0.000000e+00 : f32
    %666 = vector.broadcast %cst_135 : f32 to vector<1x256xf32>
    %667 = arith.select %665, %664, %666 : vector<1x256xi1>, vector<1x256xf32>
    %c68 = arith.constant 68 : index
    %668 = memref.load %arg7[%c68] : memref<98xf32, #tpu.memory_space<smem>>
    %669 = vector.broadcast %668 : f32 to vector<1x256xf32>
    %670 = arith.mulf %669, %667 : vector<1x256xf32>
    %671 = arith.addf %639, %670 : vector<1x256xf32>
    %c13_i32_136 = arith.constant 13 : i32
    %672 = tpu.dynamic_rotate %43 by %c13_i32_136 dim 1 : vector<1x256xf32>, i32 -> vector<1x256xf32>
    %673 = arith.andi %60, %115 : vector<1x256xi1>
    %cst_137 = arith.constant 0.000000e+00 : f32
    %674 = vector.broadcast %cst_137 : f32 to vector<1x256xf32>
    %675 = arith.select %673, %672, %674 : vector<1x256xi1>, vector<1x256xf32>
    %c69 = arith.constant 69 : index
    %676 = memref.load %arg7[%c69] : memref<98xf32, #tpu.memory_space<smem>>
    %677 = vector.broadcast %676 : f32 to vector<1x256xf32>
    %678 = arith.mulf %677, %675 : vector<1x256xf32>
    %679 = arith.addf %647, %678 : vector<1x256xf32>
    %c3_i32_138 = arith.constant 3 : i32
    %680 = tpu.dynamic_rotate %43 by %c3_i32_138 dim 1 : vector<1x256xf32>, i32 -> vector<1x256xf32>
    %681 = arith.andi %65, %85 : vector<1x256xi1>
    %cst_139 = arith.constant 0.000000e+00 : f32
    %682 = vector.broadcast %cst_139 : f32 to vector<1x256xf32>
    %683 = arith.select %681, %680, %682 : vector<1x256xi1>, vector<1x256xf32>
    %c70 = arith.constant 70 : index
    %684 = memref.load %arg7[%c70] : memref<98xf32, #tpu.memory_space<smem>>
    %685 = vector.broadcast %684 : f32 to vector<1x256xf32>
    %686 = arith.mulf %685, %683 : vector<1x256xf32>
    %687 = arith.addf %655, %686 : vector<1x256xf32>
    %c2_i32_140 = arith.constant 2 : i32
    %688 = tpu.dynamic_rotate %43 by %c2_i32_140 dim 1 : vector<1x256xf32>, i32 -> vector<1x256xf32>
    %689 = arith.andi %65, %90 : vector<1x256xi1>
    %cst_141 = arith.constant 0.000000e+00 : f32
    %690 = vector.broadcast %cst_141 : f32 to vector<1x256xf32>
    %691 = arith.select %689, %688, %690 : vector<1x256xi1>, vector<1x256xf32>
    %c71 = arith.constant 71 : index
    %692 = memref.load %arg7[%c71] : memref<98xf32, #tpu.memory_space<smem>>
    %693 = vector.broadcast %692 : f32 to vector<1x256xf32>
    %694 = arith.mulf %693, %691 : vector<1x256xf32>
    %695 = arith.addf %663, %694 : vector<1x256xf32>
    %c1_i32_142 = arith.constant 1 : i32
    %696 = tpu.dynamic_rotate %43 by %c1_i32_142 dim 1 : vector<1x256xf32>, i32 -> vector<1x256xf32>
    %697 = arith.andi %65, %95 : vector<1x256xi1>
    %cst_143 = arith.constant 0.000000e+00 : f32
    %698 = vector.broadcast %cst_143 : f32 to vector<1x256xf32>
    %699 = arith.select %697, %696, %698 : vector<1x256xi1>, vector<1x256xf32>
    %c72 = arith.constant 72 : index
    %700 = memref.load %arg7[%c72] : memref<98xf32, #tpu.memory_space<smem>>
    %701 = vector.broadcast %700 : f32 to vector<1x256xf32>
    %702 = arith.mulf %701, %699 : vector<1x256xf32>
    %703 = arith.addf %671, %702 : vector<1x256xf32>
    %704 = arith.andi %65, %100 : vector<1x256xi1>
    %cst_144 = arith.constant 0.000000e+00 : f32
    %705 = vector.broadcast %cst_144 : f32 to vector<1x256xf32>
    %706 = arith.select %704, %43, %705 : vector<1x256xi1>, vector<1x256xf32>
    %c73 = arith.constant 73 : index
    %707 = memref.load %arg7[%c73] : memref<98xf32, #tpu.memory_space<smem>>
    %708 = vector.broadcast %707 : f32 to vector<1x256xf32>
    %709 = arith.mulf %708, %706 : vector<1x256xf32>
    %710 = arith.addf %679, %709 : vector<1x256xf32>
    %c255_i32_145 = arith.constant 255 : i32
    %711 = tpu.dynamic_rotate %43 by %c255_i32_145 dim 1 : vector<1x256xf32>, i32 -> vector<1x256xf32>
    %712 = arith.andi %65, %105 : vector<1x256xi1>
    %cst_146 = arith.constant 0.000000e+00 : f32
    %713 = vector.broadcast %cst_146 : f32 to vector<1x256xf32>
    %714 = arith.select %712, %711, %713 : vector<1x256xi1>, vector<1x256xf32>
    %c74 = arith.constant 74 : index
    %715 = memref.load %arg7[%c74] : memref<98xf32, #tpu.memory_space<smem>>
    %716 = vector.broadcast %715 : f32 to vector<1x256xf32>
    %717 = arith.mulf %716, %714 : vector<1x256xf32>
    %718 = arith.addf %687, %717 : vector<1x256xf32>
    %c254_i32_147 = arith.constant 254 : i32
    %719 = tpu.dynamic_rotate %43 by %c254_i32_147 dim 1 : vector<1x256xf32>, i32 -> vector<1x256xf32>
    %720 = arith.andi %65, %110 : vector<1x256xi1>
    %cst_148 = arith.constant 0.000000e+00 : f32
    %721 = vector.broadcast %cst_148 : f32 to vector<1x256xf32>
    %722 = arith.select %720, %719, %721 : vector<1x256xi1>, vector<1x256xf32>
    %c75 = arith.constant 75 : index
    %723 = memref.load %arg7[%c75] : memref<98xf32, #tpu.memory_space<smem>>
    %724 = vector.broadcast %723 : f32 to vector<1x256xf32>
    %725 = arith.mulf %724, %722 : vector<1x256xf32>
    %726 = arith.addf %695, %725 : vector<1x256xf32>
    %c253_i32_149 = arith.constant 253 : i32
    %727 = tpu.dynamic_rotate %43 by %c253_i32_149 dim 1 : vector<1x256xf32>, i32 -> vector<1x256xf32>
    %728 = arith.andi %65, %115 : vector<1x256xi1>
    %cst_150 = arith.constant 0.000000e+00 : f32
    %729 = vector.broadcast %cst_150 : f32 to vector<1x256xf32>
    %730 = arith.select %728, %727, %729 : vector<1x256xi1>, vector<1x256xf32>
    %c76 = arith.constant 76 : index
    %731 = memref.load %arg7[%c76] : memref<98xf32, #tpu.memory_space<smem>>
    %732 = vector.broadcast %731 : f32 to vector<1x256xf32>
    %733 = arith.mulf %732, %730 : vector<1x256xf32>
    %734 = arith.addf %703, %733 : vector<1x256xf32>
    %c243_i32_151 = arith.constant 243 : i32
    %735 = tpu.dynamic_rotate %43 by %c243_i32_151 dim 1 : vector<1x256xf32>, i32 -> vector<1x256xf32>
    %736 = arith.andi %70, %85 : vector<1x256xi1>
    %cst_152 = arith.constant 0.000000e+00 : f32
    %737 = vector.broadcast %cst_152 : f32 to vector<1x256xf32>
    %738 = arith.select %736, %735, %737 : vector<1x256xi1>, vector<1x256xf32>
    %c77 = arith.constant 77 : index
    %739 = memref.load %arg7[%c77] : memref<98xf32, #tpu.memory_space<smem>>
    %740 = vector.broadcast %739 : f32 to vector<1x256xf32>
    %741 = arith.mulf %740, %738 : vector<1x256xf32>
    %742 = arith.addf %710, %741 : vector<1x256xf32>
    %c242_i32_153 = arith.constant 242 : i32
    %743 = tpu.dynamic_rotate %43 by %c242_i32_153 dim 1 : vector<1x256xf32>, i32 -> vector<1x256xf32>
    %744 = arith.andi %70, %90 : vector<1x256xi1>
    %cst_154 = arith.constant 0.000000e+00 : f32
    %745 = vector.broadcast %cst_154 : f32 to vector<1x256xf32>
    %746 = arith.select %744, %743, %745 : vector<1x256xi1>, vector<1x256xf32>
    %c78 = arith.constant 78 : index
    %747 = memref.load %arg7[%c78] : memref<98xf32, #tpu.memory_space<smem>>
    %748 = vector.broadcast %747 : f32 to vector<1x256xf32>
    %749 = arith.mulf %748, %746 : vector<1x256xf32>
    %750 = arith.addf %718, %749 : vector<1x256xf32>
    %c241_i32_155 = arith.constant 241 : i32
    %751 = tpu.dynamic_rotate %43 by %c241_i32_155 dim 1 : vector<1x256xf32>, i32 -> vector<1x256xf32>
    %752 = arith.andi %70, %95 : vector<1x256xi1>
    %cst_156 = arith.constant 0.000000e+00 : f32
    %753 = vector.broadcast %cst_156 : f32 to vector<1x256xf32>
    %754 = arith.select %752, %751, %753 : vector<1x256xi1>, vector<1x256xf32>
    %c79 = arith.constant 79 : index
    %755 = memref.load %arg7[%c79] : memref<98xf32, #tpu.memory_space<smem>>
    %756 = vector.broadcast %755 : f32 to vector<1x256xf32>
    %757 = arith.mulf %756, %754 : vector<1x256xf32>
    %758 = arith.addf %726, %757 : vector<1x256xf32>
    %c240_i32_157 = arith.constant 240 : i32
    %759 = tpu.dynamic_rotate %43 by %c240_i32_157 dim 1 : vector<1x256xf32>, i32 -> vector<1x256xf32>
    %760 = arith.andi %70, %100 : vector<1x256xi1>
    %cst_158 = arith.constant 0.000000e+00 : f32
    %761 = vector.broadcast %cst_158 : f32 to vector<1x256xf32>
    %762 = arith.select %760, %759, %761 : vector<1x256xi1>, vector<1x256xf32>
    %c80 = arith.constant 80 : index
    %763 = memref.load %arg7[%c80] : memref<98xf32, #tpu.memory_space<smem>>
    %764 = vector.broadcast %763 : f32 to vector<1x256xf32>
    %765 = arith.mulf %764, %762 : vector<1x256xf32>
    %766 = arith.addf %734, %765 : vector<1x256xf32>
    %c239_i32_159 = arith.constant 239 : i32
    %767 = tpu.dynamic_rotate %43 by %c239_i32_159 dim 1 : vector<1x256xf32>, i32 -> vector<1x256xf32>
    %768 = arith.andi %70, %105 : vector<1x256xi1>
    %cst_160 = arith.constant 0.000000e+00 : f32
    %769 = vector.broadcast %cst_160 : f32 to vector<1x256xf32>
    %770 = arith.select %768, %767, %769 : vector<1x256xi1>, vector<1x256xf32>
    %c81 = arith.constant 81 : index
    %771 = memref.load %arg7[%c81] : memref<98xf32, #tpu.memory_space<smem>>
    %772 = vector.broadcast %771 : f32 to vector<1x256xf32>
    %773 = arith.mulf %772, %770 : vector<1x256xf32>
    %774 = arith.addf %742, %773 : vector<1x256xf32>
    %c238_i32_161 = arith.constant 238 : i32
    %775 = tpu.dynamic_rotate %43 by %c238_i32_161 dim 1 : vector<1x256xf32>, i32 -> vector<1x256xf32>
    %776 = arith.andi %70, %110 : vector<1x256xi1>
    %cst_162 = arith.constant 0.000000e+00 : f32
    %777 = vector.broadcast %cst_162 : f32 to vector<1x256xf32>
    %778 = arith.select %776, %775, %777 : vector<1x256xi1>, vector<1x256xf32>
    %c82 = arith.constant 82 : index
    %779 = memref.load %arg7[%c82] : memref<98xf32, #tpu.memory_space<smem>>
    %780 = vector.broadcast %779 : f32 to vector<1x256xf32>
    %781 = arith.mulf %780, %778 : vector<1x256xf32>
    %782 = arith.addf %750, %781 : vector<1x256xf32>
    %c237_i32_163 = arith.constant 237 : i32
    %783 = tpu.dynamic_rotate %43 by %c237_i32_163 dim 1 : vector<1x256xf32>, i32 -> vector<1x256xf32>
    %784 = arith.andi %70, %115 : vector<1x256xi1>
    %cst_164 = arith.constant 0.000000e+00 : f32
    %785 = vector.broadcast %cst_164 : f32 to vector<1x256xf32>
    %786 = arith.select %784, %783, %785 : vector<1x256xi1>, vector<1x256xf32>
    %c83 = arith.constant 83 : index
    %787 = memref.load %arg7[%c83] : memref<98xf32, #tpu.memory_space<smem>>
    %788 = vector.broadcast %787 : f32 to vector<1x256xf32>
    %789 = arith.mulf %788, %786 : vector<1x256xf32>
    %790 = arith.addf %758, %789 : vector<1x256xf32>
    %c227_i32_165 = arith.constant 227 : i32
    %791 = tpu.dynamic_rotate %43 by %c227_i32_165 dim 1 : vector<1x256xf32>, i32 -> vector<1x256xf32>
    %792 = arith.andi %75, %85 : vector<1x256xi1>
    %cst_166 = arith.constant 0.000000e+00 : f32
    %793 = vector.broadcast %cst_166 : f32 to vector<1x256xf32>
    %794 = arith.select %792, %791, %793 : vector<1x256xi1>, vector<1x256xf32>
    %c84 = arith.constant 84 : index
    %795 = memref.load %arg7[%c84] : memref<98xf32, #tpu.memory_space<smem>>
    %796 = vector.broadcast %795 : f32 to vector<1x256xf32>
    %797 = arith.mulf %796, %794 : vector<1x256xf32>
    %798 = arith.addf %766, %797 : vector<1x256xf32>
    %c226_i32_167 = arith.constant 226 : i32
    %799 = tpu.dynamic_rotate %43 by %c226_i32_167 dim 1 : vector<1x256xf32>, i32 -> vector<1x256xf32>
    %800 = arith.andi %75, %90 : vector<1x256xi1>
    %cst_168 = arith.constant 0.000000e+00 : f32
    %801 = vector.broadcast %cst_168 : f32 to vector<1x256xf32>
    %802 = arith.select %800, %799, %801 : vector<1x256xi1>, vector<1x256xf32>
    %c85 = arith.constant 85 : index
    %803 = memref.load %arg7[%c85] : memref<98xf32, #tpu.memory_space<smem>>
    %804 = vector.broadcast %803 : f32 to vector<1x256xf32>
    %805 = arith.mulf %804, %802 : vector<1x256xf32>
    %806 = arith.addf %774, %805 : vector<1x256xf32>
    %c225_i32_169 = arith.constant 225 : i32
    %807 = tpu.dynamic_rotate %43 by %c225_i32_169 dim 1 : vector<1x256xf32>, i32 -> vector<1x256xf32>
    %808 = arith.andi %75, %95 : vector<1x256xi1>
    %cst_170 = arith.constant 0.000000e+00 : f32
    %809 = vector.broadcast %cst_170 : f32 to vector<1x256xf32>
    %810 = arith.select %808, %807, %809 : vector<1x256xi1>, vector<1x256xf32>
    %c86 = arith.constant 86 : index
    %811 = memref.load %arg7[%c86] : memref<98xf32, #tpu.memory_space<smem>>
    %812 = vector.broadcast %811 : f32 to vector<1x256xf32>
    %813 = arith.mulf %812, %810 : vector<1x256xf32>
    %814 = arith.addf %782, %813 : vector<1x256xf32>
    %c224_i32_171 = arith.constant 224 : i32
    %815 = tpu.dynamic_rotate %43 by %c224_i32_171 dim 1 : vector<1x256xf32>, i32 -> vector<1x256xf32>
    %816 = arith.andi %75, %100 : vector<1x256xi1>
    %cst_172 = arith.constant 0.000000e+00 : f32
    %817 = vector.broadcast %cst_172 : f32 to vector<1x256xf32>
    %818 = arith.select %816, %815, %817 : vector<1x256xi1>, vector<1x256xf32>
    %c87 = arith.constant 87 : index
    %819 = memref.load %arg7[%c87] : memref<98xf32, #tpu.memory_space<smem>>
    %820 = vector.broadcast %819 : f32 to vector<1x256xf32>
    %821 = arith.mulf %820, %818 : vector<1x256xf32>
    %822 = arith.addf %790, %821 : vector<1x256xf32>
    %c223_i32_173 = arith.constant 223 : i32
    %823 = tpu.dynamic_rotate %43 by %c223_i32_173 dim 1 : vector<1x256xf32>, i32 -> vector<1x256xf32>
    %824 = arith.andi %75, %105 : vector<1x256xi1>
    %cst_174 = arith.constant 0.000000e+00 : f32
    %825 = vector.broadcast %cst_174 : f32 to vector<1x256xf32>
    %826 = arith.select %824, %823, %825 : vector<1x256xi1>, vector<1x256xf32>
    %c88 = arith.constant 88 : index
    %827 = memref.load %arg7[%c88] : memref<98xf32, #tpu.memory_space<smem>>
    %828 = vector.broadcast %827 : f32 to vector<1x256xf32>
    %829 = arith.mulf %828, %826 : vector<1x256xf32>
    %830 = arith.addf %798, %829 : vector<1x256xf32>
    %c222_i32_175 = arith.constant 222 : i32
    %831 = tpu.dynamic_rotate %43 by %c222_i32_175 dim 1 : vector<1x256xf32>, i32 -> vector<1x256xf32>
    %832 = arith.andi %75, %110 : vector<1x256xi1>
    %cst_176 = arith.constant 0.000000e+00 : f32
    %833 = vector.broadcast %cst_176 : f32 to vector<1x256xf32>
    %834 = arith.select %832, %831, %833 : vector<1x256xi1>, vector<1x256xf32>
    %c89 = arith.constant 89 : index
    %835 = memref.load %arg7[%c89] : memref<98xf32, #tpu.memory_space<smem>>
    %836 = vector.broadcast %835 : f32 to vector<1x256xf32>
    %837 = arith.mulf %836, %834 : vector<1x256xf32>
    %838 = arith.addf %806, %837 : vector<1x256xf32>
    %c221_i32_177 = arith.constant 221 : i32
    %839 = tpu.dynamic_rotate %43 by %c221_i32_177 dim 1 : vector<1x256xf32>, i32 -> vector<1x256xf32>
    %840 = arith.andi %75, %115 : vector<1x256xi1>
    %cst_178 = arith.constant 0.000000e+00 : f32
    %841 = vector.broadcast %cst_178 : f32 to vector<1x256xf32>
    %842 = arith.select %840, %839, %841 : vector<1x256xi1>, vector<1x256xf32>
    %c90 = arith.constant 90 : index
    %843 = memref.load %arg7[%c90] : memref<98xf32, #tpu.memory_space<smem>>
    %844 = vector.broadcast %843 : f32 to vector<1x256xf32>
    %845 = arith.mulf %844, %842 : vector<1x256xf32>
    %846 = arith.addf %814, %845 : vector<1x256xf32>
    %c211_i32_179 = arith.constant 211 : i32
    %847 = tpu.dynamic_rotate %43 by %c211_i32_179 dim 1 : vector<1x256xf32>, i32 -> vector<1x256xf32>
    %848 = arith.andi %80, %85 : vector<1x256xi1>
    %cst_180 = arith.constant 0.000000e+00 : f32
    %849 = vector.broadcast %cst_180 : f32 to vector<1x256xf32>
    %850 = arith.select %848, %847, %849 : vector<1x256xi1>, vector<1x256xf32>
    %c91 = arith.constant 91 : index
    %851 = memref.load %arg7[%c91] : memref<98xf32, #tpu.memory_space<smem>>
    %852 = vector.broadcast %851 : f32 to vector<1x256xf32>
    %853 = arith.mulf %852, %850 : vector<1x256xf32>
    %854 = arith.addf %822, %853 : vector<1x256xf32>
    %c210_i32_181 = arith.constant 210 : i32
    %855 = tpu.dynamic_rotate %43 by %c210_i32_181 dim 1 : vector<1x256xf32>, i32 -> vector<1x256xf32>
    %856 = arith.andi %80, %90 : vector<1x256xi1>
    %cst_182 = arith.constant 0.000000e+00 : f32
    %857 = vector.broadcast %cst_182 : f32 to vector<1x256xf32>
    %858 = arith.select %856, %855, %857 : vector<1x256xi1>, vector<1x256xf32>
    %c92 = arith.constant 92 : index
    %859 = memref.load %arg7[%c92] : memref<98xf32, #tpu.memory_space<smem>>
    %860 = vector.broadcast %859 : f32 to vector<1x256xf32>
    %861 = arith.mulf %860, %858 : vector<1x256xf32>
    %862 = arith.addf %830, %861 : vector<1x256xf32>
    %c209_i32_183 = arith.constant 209 : i32
    %863 = tpu.dynamic_rotate %43 by %c209_i32_183 dim 1 : vector<1x256xf32>, i32 -> vector<1x256xf32>
    %864 = arith.andi %80, %95 : vector<1x256xi1>
    %cst_184 = arith.constant 0.000000e+00 : f32
    %865 = vector.broadcast %cst_184 : f32 to vector<1x256xf32>
    %866 = arith.select %864, %863, %865 : vector<1x256xi1>, vector<1x256xf32>
    %c93 = arith.constant 93 : index
    %867 = memref.load %arg7[%c93] : memref<98xf32, #tpu.memory_space<smem>>
    %868 = vector.broadcast %867 : f32 to vector<1x256xf32>
    %869 = arith.mulf %868, %866 : vector<1x256xf32>
    %870 = arith.addf %838, %869 : vector<1x256xf32>
    %c208_i32_185 = arith.constant 208 : i32
    %871 = tpu.dynamic_rotate %43 by %c208_i32_185 dim 1 : vector<1x256xf32>, i32 -> vector<1x256xf32>
    %872 = arith.andi %80, %100 : vector<1x256xi1>
    %cst_186 = arith.constant 0.000000e+00 : f32
    %873 = vector.broadcast %cst_186 : f32 to vector<1x256xf32>
    %874 = arith.select %872, %871, %873 : vector<1x256xi1>, vector<1x256xf32>
    %c94 = arith.constant 94 : index
    %875 = memref.load %arg7[%c94] : memref<98xf32, #tpu.memory_space<smem>>
    %876 = vector.broadcast %875 : f32 to vector<1x256xf32>
    %877 = arith.mulf %876, %874 : vector<1x256xf32>
    %878 = arith.addf %846, %877 : vector<1x256xf32>
    %c207_i32_187 = arith.constant 207 : i32
    %879 = tpu.dynamic_rotate %43 by %c207_i32_187 dim 1 : vector<1x256xf32>, i32 -> vector<1x256xf32>
    %880 = arith.andi %80, %105 : vector<1x256xi1>
    %cst_188 = arith.constant 0.000000e+00 : f32
    %881 = vector.broadcast %cst_188 : f32 to vector<1x256xf32>
    %882 = arith.select %880, %879, %881 : vector<1x256xi1>, vector<1x256xf32>
    %c95 = arith.constant 95 : index
    %883 = memref.load %arg7[%c95] : memref<98xf32, #tpu.memory_space<smem>>
    %884 = vector.broadcast %883 : f32 to vector<1x256xf32>
    %885 = arith.mulf %884, %882 : vector<1x256xf32>
    %886 = arith.addf %854, %885 : vector<1x256xf32>
    %c206_i32_189 = arith.constant 206 : i32
    %887 = tpu.dynamic_rotate %43 by %c206_i32_189 dim 1 : vector<1x256xf32>, i32 -> vector<1x256xf32>
    %888 = arith.andi %80, %110 : vector<1x256xi1>
    %cst_190 = arith.constant 0.000000e+00 : f32
    %889 = vector.broadcast %cst_190 : f32 to vector<1x256xf32>
    %890 = arith.select %888, %887, %889 : vector<1x256xi1>, vector<1x256xf32>
    %c96 = arith.constant 96 : index
    %891 = memref.load %arg7[%c96] : memref<98xf32, #tpu.memory_space<smem>>
    %892 = vector.broadcast %891 : f32 to vector<1x256xf32>
    %893 = arith.mulf %892, %890 : vector<1x256xf32>
    %894 = arith.addf %862, %893 : vector<1x256xf32>
    %c205_i32_191 = arith.constant 205 : i32
    %895 = tpu.dynamic_rotate %43 by %c205_i32_191 dim 1 : vector<1x256xf32>, i32 -> vector<1x256xf32>
    %896 = arith.andi %80, %115 : vector<1x256xi1>
    %cst_192 = arith.constant 0.000000e+00 : f32
    %897 = vector.broadcast %cst_192 : f32 to vector<1x256xf32>
    %898 = arith.select %896, %895, %897 : vector<1x256xi1>, vector<1x256xf32>
    %c97 = arith.constant 97 : index
    %899 = memref.load %arg7[%c97] : memref<98xf32, #tpu.memory_space<smem>>
    %900 = vector.broadcast %899 : f32 to vector<1x256xf32>
    %901 = arith.mulf %900, %898 : vector<1x256xf32>
    %902 = arith.addf %870, %901 : vector<1x256xf32>
    %903 = arith.addf %894, %902 : vector<1x256xf32>
    %904 = arith.addf %878, %886 : vector<1x256xf32>
    %905 = arith.addf %903, %904 : vector<1x256xf32>
    %cst_193 = arith.constant 0.000000e+00 : f32
    %906 = vector.broadcast %cst_193 : f32 to vector<1x256xf32>
    %907 = arith.subf %906, %905 : vector<1x256xf32>
    %908 = math.exp %907 : vector<1x256xf32>
    %cst_194 = arith.constant 1.000000e+00 : f32
    %909 = vector.broadcast %cst_194 : f32 to vector<1x256xf32>
    %910 = arith.addf %909, %908 : vector<1x256xf32>
    %911 = tpu.reciprocal %910 : vector<1x256xf32> -> vector<1x256xf32>
    %912 = vector.broadcast %35 : vector<4x1xf32> to vector<4x256xf32>
    %913 = vector.broadcast %911 : vector<1x256xf32> to vector<4x256xf32>
    %914 = arith.mulf %912, %913 : vector<4x256xf32>
    %915 = arith.mulf %1, %914 : vector<4x256xf32>
    %c0_195 = arith.constant 0 : index
    %c0_196 = arith.constant 0 : index
    %c0_197 = arith.constant 0 : index
    %916 = vector.load %arg9[%c0_195, %c0_196, %c0_197] : memref<1x4x256xf32, #tpu.memory_space<vmem>>, vector<1x4x256xf32>
    %917 = vector.shape_cast %916 : vector<1x4x256xf32> to vector<4x256xf32>
    %918 = vector.shape_cast %915 : vector<4x256xf32> to vector<1x4x256xf32>
    tpu.vector_store %arg9[%c0_195, %c0_196, %c0_197], %918 {strides = array<i32>} : memref<1x4x256xf32, #tpu.memory_space<vmem>>, vector<1x4x256xf32>,
    return
  }
  func.func @transform_0(%arg0: i32) -> (i32, i32, i32) {
    %c0_i32 = arith.constant 0 : i32
    %c0_i32_0 = arith.constant 0 : i32
    %c0_i32_1 = arith.constant 0 : i32
    return %arg0, %c0_i32, %c0_i32_0 : i32, i32, i32
  }
  func.func @transform_1(%arg0: i32) -> (i32, i32) {
    %c0_i32 = arith.constant 0 : i32
    %c0_i32_0 = arith.constant 0 : i32
    %c0_i32_1 = arith.constant 0 : i32
    return %c0_i32, %c0_i32_0 : i32, i32
  }
  func.func @transform_2(%arg0: i32) -> (i32, i32) {
    %c0_i32 = arith.constant 0 : i32
    %c0_i32_0 = arith.constant 0 : i32
    %c0_i32_1 = arith.constant 0 : i32
    return %c0_i32, %c0_i32_0 : i32, i32
  }
  func.func @transform_3(%arg0: i32) -> (i32, i32) {
    %c0_i32 = arith.constant 0 : i32
    %c0_i32_0 = arith.constant 0 : i32
    %c0_i32_1 = arith.constant 0 : i32
    return %c0_i32, %c0_i32_0 : i32, i32
  }
  func.func @transform_4(%arg0: i32) -> (i32, i32) {
    %c0_i32 = arith.constant 0 : i32
    %c0_i32_0 = arith.constant 0 : i32
    %c0_i32_1 = arith.constant 0 : i32
    return %c0_i32, %c0_i32_0 : i32, i32
  }
  func.func @transform_5(%arg0: i32) -> (i32, i32) {
    %c0_i32 = arith.constant 0 : i32
    %c0_i32_0 = arith.constant 0 : i32
    %c0_i32_1 = arith.constant 0 : i32
    return %c0_i32, %c0_i32_0 : i32, i32
  }
  func.func @transform_6(%arg0: i32) -> i32 {
    %c0_i32 = arith.constant 0 : i32
    %c0_i32_0 = arith.constant 0 : i32
    return %c0_i32 : i32
  }
  func.func @transform_7(%arg0: i32) -> i32 {
    %c0_i32 = arith.constant 0 : i32
    %c0_i32_0 = arith.constant 0 : i32
    return %c0_i32 : i32
  }
  func.func @transform_8(%arg0: i32) -> (i32, i32, i32) {
    %c0_i32 = arith.constant 0 : i32
    %c0_i32_0 = arith.constant 0 : i32
    %c0_i32_1 = arith.constant 0 : i32
    return %arg0, %c0_i32, %c0_i32_0 : i32, i32, i32
  }
}

</mosaic_0001>

<bundles_post_ra>
// kernel: tpu_custom_call.1
= control target key start
LH: loop header
LB: loop body
LE: loop exit
PB: predicated region body
PF: predicated region fallthrough
CT: control target
= control target key end

     0   :  { %s6389_s0 = inlined_call_operand.hbm [shape: f32[2,4,256], index: 0, kind: input, shape index: {}]   ;;  %s6390_s1 = inlined_call_operand.vmem [shape: f32[1,4], index: 1, kind: input, shape index: {}]   ;;  %s6391_s2 = inlined_call_operand.vmem [shape: f32[4,1], index: 2, kind: input, shape index: {}]   ;;  %s6392_s3 = inlined_call_operand.vmem [shape: f32[1,4], index: 3, kind: input, shape index: {}]   ;;  %s6393_s4 = inlined_call_operand.vmem [shape: f32[4,1], index: 4, kind: input, shape index: {}]   ;;  %s6394_s5 = inlined_call_operand.vmem [shape: s32[1,256], index: 5, kind: input, shape index: {}]   ;;  %s6395_s6 = inlined_call_operand.vmem [shape: f32[98], index: 6, kind: input, shape index: {}]   ;;  %s6396_s7 = inlined_call_operand.<no memory space> [shape: f32[1], index: 7, kind: input, shape index: {}]   ;;  %s6397_s8 = inlined_call_operand.hbm [shape: f32[2,4,256], index: 8, kind: output, shape index: {}]  }
   0x1   :  { %6687 = sst [smem:[#allocation136_spill]] %s6389_s0 }
   0x2   :  { %6688 = sst [smem:[#allocation137_spill]] %s6390_s1 }
   0x3   :  { %6689 = sst [smem:[#allocation138_spill]] %s6391_s2 }
   0x4   :  { %6690 = sst [smem:[#allocation139_spill]] %s6392_s3 }
   0x5   :  { %6691 = sst [smem:[#allocation140_spill]] %s6393_s4 }
   0x6   :  { %6692 = sst [smem:[#allocation141_spill]] %s6394_s5 }
   0x7   :  { %6693 = sst [smem:[#allocation142_spill]] %s6395_s6 }
   0x8   :  { %6694 = sst [smem:[#allocation143_spill]] %s6397_s8 }
   0x9   :  { %13 = sst [smem:[#allocation2]] %s6396_s7 }
   0xa   :  { %14 = vsyncpa [#allocation4], 0 }
   0xb   :  { %16 = vsyncpa [#allocation4 + $0x1], 0 }
   0xc   :  { %17 = vsyncpa [#allocation6], 0 }
   0xd   :  { %18 = vsyncpa [#allocation5], 0 }
   0xe   :  { %20 = vsyncpa [#allocation5 + $0x1], 0  ;;  %s2794_s29 = smov 0   ;;  %s2796_s30 = smov 0  }
   0xf   :  { %s2798_s9 = smov 0   ;;  %s2800_s10 = smov 0  }
  0x10 LB: > { %6695 = sst [smem:[#allocation12_spill]] %s2678_s29  ;;  %s2815_s7 = sadd.s32 4294967295, %s2690_s10   ;;  %s2690_s10 = sphi %s2800_s10, %s7631_s10   ;;  %s2686_s9 = sphi %s2798_s9, %s7634_s9   ;;  %s2682_s30 = sphi %s2796_s30, %s7633_s30   ;;  %s2678_s29 = sphi %s2794_s29, %s7632_s29  }
  0x11   : > { %6696 = sst [smem:[#allocation13_spill]] %s2682_s30  ;;  %s2340_s11 = sadd.s32 4294967294, %s2690_s10  }
  0x12   : > { %6697 = sst [smem:[#allocation14_spill]] %s2686_s9  ;;  %p46_p0 = scmp.ne.s32.totalorder %s2682_s30, %s2678_s29 }
  0x13   : > { %6698 = sst [smem:[#allocation15_spill]] %s2690_s10  ;;  %p6398_p1 = scmp.eq.s32.totalorder %s2815_s7, 0 }
  0x14   : > { %6699 = sst [smem:[#allocation16_spill]] %s2815_s7  ;;  %p223_p3 = scmp.eq.s32.totalorder %s2340_s11, 1 }
  0x15   : > { %p2824_p4 = por %p6398_p1, %p46_p0  ;;  %p2341_p5 = scmp.ge.s32.totalorder %s2690_s10, 1 }
  0x16   : > { %p2829_p6 = por %p223_p3, %p46_p0  ;;  %p230_p7 = scmp.lt.s32.totalorder %s2690_s10, 3 }
  0x17   : > { %s6700_s12 = scalar_select %p2824_p4, 1, 0 }
  0x18   : > { %s6701_s13 = scalar_select %p2829_p6, 1, 0 }
  0x19   : > { %s6703_s6 = sld [smem:[#allocation142_spill]]  ;;  %p2837_p8 = pnand %p2341_p5, %p230_p7 }
  0x1a   : > { %6702 = sst [smem:[#allocation17_spill]] %s6701_s13  ;;  %s2845_s18 = sadd.s32 1, %s2690_s10  }
  0x1b   : > { %s6704_s17 = scalar_select %p2837_p8, 1, 0 }
  0x1c   : > { %p2463_p10 = pneg %p2837_p8  ;;  %6705 = sst [smem:[#allocation18_spill]] %s2845_s18 }
  0x1d   : > { %s30_s20 = ssub.s32 %s2690_s10, %s2845_s18  ;;  %s33_s22 = sadd.s32 1, %s2686_s9 }
  0x1e   : > { %p2849_p11 = pnand %p2463_p10, %p6398_p1  ;;  %p2855_p12 = scmp.eq.s32.totalorder %s30_s20, 0 }
  0x1f   : > { %s258_s16 = sshll.u32 %s6703_s6, 4  ;;  %p40_p13 = scmp.ne.s32.totalorder %s2686_s9, %s2682_s30  ;;  %s259_s16 = int_to_ptr.vmem [resolvable:$true] %s258_s16 }
  0x20   : > { %s2579_s23 = scalar_lea.vmem %s259_s16, 16  ;;  %p2581_p3 = pneg %p2849_p11 }
  0x21   : > { %p2580_p0 = scmp.ne.s32.totalorder %s259_s16, %s2579_s23  ;;  %p2587_p9 = scmp.lt.s32.totalorder %s259_s16, %s259_s16 }
  0x22   : > { %p2588_p2 = scmp.lt.s32.totalorder %s2579_s23, %s2579_s23 }
  0x23   : > { %p2582_p5 = pnand %p2581_p3, %p2580_p0 }
  0x24   : > { %p2589_p10 = por %p2588_p2, %p2587_p9 }
  0x25   : > { %p2583_p7 = pneg %p2582_p5 }
  0x27   : > { %p2590_p1 = pnand %p2589_p10, %p2583_p7 }
  0x29   : > { %2593 = shalt.err (!%p2590_p1)
}
  0x2a   : > { %s2692_s24 = smov [#allocation7]   ;;  %p41_p2 = scmp.eq.s32.totalorder %s2690_s10, 0 }
  0x2b   : > { %2466 = dma.vmem_to_smem (!%p2849_p11), %s259_s16, 16, %s2692_s24, [#allocation6]  }
  0x2c   : > { %s2869_s25 = scalar_select %p2855_p12, %s2686_s9, %s33_s22  }
  0x2d   : > { %p6709_p1 = scmp.eq.s32.totalorder %s2815_s7, 1  ;;  %p2476_p0 = scmp.lt.s32.totalorder %s2690_s10, 2 }
  0x2e   : > { %6708 = sst [smem:[#allocation19_spill]] %s2869_s25  ;;  %s272_s27 = sand.u32 1, %s2686_s9  }
  0x2f   : > { %p2877_p9 = por %p6709_p1, %p40_p13  ;;  %p42_p3 = por %p41_p2, %p40_p13 }
  0x30   : > { %s2344_s28 = sshll.u32 %s272_s27, 3  ;;  %s2453_s11 = sshll.u32 %s2690_s10, 7 }
  0x31   : > { %s6710_s26 = scalar_select %p2877_p9, 1, 0 }
  0x32   : > { %s6712_s0 = sld [smem:[#allocation136_spill]]  ;;  %s276_s19 = scalar_lea.vmem [#allocation3], %s2344_s28 }
  0x33   : > { %6711 = sst [smem:[#allocation20_spill]] %s6710_s26  ;;  %s284_s20 = sshll.u32 %s276_s19, 4  ;;  %s285_s20 = int_to_ptr.vmem [resolvable:$true] %s284_s20 }
  0x34   : > { %p2892_p11 = pnand %p2476_p0, %p42_p3  ;;  %s273_s22 = scalar_lea.sflag [#allocation4], %s272_s27 }
  0x36   : > { %p2596_p13 = pneg %p2892_p11 }
  0x38   : > { %s2890_s16 = scalar_lea.hbm %s6712_s0, %s2453_s11  ;;  %s2599_s14 = scalar_lea.hbm %s6712_s0, 256 }
  0x39   : > { %s2594_s23 = scalar_lea.hbm %s2890_s16, 128  ;;  %p2600_p10 = scmp.lt.s32.totalorder %s2890_s16, %s6712_s0 }
  0x3a   : > { %p2595_p12 = scmp.ne.s32.totalorder %s2890_s16, %s2594_s23  ;;  %p2601_p2 = scmp.lt.s32.totalorder %s2599_s14, %s2594_s23 }
  0x3c   : > { %p2597_p5 = pnand %p2596_p13, %p2595_p12  ;;  %p2602_p1 = por %p2601_p2, %p2600_p10 }
  0x3e   : > { %p2598_p7 = pneg %p2597_p5 }
  0x40   : > { %p2603_p0 = pnand %p2602_p1, %p2598_p7 }
  0x42   : > { %2606 = shalt.err (!%p2603_p0)
}
  0x43   : > { %s2607_s19 = scalar_lea.vmem %s285_s20, 128  ;;  %s2693_s27 = smov [#allocation3]  }
  0x44   : > { %p2608_p3 = scmp.ne.s32.totalorder %s285_s20, %s2607_s19  ;;  %s2612_s6 = sshll.u32 %s2693_s27, 4  ;;  %s2613_s6 = int_to_ptr.vmem [resolvable:$false] %s2612_s6 }
  0x45   : > { %s2614_s25 = scalar_lea.vmem %s2613_s6, 256  ;;  %p2615_p12 = scmp.lt.s32.totalorder %s285_s20, %s2613_s6 }
  0x46   : > { %p2610_p6 = pnand %p2608_p3, %p2596_p13  ;;  %p2616_p5 = scmp.lt.s32.totalorder %s2614_s25, %s2607_s19 }
  0x48   : > { %p2611_p9 = pneg %p2610_p6  ;;  %p2617_p4 = por %p2616_p5, %p2615_p12 }
  0x4a   : > { %p2618_p8 = pnand %p2617_p4, %p2611_p9 }
  0x4c   : > { %2621 = shalt.err (!%p2618_p8)
}
  0x4d   : > { %2470 = dma.hbm_to_vmem [thread:$0]  (!%p2892_p11), %s2890_s16, 128, %s285_s20, %s273_s22  }
  0x4e   : > { %p6714_p7 = scmp.ne.s32.totalorder %s6704_s17, 0 }
  0x50   : > { %293 = sbr.rel (%p6714_p7) target bundleno = 1359 (0x54f), region = 52 }
  0x55   : > { %s2913_s23 = sand.u32 1, %s2682_s30   ;;  %p6717_p4 = scmp.ne.s32.totalorder %s6700_s12, 0 }
  0x56   : > { %6715 = sst [smem:[#allocation21_spill]] %s2913_s23  ;;  %s6402_s24 = sshll.u32 %s2913_s23, 3 }
  0x57   : > { %s296_s6 = scalar_lea.sflag [#allocation4], %s2913_s23  ;;  %s2919_s25 = scalar_lea.vmem [#allocation3], %s6402_s24 }
  0x58   : > { %6716 = sst [smem:[#allocation22_spill]] %s2919_s25 }
  0x59   : > { %2665 = dma.done.wait (%p6717_p4), %s296_s6, 128  }
  0x5a   : > { %2667 = vsyncadd (%p6717_p4), %s296_s6, 4294967168  ;;  %p6718_p6 = scmp.eq.s32.totalorder %s2815_s7, 0 }
  0x5c   : > { %2669 = dma.done.wait (%p6718_p6), [#allocation6], 16   ;;  %p6719_p8 = pmov %p6718_p6 }
  0x5e   : > { %2671 = vsyncadd (%p6719_p8), [#allocation6], 4294967280 }
  0x5f   : > { %308 = sfence }
  0x60   : > { %v2930_v0 = vld [vmem:[%s2919_s25] sm:$0xff]  ;;  %vm341_vm0 = vcmask 1043456   ;;  %v6458_v8 = vmov 0   ;;  %v355_v9 = vlaneseq  ;;  %v2695_v11 = vmov 1966171168   ;;  %s6721_s3 = sld [smem:[#allocation139_spill]] }
  0x61   : > { %v339_v1 = vcombine.high %v2930_v0, %v2930_v0  ;;  %v342_v2 = vsel %vm341_vm0, %v2930_v0, 0.0  ;;  %v348_v4 = vsel %vm341_vm0, %v2930_v0, -inf  ;;  %2564 = vset.pattern.permute.xlu1 %v6458_v8  ;;  %2563 = vset.pattern.permute.xlu0 %v6458_v8  ;;  %v374_v12 = vunpack.c.l.s4 %v2695_v11  ;;  %s6722_s1 = sld [smem:[#allocation137_spill]]  ;;  %s6451_s15 = smov 51  }
  0x62   : > { %v2942_v10 = vshrl.u32 %v355_v9, 7  ;;  %v2957_v42 = vand.u32 127, %v355_v9  ;;  %vm420_vm1 = vcmask 24576   ;;  %s6723_s4 = sld [smem:[#allocation140_spill]]  ;;  %s2698_s28 = smov 50  }
  0x63   : > { %v343_v3 = vsel %vm341_vm0, %v339_v1, 0.0  ;;  %v349_v5 = vsel %vm341_vm0, %v339_v1, -inf  ;;  %v375_v18 = vunpack.c.0.s8 %v374_v12  ;;  %s6724_s2 = sld [smem:[#allocation138_spill]]  ;;  %s2699_s19 = smov 49  }
  0x64   : > { %v344_v6 = vadd.f32 %v343_v3, %v342_v2  ;;  %v350_v7 = vmax.f32 %v348_v4, %v349_v5  ;;  %v2945_v13 = vsub.s32 0, %v2942_v10  ;;  %v2948_v14 = vsub.s32 1, %v2942_v10  ;;  %s2700_s27 = smov 48   ;;  %s2701_s6 = smov 47  }
  0x65   : > { %v365_v15 = vsub.s32 2, %v2942_v10  ;;  %v369_v16 = vsub.s32 3, %v2942_v10  ;;  %v378_v25 = vsub.s32 %v375_v18, %v2942_v10  ;;  %v402_v43 = vsub.s32 %v2957_v42, %v2942_v10  ;;  %s2702_s12 = smov 46   ;;  %s2703_s17 = smov 45  }
  0x66   : > { %345 = vadd.xlane.f32.xlu0 %v344_v6  ;;  %6720 = vst [vmem:[#allocation23_spill] sm:$0xff] %v2945_v13  ;;  %v432_v50 = vld [vmem:[%s6721_s3] sm:$0x1]  ;;  %s2704_s16 = smov 35   ;;  %s2705_s20 = smov 34  }
  0x67   : > { %v353_v53 = vld [vmem:[%s6722_s1] sm:$0x1]  ;;  %s2706_s21 = smov 33   ;;  %s6403_s22 = smov 32  }
  0x68   : > { %v501_v63 = vld [vmem:[%s6723_s4] sm:$0xf]  ;;  %s6405_s11 = smov 31   ;;  %s6407_s14 = smov 30  }
  0x69   : > { %v425_v1 = vld [vmem:[%s6724_s2] sm:$0xf]  ;;  %s6409_s24 = smov 29   ;;  %s6812_s5 = sld [smem:[#allocation141_spill]] }
  0x6a   : > { %351 = vmax.xlane.f32.xlu0 %v350_v7  ;;  %s3447_s2 = sld [smem:[#allocation7 + $0x36]]  ;;  %s6814_s4 = smov 110  }
  0x6b   : > { %s3455_s3 = sld [smem:[#allocation7 + $0x38]]  ;;  %s6818_s9 = smov 109  }
  0x6c   : > { %s3463_s0 = sld [smem:[#allocation7 + $0x39]]  ;;  %s6821_s13 = smov 99  }
  0x6d   : > { %s3465_s1 = sld [smem:[#allocation7 + $0x3a]]  ;;  %s6826_s25 = smov 98  }
  0x6e   : > { %s3481_s30 = sld [smem:[#allocation7 + $0x3d]] }
  0x6f   : > { %s3483_s18 = sld [smem:[#allocation7 + $0x3e]] }
  0x70   : > { %s3494_s10 = sld [smem:[#allocation7 + $0x40]] }
  0x71   : > { %6813 = sst [smem:[#allocation90_spill]] %s3455_s3 }
  0x72   : > { %s3505_s29 = sld [smem:[#allocation7 + $0x42]] }
  0x73   : > { %6816 = sst [smem:[#allocation92_spill]] %s3465_s1 }
  0x74   : > { %s3513_s8 = sld [smem:[#allocation7 + $0x43]] }
  0x75   : > { %s3515_s26 = sld [smem:[#allocation7 + $0x44]] }
  0x76   : > { %s3522_s23 = sld [smem:[#allocation7 + $0x45]] }
  0x77   : > { %s3546_s7 = sld [smem:[#allocation7 + $0x47]] }
  0x78   : > { %s3710_s3 = sld [smem:[#allocation7 + $0x53]] }
  0x79   : > { %s3720_s1 = sld [smem:[#allocation7 + $0x1]] }
  0x7a   : > { %6824 = sst [smem:[#allocation97_spill]] %s3513_s8 }
  0x7b   : > { %6825 = sst [smem:[#allocation98_spill]] %s3515_s26 }
  0x7c   : > { %s3767_s26 = sld [smem:[#allocation7 + $0x3]] }
  0x7d   : > { %6831 = sst [smem:[#allocation99_spill]] %s3546_s7  ;;  %s6884_s7 = smov 93  }
  0x7e   : > { %s3774_s8 = sld [smem:[#allocation7 + $0x5]] }
  0xef   : > { %v346_v17 = vpop.xlane.xlu0 %345 }
  0xf0   : > { %v347_v19 = vmul.f32 0.00390625, %v346_v17 }
  0xf2   : > { %v358_v20 = vrot.slane %v347_v19, %v2945_v13  ;;  %v362_v21 = vrot.slane %v347_v19, %v2948_v14  ;;  %v366_v22 = vrot.slane %v347_v19, %v365_v15  ;;  %v370_v23 = vrot.slane %v347_v19, %v369_v16 }
  0xf3   : > { %v352_v24 = vpop.xlane.xlu0 %351 }
  0xf4   : > { %v437_v26 = vrot.slane %v352_v24, %v2945_v13  ;;  %v441_v27 = vrot.slane %v352_v24, %v2948_v14  ;;  %v445_v28 = vrot.slane %v352_v24, %v365_v15  ;;  %v449_v29 = vrot.slane %v352_v24, %v369_v16 }
  0xf5   : > { %v371_v30 = vcombine.low %v358_v20, %v362_v21  ;;  %v372_v31 = vcombine.low %v366_v22, %v370_v23  ;;  %v2696_v15 = vmov 839922192  }
  0xf6   : > { %v450_v32 = vcombine.low %v437_v26, %v441_v27  ;;  %v451_v33 = vcombine.low %v445_v28, %v449_v29  ;;  %v520_v16 = vunpack.c.l.s4 %v2696_v15 }
  0xf7   : > { %v379_v34 = vrot.slane %v371_v30, %v378_v25  ;;  %v386_v35 = vrot.slane %v372_v31, %v378_v25 }
  0xf8   : > { %v458_v36 = vrot.slane %v450_v32, %v378_v25  ;;  %v465_v37 = vrot.slane %v451_v33, %v378_v25  ;;  %v521_v17 = vunpack.c.0.s8 %v520_v16 }
  0xf9   : > { %v387_v38 = vcombine.low %v379_v34, %v386_v35 }
  0xfa   : > { %v466_v39 = vcombine.low %v458_v36, %v465_v37  ;;  %v524_v18 = vsub.s32 %v521_v17, %v2942_v10 }
  0xfb   : > { %v394_v40 = vrot.slane %v387_v38, %v378_v25 }
  0xfc   : > { %v473_v41 = vrot.slane %v466_v39, %v378_v25 }
  0xfd   : > { %396 = vperm.xlu1 %2564, %v394_v40  }
  0xfe   : > { %475 = vperm.xlu0 %2563, %v473_v41  }
 0x178   : > { %v397_v44 = vpop.permute.xlu1 %396 }
 0x179   : > { %v403_v45 = vrot.slane %v397_v44, %v402_v43  ;;  %v476_v46 = vpop.permute.xlu0 %475 }
 0x17a   : > { %v480_v47 = vrot.slane %v476_v46, %v402_v43 }
 0x17b   : > { %v410_v48 = vrot.slane %v403_v45, %v378_v25 }
 0x17c   : > { %v487_v49 = vrot.slane %v480_v47, %v378_v25 }
 0x17d   : > { %v417_v52 = vrot.slane %v410_v48, %v378_v25 }
 0x17e   : > { %v494_v51 = vrot.slane %v487_v49, %v378_v25 }
 0x17f   : > { %v419_v56 = vmul.f32 %v417_v52, %v353_v53 }
 0x180   : > { %v496_v54 = vmul.f32 %v494_v51, %v432_v50 }
 0x181   : > { %v421_v57 = vsel %vm420_vm1, %v419_v56, 0.0 }
 0x182   : > { %v497_v55 = vsel %vm420_vm1, %v496_v54, 0.0 }
 0x183   : > { %498 = vadd.xlane.f32.xlu1 %v497_v55 }
 0x187   : > { %422 = vadd.xlane.f32.xlu1 %v421_v57 }
 0x20c   : > { %v499_v58 = vpop.xlane.xlu1 %498 }
 0x20d   : > { %v500_v59 = vmax.f32 %v499_v58, 0.0 }
 0x20f   : > { %v505_v61 = vrot.slane %v500_v59, %v2945_v13 }
 0x210   : > { %v423_v60 = vpop.xlane.xlu1 %422 }
 0x211   : > { %v424_v62 = vmax.f32 %v423_v60, 0.0  ;;  %v506_v3 = vmul.f32 %v505_v61, %v501_v63 }
 0x213   : > { %v429_v2 = vrot.slane %v424_v62, %v2945_v13 }
 0x215   : > { %v430_v4 = vmul.f32 %v429_v2, %v425_v1 }
 0x217   : > { %v508_v5 = vadd.f32 %v506_v3, %v430_v4 }
 0x219   : > { %v509_v6 = vsub.f32 0.0, %v508_v5 }
 0x21b   : > { %v510_v7 = vmul.f32 1.442695, %v509_v6 }
 0x21d   : > { %2566 = vpow2.f32 %v510_v7 }
 0x22a   : > { %v2567_v9 = vpop.eup %2566 }
 0x22b   : > { %v512_v11 = vadd.f32 1.0, %v2567_v9 }
 0x22d   : > { %2568 = vrcp.f32 %v512_v11 }
 0x23a   : > { %v2569_v12 = vpop.eup %2568 }
 0x23b   : > { %516 = vperm.xlu1 %2564, %v2569_v12  }
 0x2b6   : > { %v2976_v19 = vpop.permute.xlu1 %516 }
 0x2b7   : > { %6725 = vst [vmem:[#allocation24_spill] sm:$0xff] %v2976_v19  ;;  %v525_v20 = vrot.slane %v2976_v19, %v524_v18 }
 0x2b9   : > { %v2980_v21 = vmul.f32 %v525_v20, %v2930_v0 }
 0x2bb   : > { %v2984_v22 = vcombine.high %v2980_v21, %v2980_v21  ;;  %v547_v23 = vsel %vm341_vm0, %v2980_v21, -inf  ;;  %v531_v36 = vsel %vm341_vm0, %v2980_v21, 0.0 }
 0x2bc   : > { %v548_v24 = vrot.slane %v547_v23, 4  ;;  %v532_v38 = vrot.slane %v531_v36, 4 }
 0x2bd   : > { %v554_v25 = vsel %vm341_vm0, %v2984_v22, -inf  ;;  %v538_v57 = vsel %vm341_vm0, %v2984_v22, 0.0 }
 0x2be   : > { %v549_v26 = vmax.f32 %v547_v23, %v548_v24  ;;  %v555_v10 = vrot.slane %v554_v25, 4  ;;  %v533_v41 = vadd.f32 %v532_v38, %v531_v36  ;;  %v539_v60 = vrot.slane %v538_v57, 4 }
 0x2c0   : > { %v550_v27 = vrot.slane %v549_v26, 2  ;;  %v556_v28 = vmax.f32 %v554_v25, %v555_v10  ;;  %v534_v45 = vrot.slane %v533_v41, 2  ;;  %v540_v63 = vadd.f32 %v539_v60, %v538_v57 }
 0x2c2   : > { %v551_v29 = vmax.f32 %v549_v26, %v550_v27  ;;  %v557_v30 = vrot.slane %v556_v28, 2  ;;  %v535_v48 = vadd.f32 %v534_v45, %v533_v41  ;;  %v541_v3 = vrot.slane %v540_v63, 2 }
 0x2c4   : > { %v552_v31 = vrot.slane %v551_v29, 1  ;;  %v558_v0 = vmax.f32 %v556_v28, %v557_v30  ;;  %v536_v51 = vrot.slane %v535_v48, 1  ;;  %v542_v6 = vadd.f32 %v541_v3, %v540_v63 }
 0x2c6   : > { %v2990_v32 = vmax.f32 %v551_v29, %v552_v31  ;;  %v559_v33 = vrot.slane %v558_v0, 1  ;;  %v537_v54 = vadd.f32 %v536_v51, %v535_v48  ;;  %v543_v11 = vrot.slane %v542_v6, 1 }
 0x2c8   : > { %6726 = vst [vmem:[#allocation25_spill] sm:$0xff] %v2990_v32  ;;  %v2992_v34 = vmax.f32 %v558_v0, %v559_v33  ;;  %1531 = vrot.lane.b32.xlu0 %v2990_v32, %s6451_s15  ;;  %v3168_v58 = vmul.f32 0.25, %v537_v54  ;;  %v544_v16 = vadd.f32 %v543_v11, %v542_v6 }
 0x2ca   : > { %6727 = vst [vmem:[#allocation26_spill] sm:$0xff] %v2992_v34  ;;  %1533 = vrot.lane.b32.xlu1 %v2992_v34, %s6451_s15  ;;  %v3222_v20 = vmul.f32 0.25, %v544_v16 }
 0x2cc   : > { %1545 = vrot.lane.b32.xlu0 %v2990_v32, %s2698_s28 }
 0x2ce   : > { %1547 = vrot.lane.b32.xlu1 %v2992_v34, %s2698_s28 }
 0x2d0   : > { %1559 = vrot.lane.b32.xlu0 %v2990_v32, %s2699_s19 }
 0x2d2   : > { %1561 = vrot.lane.b32.xlu1 %v2992_v34, %s2699_s19 }
 0x2d4   : > { %1573 = vrot.lane.b32.xlu0 %v2990_v32, %s2700_s27 }
 0x2d6   : > { %1575 = vrot.lane.b32.xlu1 %v2992_v34, %s2700_s27 }
 0x2d8   : > { %1587 = vrot.lane.b32.xlu0 %v2990_v32, %s2701_s6 }
 0x2da   : > { %1589 = vrot.lane.b32.xlu1 %v2992_v34, %s2701_s6 }
 0x2dc   : > { %1601 = vrot.lane.b32.xlu0 %v2990_v32, %s2702_s12 }
 0x2de   : > { %1603 = vrot.lane.b32.xlu1 %v2992_v34, %s2702_s12 }
 0x2e0   : > { %1615 = vrot.lane.b32.xlu0 %v2990_v32, %s2703_s17 }
 0x2e2   : > { %1617 = vrot.lane.b32.xlu1 %v2992_v34, %s2703_s17 }
 0x2e4   : > { %1629 = vrot.lane.b32.xlu0 %v2990_v32, %s2704_s16 }
 0x2e6   : > { %1631 = vrot.lane.b32.xlu1 %v2992_v34, %s2704_s16 }
 0x2e8   : > { %1643 = vrot.lane.b32.xlu0 %v2990_v32, %s2705_s20 }
 0x2ea   : > { %1645 = vrot.lane.b32.xlu1 %v2992_v34, %s2705_s20 }
 0x2ec   : > { %1657 = vrot.lane.b32.xlu0 %v2990_v32, %s2706_s21 }
 0x2ee   : > { %1659 = vrot.lane.b32.xlu1 %v2992_v34, %s2706_s21 }
 0x2f0   : > { %1671 = vrot.lane.b32.xlu0 %v2990_v32, %s6403_s22 }
 0x2f2   : > { %1673 = vrot.lane.b32.xlu1 %v2992_v34, %s6403_s22  ;;  %s6411_s22 = smov 19  }
 0x2f4   : > { %1685 = vrot.lane.b32.xlu0 %v2990_v32, %s6405_s11 }
 0x2f6   : > { %1687 = vrot.lane.b32.xlu1 %v2992_v34, %s6405_s11  ;;  %s6413_s11 = smov 18  }
 0x2f8   : > { %1699 = vrot.lane.b32.xlu0 %v2990_v32, %s6407_s14 }
 0x2fa   : > { %1701 = vrot.lane.b32.xlu1 %v2992_v34, %s6407_s14  ;;  %s6415_s14 = smov 17  }
 0x2fc   : > { %1713 = vrot.lane.b32.xlu0 %v2990_v32, %s6409_s24 }
 0x2fe   : > { %1715 = vrot.lane.b32.xlu1 %v2992_v34, %s6409_s24  ;;  %s6417_s24 = smov 16  }
 0x300   : > { %1727 = vrot.lane.b32.xlu0 %v2990_v32, %s6411_s22 }
 0x302   : > { %1729 = vrot.lane.b32.xlu1 %v2992_v34, %s6411_s22  ;;  %s6419_s22 = smov 15  }
 0x304   : > { %1741 = vrot.lane.b32.xlu0 %v2990_v32, %s6413_s11 }
 0x306   : > { %1743 = vrot.lane.b32.xlu1 %v2992_v34, %s6413_s11  ;;  %s6421_s11 = smov 14  }
 0x308   : > { %1755 = vrot.lane.b32.xlu0 %v2990_v32, %s6415_s14 }
 0x30a   : > { %1757 = vrot.lane.b32.xlu1 %v2992_v34, %s6415_s14  ;;  %s6423_s14 = smov 13  }
 0x30c   : > { %1769 = vrot.lane.b32.xlu0 %v2990_v32, %s6417_s24 }
 0x30e   : > { %1771 = vrot.lane.b32.xlu1 %v2992_v34, %s6417_s24  ;;  %s6425_s24 = smov 3  }
 0x310   : > { %1783 = vrot.lane.b32.xlu0 %v2990_v32, %s6419_s22 }
 0x312   : > { %1785 = vrot.lane.b32.xlu1 %v2992_v34, %s6419_s22  ;;  %s6427_s22 = smov 2  }
 0x314   : > { %1797 = vrot.lane.b32.xlu0 %v2990_v32, %s6421_s11 }
 0x316   : > { %1799 = vrot.lane.b32.xlu1 %v2992_v34, %s6421_s11  ;;  %s6429_s11 = smov 1  }
 0x318   : > { %1811 = vrot.lane.b32.xlu0 %v2990_v32, %s6423_s14 }
 0x31a   : > { %1813 = vrot.lane.b32.xlu1 %v2992_v34, %s6423_s14  ;;  %s6431_s14 = smov 127  }
 0x31c   : > { %1825 = vrot.lane.b32.xlu0 %v2990_v32, %s6425_s24 }
 0x31e   : > { %1827 = vrot.lane.b32.xlu1 %v2992_v34, %s6425_s24  ;;  %s2722_s24 = smov 126  }
 0x320   : > { %1839 = vrot.lane.b32.xlu0 %v2990_v32, %s6427_s22 }
 0x322   : > { %1841 = vrot.lane.b32.xlu1 %v2992_v34, %s6427_s22  ;;  %s6433_s22 = smov 125  }
 0x324   : > { %1853 = vrot.lane.b32.xlu0 %v2990_v32, %s6429_s11 }
 0x326   : > { %1855 = vrot.lane.b32.xlu1 %v2992_v34, %s6429_s11  ;;  %s6435_s11 = smov 115  }
 0x328   : > { %1875 = vrot.lane.b32.xlu0 %v2990_v32, %s6431_s14 }
 0x32a   : > { %1877 = vrot.lane.b32.xlu1 %v2992_v34, %s6431_s14  ;;  %s6437_s14 = smov 114  }
 0x32c   : > { %1889 = vrot.lane.b32.xlu0 %v2990_v32, %s2722_s24 }
 0x32e   : > { %1891 = vrot.lane.b32.xlu1 %v2992_v34, %s2722_s24 }
 0x330   : > { %1903 = vrot.lane.b32.xlu0 %v2990_v32, %s6433_s22 }
 0x332   : > { %1905 = vrot.lane.b32.xlu1 %v2992_v34, %s6433_s22  ;;  %s6439_s22 = smov 113  }
 0x334   : > { %1917 = vrot.lane.b32.xlu0 %v2990_v32, %s6435_s11 }
 0x336   : > { %1919 = vrot.lane.b32.xlu1 %v2992_v34, %s6435_s11  ;;  %s6441_s11 = smov 112  }
 0x338   : > { %1931 = vrot.lane.b32.xlu0 %v2990_v32, %s6437_s14 }
 0x33a   : > { %v3108_v35 = vpop.permute.xlu0 %1531  ;;  %1933 = vrot.lane.b32.xlu1 %v2992_v34, %s6437_s14  ;;  %s6443_s14 = smov 111  }
 0x33c   : > { %1945 = vrot.lane.b32.xlu0 %v2990_v32, %s6439_s22  ;;  %v3116_v37 = vpop.permute.xlu1 %1533 }
 0x33e   : > { %v3118_v39 = vpop.permute.xlu0 %1545  ;;  %1947 = vrot.lane.b32.xlu1 %v2992_v34, %s6439_s22  ;;  %s6445_s22 = smov 110  }
 0x340   : > { %1959 = vrot.lane.b32.xlu0 %v2990_v32, %s6441_s11  ;;  %v3124_v40 = vpop.permute.xlu1 %1547 }
 0x342   : > { %v3126_v43 = vpop.permute.xlu0 %1559  ;;  %1961 = vrot.lane.b32.xlu1 %v2992_v34, %s6441_s11  ;;  %s6489_s11 = smov 109  }
 0x344   : > { %1973 = vrot.lane.b32.xlu0 %v2990_v32, %s6443_s14  ;;  %v3132_v44 = vpop.permute.xlu1 %1561 }
 0x346   : > { %v3134_v46 = vpop.permute.xlu0 %1573  ;;  %1975 = vrot.lane.b32.xlu1 %v2992_v34, %s6443_s14  ;;  %s6447_s14 = smov 99  }
 0x348   : > { %1987 = vrot.lane.b32.xlu0 %v2990_v32, %s6445_s22  ;;  %v3140_v47 = vpop.permute.xlu1 %1575 }
 0x34a   : > { %v3142_v49 = vpop.permute.xlu0 %1587  ;;  %1989 = vrot.lane.b32.xlu1 %v2992_v34, %s6445_s22  ;;  %s6449_s22 = smov 98  }
 0x34c   : > { %2001 = vrot.lane.b32.xlu0 %v2990_v32, %s6489_s11  ;;  %v3148_v50 = vpop.permute.xlu1 %1589 }
 0x34e   : > { %v3150_v52 = vpop.permute.xlu0 %1601  ;;  %2003 = vrot.lane.b32.xlu1 %v2992_v34, %s6489_s11  ;;  %s3440_s11 = sld [smem:[#allocation7 + $0x35]] }
 0x350   : > { %2015 = vrot.lane.b32.xlu0 %v2990_v32, %s6447_s14  ;;  %v3156_v53 = vpop.permute.xlu1 %1603 }
 0x352   : > { %v3158_v55 = vpop.permute.xlu0 %1615  ;;  %2017 = vrot.lane.b32.xlu1 %v2992_v34, %s6447_s14  ;;  %s6486_s14 = smov 97  }
 0x354   : > { %2029 = vrot.lane.b32.xlu0 %v2990_v32, %s6449_s22  ;;  %v3164_v56 = vpop.permute.xlu1 %1617  ;;  %6811 = sst [smem:[#allocation89_spill]] %s3440_s11 }
 0x355   : > { %s3698_s11 = sld [smem:[#allocation7 + $0x52]] }
 0x356   : > { %v3170_v59 = vpop.permute.xlu0 %1629  ;;  %2031 = vrot.lane.b32.xlu1 %v2992_v34, %s6449_s22  ;;  %s6452_s22 = smov 96  }
 0x358   : > { %628 = vrot.lane.b32.xlu0 %v3168_v58, %s6451_s15  ;;  %v3176_v61 = vpop.permute.xlu1 %1631  ;;  %s6454_s15 = smov 95  }
 0x35a   : > { %v3178_v62 = vpop.permute.xlu0 %1643  ;;  %2045 = vrot.lane.b32.xlu1 %v2992_v34, %s6486_s14  ;;  %s6809_s14 = smov 111  }
 0x35c   : > { %656 = vrot.lane.b32.xlu0 %v3168_v58, %s2698_s28  ;;  %v3184_v1 = vpop.permute.xlu1 %1645 }
 0x35e   : > { %v3186_v2 = vpop.permute.xlu0 %1657  ;;  %2059 = vrot.lane.b32.xlu1 %v2992_v34, %s6452_s22  ;;  %s6456_s22 = smov 94  }
 0x35f   : > { %6728 = vst [vmem:[#allocation27_spill] sm:$0xff] %v3186_v2 }
 0x360   : > { %684 = vrot.lane.b32.xlu0 %v3168_v58, %s2699_s19  ;;  %v3192_v4 = vpop.permute.xlu1 %1659 }
 0x361   : > { %6729 = vst [vmem:[#allocation28_spill] sm:$0xff] %v3192_v4 }
 0x362   : > { %v3194_v5 = vpop.permute.xlu0 %1671  ;;  %2073 = vrot.lane.b32.xlu1 %v2992_v34, %s6454_s15  ;;  %s6484_s15 = smov 93  }
 0x363   : > { %6730 = vst [vmem:[#allocation29_spill] sm:$0xff] %v3194_v5  ;;  %v6891_v5 = vmov 0 }
 0x364   : > { %712 = vrot.lane.b32.xlu0 %v3168_v58, %s2700_s27  ;;  %v3200_v7 = vpop.permute.xlu1 %1673 }
 0x365   : > { %6731 = vst [vmem:[#allocation30_spill] sm:$0xff] %v3200_v7 }
 0x366   : > { %v3202_v9 = vpop.permute.xlu0 %1685  ;;  %2087 = vrot.lane.b32.xlu1 %v2992_v34, %s6456_s22  ;;  %s6481_s22 = smov 83  }
 0x367   : > { %6732 = vst [vmem:[#allocation31_spill] sm:$0xff] %v3202_v9 }
 0x368   : > { %740 = vrot.lane.b32.xlu0 %v3168_v58, %s2701_s6  ;;  %v3208_v12 = vpop.permute.xlu1 %1687 }
 0x369   : > { %6733 = vst [vmem:[#allocation32_spill] sm:$0xff] %v3208_v12 }
 0x36a   : > { %v3210_v15 = vpop.permute.xlu0 %1699  ;;  %2101 = vrot.lane.b32.xlu1 %v2992_v34, %s6484_s15  ;;  %s3432_s15 = sld [smem:[#allocation7 + $0x33]] }
 0x36b   : > { %6734 = vst [vmem:[#allocation33_spill] sm:$0xff] %v3210_v15 }
 0x36c   : > { %768 = vrot.lane.b32.xlu0 %v3168_v58, %s2702_s12  ;;  %v3216_v17 = vpop.permute.xlu1 %1701 }
 0x36d   : > { %6735 = vst [vmem:[#allocation34_spill] sm:$0xff] %v3216_v17 }
 0x36e   : > { %v3218_v18 = vpop.permute.xlu0 %1713  ;;  %2115 = vrot.lane.b32.xlu1 %v2992_v34, %s6481_s22  ;;  %s3426_s22 = sld [smem:[#allocation7 + $0x32]] }
 0x36f   : > { %6736 = vst [vmem:[#allocation35_spill] sm:$0xff] %v3218_v18 }
 0x370   : > { %796 = vrot.lane.b32.xlu0 %v3168_v58, %s2703_s17  ;;  %v3226_v21 = vpop.permute.xlu1 %1715  ;;  %6807 = sst [smem:[#allocation86_spill]] %s3432_s15  ;;  %s6865_s15 = smov 95  }
 0x371   : > { %6737 = vst [vmem:[#allocation36_spill] sm:$0xff] %v3226_v21 }
 0x372   : > { %v3228_v22 = vpop.permute.xlu0 %1727  ;;  %658 = vrot.lane.b32.xlu1 %v3222_v20, %s2698_s28  ;;  %s6745_s28 = smov 32  }
 0x373   : > { %6738 = vst [vmem:[#allocation37_spill] sm:$0xff] %v3228_v22  ;;  %v6854_v22 = vmov 0 }
 0x374   : > { %824 = vrot.lane.b32.xlu0 %v3168_v58, %s2704_s16  ;;  %v3234_v23 = vpop.permute.xlu1 %1729  ;;  %6806 = sst [smem:[#allocation85_spill]] %s3426_s22 }
 0x375   : > { %6739 = vst [vmem:[#allocation38_spill] sm:$0xff] %v3234_v23  ;;  %s3657_s22 = sld [smem:[#allocation7 + $0x4f]] }
 0x376   : > { %v3236_v24 = vpop.permute.xlu0 %1741  ;;  %686 = vrot.lane.b32.xlu1 %v3222_v20, %s2699_s19  ;;  %s6748_s19 = smov 31  }
 0x377   : > { %6740 = vst [vmem:[#allocation39_spill] sm:$0xff] %v3236_v24  ;;  %v6845_v24 = vmov 0 }
 0x378   : > { %841 = vrot.lane.b32.xlu0 %v3168_v58, %s2705_s20  ;;  %v3242_v25 = vpop.permute.xlu1 %1743 }
 0x379   : > { %6741 = vst [vmem:[#allocation40_spill] sm:$0xff] %v3242_v25  ;;  %v6848_v25 = vmov 0 }
 0x37a   : > { %v3244_v26 = vpop.permute.xlu0 %1755  ;;  %714 = vrot.lane.b32.xlu1 %v3222_v20, %s2700_s27  ;;  %s6751_s27 = smov 30  }
 0x37b   : > { %6742 = vst [vmem:[#allocation41_spill] sm:$0xff] %v3244_v26  ;;  %v6839_v26 = vmov 0  ;;  %6860 = sst [smem:[#allocation110_spill]] %s3657_s22  ;;  %s6894_s22 = smov 98  }
 0x37c   : > { %858 = vrot.lane.b32.xlu0 %v3168_v58, %s2706_s21  ;;  %v3250_v10 = vpop.permute.xlu1 %1757 }
 0x37d   : > { %6743 = vst [vmem:[#allocation42_spill] sm:$0xff] %v3250_v10 }
 0x37e   : > { %v3252_v27 = vpop.permute.xlu0 %1769  ;;  %742 = vrot.lane.b32.xlu1 %v3222_v20, %s2701_s6  ;;  %s6754_s6 = smov 29  }
 0x37f   : > { %6744 = vst [vmem:[#allocation43_spill] sm:$0xff] %v3252_v27 }
 0x380   : > { %875 = vrot.lane.b32.xlu0 %v3168_v58, %s6745_s28  ;;  %v3258_v28 = vpop.permute.xlu1 %1771 }
 0x381   : > { %6746 = vst [vmem:[#allocation44_spill] sm:$0xff] %v3258_v28 }
 0x382   : > { %v3260_v29 = vpop.permute.xlu0 %1783  ;;  %770 = vrot.lane.b32.xlu1 %v3222_v20, %s2702_s12  ;;  %s6757_s12 = smov 19  }
 0x383   : > { %6747 = vst [vmem:[#allocation45_spill] sm:$0xff] %v3260_v29 }
 0x384   : > { %892 = vrot.lane.b32.xlu0 %v3168_v58, %s6748_s19  ;;  %v3266_v30 = vpop.permute.xlu1 %1785 }
 0x385   : > { %6749 = vst [vmem:[#allocation46_spill] sm:$0xff] %v3266_v30 }
 0x386   : > { %v3268_v31 = vpop.permute.xlu0 %1797  ;;  %798 = vrot.lane.b32.xlu1 %v3222_v20, %s2703_s17  ;;  %s6760_s17 = smov 18  }
 0x387   : > { %6750 = vst [vmem:[#allocation47_spill] sm:$0xff] %v3268_v31 }
 0x388   : > { %909 = vrot.lane.b32.xlu0 %v3168_v58, %s6751_s27  ;;  %v3274_v0 = vpop.permute.xlu1 %1799 }
 0x389   : > { %6752 = vst [vmem:[#allocation48_spill] sm:$0xff] %v3274_v0 }
 0x38a   : > { %v3276_v33 = vpop.permute.xlu0 %1811  ;;  %826 = vrot.lane.b32.xlu1 %v3222_v20, %s2704_s16  ;;  %s6763_s16 = smov 17  }
 0x38b   : > { %6753 = vst [vmem:[#allocation49_spill] sm:$0xff] %v3276_v33  ;;  %v6829_v33 = vmov 0 }
 0x38c   : > { %926 = vrot.lane.b32.xlu0 %v3168_v58, %s6754_s6  ;;  %v3282_v36 = vpop.permute.xlu1 %1813 }
 0x38d   : > { %6755 = vst [vmem:[#allocation50_spill] sm:$0xff] %v3282_v36 }
 0x38e   : > { %v3284_v38 = vpop.permute.xlu0 %1825  ;;  %843 = vrot.lane.b32.xlu1 %v3222_v20, %s2705_s20  ;;  %s6766_s20 = smov 16  }
 0x38f   : > { %6756 = vst [vmem:[#allocation51_spill] sm:$0xff] %v3284_v38 }
 0x390   : > { %943 = vrot.lane.b32.xlu0 %v3168_v58, %s6757_s12  ;;  %v3290_v41 = vpop.permute.xlu1 %1827 }
 0x391   : > { %6758 = vst [vmem:[#allocation52_spill] sm:$0xff] %v3290_v41  ;;  %v6827_v41 = vmov 0 }
 0x392   : > { %v3292_v45 = vpop.permute.xlu0 %1839  ;;  %860 = vrot.lane.b32.xlu1 %v3222_v20, %s2706_s21  ;;  %s6769_s21 = smov 15  }
 0x393   : > { %6759 = vst [vmem:[#allocation53_spill] sm:$0xff] %v3292_v45 }
 0x394   : > { %960 = vrot.lane.b32.xlu0 %v3168_v58, %s6760_s17  ;;  %v3298_v48 = vpop.permute.xlu1 %1841 }
 0x395   : > { %6761 = vst [vmem:[#allocation54_spill] sm:$0xff] %v3298_v48 }
 0x396   : > { %v3300_v51 = vpop.permute.xlu0 %1853  ;;  %877 = vrot.lane.b32.xlu1 %v3222_v20, %s6745_s28  ;;  %s6772_s28 = smov 14  }
 0x397   : > { %6762 = vst [vmem:[#allocation55_spill] sm:$0xff] %v3300_v51 }
 0x398   : > { %977 = vrot.lane.b32.xlu0 %v3168_v58, %s6763_s16  ;;  %v3306_v54 = vpop.permute.xlu1 %1855 }
 0x399   : > { %6764 = vst [vmem:[#allocation56_spill] sm:$0xff] %v3306_v54 }
 0x39a   : > { %v3308_v57 = vpop.permute.xlu0 %1875  ;;  %894 = vrot.lane.b32.xlu1 %v3222_v20, %s6748_s19  ;;  %s6775_s19 = smov 13  }
 0x39b   : > { %6765 = vst [vmem:[#allocation57_spill] sm:$0xff] %v3308_v57 }
 0x39c   : > { %994 = vrot.lane.b32.xlu0 %v3168_v58, %s6766_s20  ;;  %v3314_v60 = vpop.permute.xlu1 %1877 }
 0x39d   : > { %6767 = vst [vmem:[#allocation58_spill] sm:$0xff] %v3314_v60 }
 0x39e   : > { %v3316_v63 = vpop.permute.xlu0 %1889  ;;  %911 = vrot.lane.b32.xlu1 %v3222_v20, %s6751_s27  ;;  %s6778_s27 = smov 3  }
 0x39f   : > { %6768 = vst [vmem:[#allocation59_spill] sm:$0xff] %v3316_v63 }
 0x3a0   : > { %1011 = vrot.lane.b32.xlu0 %v3168_v58, %s6769_s21  ;;  %v3322_v3 = vpop.permute.xlu1 %1891 }
 0x3a1   : > { %6770 = vst [vmem:[#allocation60_spill] sm:$0xff] %v3322_v3  ;;  %v6820_v3 = vmov 0  }
 0x3a2   : > { %v3324_v6 = vpop.permute.xlu0 %1903  ;;  %928 = vrot.lane.b32.xlu1 %v3222_v20, %s6754_s6  ;;  %s6781_s6 = smov 2  }
 0x3a3   : > { %6771 = vst [vmem:[#allocation61_spill] sm:$0xff] %v3324_v6 }
 0x3a4   : > { %1028 = vrot.lane.b32.xlu0 %v3168_v58, %s6772_s28  ;;  %v3330_v11 = vpop.permute.xlu1 %1905 }
 0x3a5   : > { %6773 = vst [vmem:[#allocation62_spill] sm:$0xff] %v3330_v11 }
 0x3a6   : > { %v3332_v16 = vpop.permute.xlu0 %1917  ;;  %945 = vrot.lane.b32.xlu1 %v3222_v20, %s6757_s12  ;;  %s6784_s12 = smov 1  }
 0x3a7   : > { %6774 = vst [vmem:[#allocation63_spill] sm:$0xff] %v3332_v16 }
 0x3a8   : > { %1045 = vrot.lane.b32.xlu0 %v3168_v58, %s6775_s19  ;;  %v3338_v8 = vpop.permute.xlu1 %1919 }
 0x3a9   : > { %6776 = vst [vmem:[#allocation64_spill] sm:$0xff] %v3338_v8 }
 0x3aa   : > { %v3340_v19 = vpop.permute.xlu0 %1931  ;;  %962 = vrot.lane.b32.xlu1 %v3222_v20, %s6760_s17  ;;  %s6787_s17 = smov 127  }
 0x3ab   : > { %6777 = vst [vmem:[#allocation65_spill] sm:$0xff] %v3340_v19 }
 0x3ac   : > { %1062 = vrot.lane.b32.xlu0 %v3168_v58, %s6778_s27  ;;  %v3346_v6 = vpop.permute.xlu1 %1933 }
 0x3ad   : > { %6779 = vst [vmem:[#allocation66_spill] sm:$0xff] %v3346_v6 }
 0x3ae   : > { %v3348_v11 = vpop.permute.xlu0 %1945  ;;  %979 = vrot.lane.b32.xlu1 %v3222_v20, %s6763_s16  ;;  %s6792_s16 = smov 125  }
 0x3af   : > { %6780 = vst [vmem:[#allocation67_spill] sm:$0xff] %v3348_v11 }
 0x3b0   : > { %1079 = vrot.lane.b32.xlu0 %v3168_v58, %s6781_s6  ;;  %v3354_v16 = vpop.permute.xlu1 %1947 }
 0x3b1   : > { %6782 = vst [vmem:[#allocation68_spill] sm:$0xff] %v3354_v16 }
 0x3b2   : > { %v3356_v8 = vpop.permute.xlu0 %1959  ;;  %996 = vrot.lane.b32.xlu1 %v3222_v20, %s6766_s20  ;;  %s6795_s20 = smov 115  }
 0x3b3   : > { %6783 = vst [vmem:[#allocation69_spill] sm:$0xff] %v3356_v8 }
 0x3b4   : > { %1096 = vrot.lane.b32.xlu0 %v3168_v58, %s6784_s12  ;;  %v3362_v19 = vpop.permute.xlu1 %1961 }
 0x3b5   : > { %6785 = vst [vmem:[#allocation70_spill] sm:$0xff] %v3362_v19 }
 0x3b6   : > { %v3364_v6 = vpop.permute.xlu0 %1973  ;;  %1013 = vrot.lane.b32.xlu1 %v3222_v20, %s6769_s21  ;;  %s6798_s21 = smov 114  }
 0x3b7   : > { %6786 = vst [vmem:[#allocation71_spill] sm:$0xff] %v3364_v6 }
 0x3b8   : > { %1123 = vrot.lane.b32.xlu0 %v3168_v58, %s6787_s17  ;;  %v3370_v11 = vpop.permute.xlu1 %1975 }
 0x3b9   : > { %6788 = vst [vmem:[#allocation72_spill] sm:$0xff] %v3370_v11 }
 0x3ba   : > { %v3372_v16 = vpop.permute.xlu0 %1987  ;;  %1030 = vrot.lane.b32.xlu1 %v3222_v20, %s6772_s28  ;;  %s6801_s28 = smov 113  }
 0x3bb   : > { %6789 = vst [vmem:[#allocation73_spill] sm:$0xff] %v3372_v16 }
 0x3bc   : > { %1140 = vrot.lane.b32.xlu0 %v3168_v58, %s2722_s24  ;;  %v3378_v8 = vpop.permute.xlu1 %1989 }
 0x3bd   : > { %6790 = vst [vmem:[#allocation74_spill] sm:$0xff] %v3378_v8 }
 0x3be   : > { %v3380_v19 = vpop.permute.xlu0 %2001  ;;  %1047 = vrot.lane.b32.xlu1 %v3222_v20, %s6775_s19  ;;  %s3416_s19 = sld [smem:[#allocation7 + $0x18]] }
 0x3bf   : > { %6791 = vst [vmem:[#allocation75_spill] sm:$0xff] %v3380_v19 }
 0x3c0   : > { %1157 = vrot.lane.b32.xlu0 %v3168_v58, %s6792_s16  ;;  %v3386_v6 = vpop.permute.xlu1 %2003 }
 0x3c1   : > { %6793 = vst [vmem:[#allocation76_spill] sm:$0xff] %v3386_v6 }
 0x3c2   : > { %v3388_v11 = vpop.permute.xlu0 %2015  ;;  %1064 = vrot.lane.b32.xlu1 %v3222_v20, %s6778_s27  ;;  %s6803_s27 = smov 112  }
 0x3c3   : > { %6794 = vst [vmem:[#allocation77_spill] sm:$0xff] %v3388_v11 }
 0x3c4   : > { %1174 = vrot.lane.b32.xlu0 %v3168_v58, %s6795_s20  ;;  %v3394_v16 = vpop.permute.xlu1 %2017  ;;  %v1118_v0 = vstv %s3416_s19  ;;  %s3588_s19 = sld [smem:[#allocation7 + $0x4b]] }
 0x3c5   : > { %6796 = vst [vmem:[#allocation78_spill] sm:$0xff] %v3394_v16 }
 0x3c6   : > { %v3396_v8 = vpop.permute.xlu0 %2029  ;;  %1081 = vrot.lane.b32.xlu1 %v3222_v20, %s6781_s6  ;;  %s3422_s6 = sld [smem:[#allocation7 + $0x49]] }
 0x3c7   : > { %6797 = vst [vmem:[#allocation79_spill] sm:$0xff] %v3396_v8 }
 0x3c8   : > { %1191 = vrot.lane.b32.xlu0 %v3168_v58, %s6798_s21  ;;  %v3402_v19 = vpop.permute.xlu1 %2031 }
 0x3c9   : > { %6799 = vst [vmem:[#allocation80_spill] sm:$0xff] %v3402_v19 }
 0x3ca   : > { %v3404_v6 = vpop.permute.xlu0 %628  ;;  %1098 = vrot.lane.b32.xlu1 %v3222_v20, %s6784_s12  ;;  %s3424_s12 = sld [smem:[#allocation7 + $0x31]] }
 0x3cb   : > { %6800 = vst [vmem:[#allocation81_spill] sm:$0xff] %v3404_v6  ;;  %6842 = sst [smem:[#allocation103_spill]] %s3588_s19 }
 0x3cc   : > { %1208 = vrot.lane.b32.xlu0 %v3168_v58, %s6801_s28  ;;  %v3410_v11 = vpop.permute.xlu1 %2045  ;;  %v1870_v29 = vstv %s3422_s6  ;;  %s3595_s6 = sld [smem:[#allocation7 + $0x4c]] }
 0x3cd   : > { %6802 = vst [vmem:[#allocation82_spill] sm:$0xff] %v3410_v11  ;;  %s3802_s19 = sld [smem:[#allocation7 + $0x7]] }
 0x3ce   : > { %v3412_v16 = vpop.permute.xlu0 %656  ;;  %1125 = vrot.lane.b32.xlu1 %v3222_v20, %s6787_s17  ;;  %s3434_s17 = sld [smem:[#allocation7 + $0x34]] }
 0x3d0   : > { %1225 = vrot.lane.b32.xlu0 %v3168_v58, %s6803_s27  ;;  %v3420_v8 = vpop.permute.xlu1 %2059  ;;  %6805 = sst [smem:[#allocation84_spill]] %s3424_s12  ;;  %s6853_s12 = smov 96  }
 0x3d1   : > { %6804 = vst [vmem:[#allocation83_spill] sm:$0xff] %v3420_v8  ;;  %v3445_v8 = vld [vmem:[%s6812_s5] sm:$0x3]  ;;  %s3473_s5 = sld [smem:[#allocation7 + $0x3c]] }
 0x3d2   : > { %v3428_v6 = vpop.permute.xlu0 %684  ;;  %1142 = vrot.lane.b32.xlu1 %v3222_v20, %s2722_s24  ;;  %s3453_s24 = sld [smem:[#allocation7 + $0x37]]  ;;  %vm614_vm2 = vcmp.ge.s32.totalorder %v3445_v8, 0  ;;  %vm615_vm3 = vcmp.lt.s32.totalorder %v3445_v8, 16  ;;  %vm605_vm5 = vcmp.ge.s32.totalorder %v3445_v8, 3  ;;  %vm606_vm6 = vcmp.lt.s32.totalorder %v3445_v8, 19 }
 0x3d3   : > { %vm616_vm4 = vmand %vm614_vm2, %vm615_vm3  ;;  %vm608_vm7 = vcmp.ge.s32.totalorder %v3445_v8, 2  ;;  %vm609_vm8 = vcmp.lt.s32.totalorder %v3445_v8, 18  ;;  %vm611_vm10 = vcmp.ge.s32.totalorder %v3445_v8, 1  ;;  %vm612_vm11 = vcmp.lt.s32.totalorder %v3445_v8, 17  ;;  %6844 = sst [smem:[#allocation105_spill]] %s3595_s6 }
 0x3d4   : > { %6808 = sst [smem:[#allocation87_spill]] %s3434_s17  ;;  %1242 = vrot.lane.b32.xlu0 %v3168_v58, %s6809_s14  ;;  %v3438_v11 = vpop.permute.xlu1 %2073  ;;  %v719_v57 = vsel %vm616_vm4, 1, %v6820_v3  ;;  %vm607_vm9 = vmand %vm605_vm5, %vm606_vm6  ;;  %vm617_vm15 = vcmp.ge.s32.totalorder %v3445_v8, 4294967295  ;;  %vm618_vm0 = vcmp.lt.s32.totalorder %v3445_v8, 15  ;;  %vm620_vm2 = vcmp.ge.s32.totalorder %v3445_v8, 4294967294 }
 0x3d5   : > { %6810 = vst [vmem:[#allocation88_spill] sm:$0xff] %v3438_v11  ;;  %vm610_vm12 = vmand %vm608_vm7, %vm609_vm8  ;;  %v723_v60 = vrot.slane %v719_v57, %v2945_v13  ;;  %v635_v54 = vsel %vm607_vm9, 1, %v6820_v3  ;;  %vm621_vm3 = vcmp.lt.s32.totalorder %v3445_v8, 14  ;;  %vm6565_vm4 = vcmp.lt.s32.totalorder %v2957_v42, 51  ;;  %s3688_s17 = sld [smem:[#allocation7 + $0x51]] }
 0x3d6   : > { %v3449_v19 = vpop.permute.xlu0 %712  ;;  %1159 = vrot.lane.b32.xlu1 %v3222_v20, %s6792_s16  ;;  %s3471_s16 = sld [smem:[#allocation7 + $0x3b]]  ;;  %vm613_vm13 = vmand %vm611_vm10, %vm612_vm11  ;;  %v663_v48 = vsel %vm610_vm12, 1, %v6820_v3  ;;  %v643_v36 = vrot.slane %v635_v54, %v2948_v14  ;;  %vm623_vm6 = vcmp.ge.s32.totalorder %v3445_v8, 4294967293  ;;  %vm624_vm7 = vcmp.lt.s32.totalorder %v3445_v8, 13 }
 0x3d7   : > { %vm3524_vm14 = vcmp.ne.s32.totalorder %v723_v60, 0  ;;  %v3538_v60 = vsel %vm613_vm13, 1, %v6820_v3  ;;  %v667_v31 = vrot.slane %v663_v48, %v2945_v13  ;;  %v671_v30 = vrot.slane %v663_v48, %v2948_v14  ;;  %vm3564_vm5 = vmand %vm617_vm15, %vm618_vm0  ;;  %s6886_s6 = sld [smem:[#allocation85_spill]] }
 0x3d8   : > { %1259 = vrot.lane.b32.xlu0 %v3168_v58, %s6814_s4  ;;  %v3459_v11 = vpop.permute.xlu1 %2087  ;;  %v6828_v41 = vsel %vm3524_vm14, 4294967295, %v6827_v41  ;;  %vm6580_vm8 = vcmp.ge.s32.totalorder %v2957_v42, 48  ;;  %v695_v48 = vrot.slane %v3538_v60, %v2945_v13  ;;  %vm3580_vm9 = vmand %vm620_vm2, %vm621_vm3  ;;  %vm6566_vm11 = vcmp.lt.s32.totalorder %v2957_v42, 50 }
 0x3d9   : > { %6815 = vst [vmem:[#allocation91_spill] sm:$0xff] %v3459_v11  ;;  %v1115_v10 = vsel %vm3524_vm14, %v3168_v58, 0.0  ;;  %vm3606_vm12 = vcmp.ne.s32.totalorder %v643_v36, 0  ;;  %vm3610_vm13 = vcmp.ne.s32.totalorder %v667_v31, 0  ;;  %v3618_v23 = vsel %vm3564_vm5, 1, %v6820_v3  ;;  %vm3624_vm15 = vmand %vm623_vm6, %vm624_vm7 }
 0x3da   : > { %v3467_v63 = vpop.permute.xlu0 %740  ;;  %1176 = vrot.lane.b32.xlu1 %v3222_v20, %s6795_s20  ;;  %s3492_s20 = sld [smem:[#allocation7 + $0x3f]]  ;;  %v6846_v24 = vsel %vm3606_vm12, 4294967295, %v6845_v24  ;;  %v6849_v25 = vsel %vm3610_vm13, 4294967295, %v6848_v25  ;;  %vm3637_vm0 = vcmp.ne.s32.totalorder %v671_v30, 0  ;;  %v699_v8 = vrot.slane %v3538_v60, %v2948_v14  ;;  %vm3754_vm7 = vmand %vm6580_vm8, %vm3610_vm13 }
 0x3db   : > { %6817 = vst [vmem:[#allocation93_spill] sm:$0xff] %v3467_v63  ;;  %6847 = vst [vmem:[#allocation106_spill] sm:$0xff] %v6846_v24  ;;  %v6855_v22 = vsel %vm3637_vm0, 4294967295, %v6854_v22  ;;  %v3647_v18 = vsel %vm3580_vm9, 1, %v6820_v3  ;;  %vm6587_vm2 = vcmp.lt.s32.totalorder %v2957_v42, 49  ;;  %vm3652_vm3 = vcmp.ne.s32.totalorder %v695_v48, 0 }
 0x3dc   : > { %1276 = vrot.lane.b32.xlu0 %v3168_v58, %s6818_s9  ;;  %v3477_v11 = vpop.permute.xlu1 %2101  ;;  %6850 = vst [vmem:[#allocation107_spill] sm:$0xff] %v6849_v25  ;;  %6856 = vst [vmem:[#allocation108_spill] sm:$0xff] %v6855_v22  ;;  %v6858_v30 = vmov 0  ;;  %v3663_v28 = vmul.f32 %v1118_v0, %v1115_v10  ;;  %v3676_v17 = vsel %vm3624_vm15, 1, %v6820_v3  ;;  %v779_v21 = vrot.slane %v3647_v18, %v2945_v13 }
 0x3dd   : > { %6819 = vst [vmem:[#allocation94_spill] sm:$0xff] %v3477_v11  ;;  %v6859_v30 = vsel %vm3652_vm3, 4294967295, %v6858_v30  ;;  %vm3700_vm5 = vcmp.ne.s32.totalorder %v699_v8, 0  ;;  %v807_v36 = vrot.slane %v3676_v17, %v2945_v13  ;;  %v6873_v48 = vmov 0  ;;  %vm3813_vm6 = vmand %vm6580_vm8, %vm3652_vm3 }
 0x3de   : > { %v3485_v63 = vpop.permute.xlu0 %768  ;;  %1193 = vrot.lane.b32.xlu1 %v3222_v20, %s6798_s21  ;;  %s3502_s21 = sld [smem:[#allocation7 + $0x41]]  ;;  %6861 = vst [vmem:[#allocation111_spill] sm:$0xff] %v3663_v28  ;;  %vm3730_vm9 = vcmp.ne.s32.totalorder %v779_v21, 0  ;;  %v1536_v21 = vsel %vm6565_vm4, %v3116_v37, %v3108_v35  ;;  %v6880_v28 = vmov 0  ;;  %v3836_v12 = vsel %vm6587_vm2, %v3126_v43, %v3132_v44 }
 0x3df   : > { %vm6901_vm13 = vcmp.lt.s32.totalorder %v2957_v42, 50  ;;  %v6920_v25 = vmov 0 }
 0x3e0   : > { %1293 = vrot.lane.b32.xlu0 %v3168_v58, %s6821_s13  ;;  %v3498_v11 = vpop.permute.xlu1 %2115 }
 0x3e1   : > { %6822 = vst [vmem:[#allocation95_spill] sm:$0xff] %v3498_v11  ;;  %v727_v11 = vrot.slane %v719_v57, %v2948_v14  ;;  %v639_v57 = vrot.slane %v635_v54, %v2945_v13 }
 0x3e2   : > { %v3507_v51 = vpop.permute.xlu0 %796  ;;  %1210 = vrot.lane.b32.xlu1 %v3222_v20, %s6801_s28  ;;  %s3531_s28 = sld [smem:[#allocation7 + $0x46]] }
 0x3e3   : > { %vm3540_vm1 = vcmp.ne.s32.totalorder %v727_v11, 0  ;;  %vm3584_vm10 = vcmp.ne.s32.totalorder %v639_v57, 0  ;;  %v1867_v57 = vsel %vm3524_vm14, %v2990_v32, 0.0 }
 0x3e4   : > { %6823 = sst [smem:[#allocation96_spill]] %s3502_s21  ;;  %1310 = vrot.lane.b32.xlu0 %v3168_v58, %s6826_s25  ;;  %v3519_v45 = vpop.permute.xlu1 %658  ;;  %v6830_v33 = vsel %vm3540_vm1, 4294967295, %v6829_v33  ;;  %v6840_v26 = vsel %vm3584_vm10, 4294967295, %v6839_v26  ;;  %v1116_v54 = vsel %vm3540_vm1, %v3222_v20, 0.0  ;;  %s6872_s21 = smov 94   ;;  %vm3742_vm15 = vmand %vm6580_vm8, %vm3584_vm10 }
 0x3e5   : > { %s3550_s25 = sld [smem:[#allocation7 + $0x48]]  ;;  %6841 = vst [vmem:[#allocation102_spill] sm:$0xff] %v6840_v26  ;;  %v3680_v10 = vmul.f32 %v1118_v0, %v1116_v54  ;;  %v6869_v54 = vmov 0  ;;  %v6874_v48 = vsel %vm3742_vm15, 4294967295, %v6873_v48  ;;  %v811_v0 = vrot.slane %v3676_v17, %v2948_v14 }
 0x3e6   : > { %v3533_v38 = vpop.permute.xlu0 %824  ;;  %1227 = vrot.lane.b32.xlu1 %v3222_v20, %s6803_s27  ;;  %s6833_s27 = smov 97   ;;  %v6870_v54 = vsel %vm3730_vm9, 4294967295, %v6869_v54  ;;  %6875 = vst [vmem:[#allocation117_spill] sm:$0xff] %v6874_v48  ;;  %v1537_v8 = vsel %vm3742_vm15, %v1536_v21, 0.0 }
 0x3e7   : > { %6864 = vst [vmem:[#allocation114_spill] sm:$0xff] %v3680_v10  ;;  %6871 = vst [vmem:[#allocation116_spill] sm:$0xff] %v6870_v54  ;;  %vm3838_vm8 = vcmp.ne.s32.totalorder %v811_v0, 0  ;;  %v6919_v54 = vrot.slane %v3618_v23, %v2945_v13 }
 0x3e8   : > { %1327 = vrot.lane.b32.xlu0 %v3168_v58, %s6833_s27  ;;  %v3554_v11 = vpop.permute.xlu1 %686  ;;  %s3570_s27 = sld [smem:[#allocation7 + $0x4a]]  ;;  %v6892_v5 = vsel %vm3838_vm8, 4294967295, %v6891_v5 }
 0x3e9   : > { %6893 = vst [vmem:[#allocation121_spill] sm:$0xff] %v6892_v5 }
 0x3ea   : > { %v3590_v27 = vpop.permute.xlu0 %841  ;;  %1244 = vrot.lane.b32.xlu1 %v3222_v20, %s6809_s14  ;;  %s3628_s14 = sld [smem:[#allocation7 + $0x4d]] }
 0x3eb   : > { %6832 = sst [smem:[#allocation100_spill]] %s3550_s25  ;;  %6843 = vst [vmem:[#allocation104_spill] sm:$0xff] %v3590_v27  ;;  %v1868_v27 = vsel %vm3540_vm1, %v2992_v34, 0.0  ;;  %v3665_v34 = vmul.f32 %v1870_v29, %v1867_v57  ;;  %v6867_v57 = vmov 0  ;;  %vm6907_vm1 = vcmp.lt.s32.totalorder %v2957_v42, 49 }
 0x3ec   : > { %1344 = vrot.lane.b32.xlu0 %v3168_v58, %s6853_s12  ;;  %v3632_v31 = vpop.permute.xlu1 %714  ;;  %s3649_s12 = sld [smem:[#allocation7 + $0x4e]]  ;;  %v3667_v15 = vmul.f32 %v1870_v29, %v1868_v27  ;;  %v783_v29 = vrot.slane %v3647_v18, %v2948_v14  ;;  %v6868_v57 = vsel %vm3700_vm5, 4294967295, %v6867_v57  ;;  %v1549_v18 = vsel %vm6566_vm11, %v3118_v39, %v3124_v40 }
 0x3ed   : > { %6862 = vst [vmem:[#allocation112_spill] sm:$0xff] %v3665_v34  ;;  %s6883_s25 = sld [smem:[#allocation84_spill]] }
 0x3ee   : > { %6836 = sst [smem:[#allocation101_spill]] %s3570_s27  ;;  %v3659_v60 = vpop.permute.xlu0 %858  ;;  %1261 = vrot.lane.b32.xlu1 %v3222_v20, %s6814_s4  ;;  %6863 = vst [vmem:[#allocation113_spill] sm:$0xff] %v3667_v15  ;;  %v1535_v15 = vsel %vm6565_vm4, %v3108_v35, %v3116_v37  ;;  %v1550_v35 = vsel %vm6566_vm11, %v3124_v40, %v3118_v39  ;;  %vm3782_vm4 = vcmp.ne.s32.totalorder %v783_v29, 0  ;;  %v6878_v40 = vmov 0 }
 0x3ef   : > { %s3678_s4 = sld [smem:[#allocation7 + $0x50]]  ;;  %v1538_v39 = vsel %vm3606_vm12, %v1535_v15, 0.0  ;;  %v6879_v40 = vsel %vm3782_vm4, 4294967295, %v6878_v40  ;;  %vm3789_vm11 = vcmp.ne.s32.totalorder %v807_v36, 0  ;;  %v1551_v15 = vsel %vm3754_vm7, %v1550_v35, 0.0  ;;  %vm6902_vm12 = vmmov %vm6901_vm13 }
 0x3f0   : > { %1361 = vrot.lane.b32.xlu0 %v3168_v58, %s6865_s15  ;;  %v3692_v3 = vpop.permute.xlu1 %742  ;;  %v6881_v28 = vsel %vm3789_vm11, 4294967295, %v6880_v28  ;;  %v1552_v29 = vsel %vm3637_vm0, %v1549_v18, 0.0  ;;  %v3805_v36 = vadd.s32 128, %v2957_v42  ;;  %v3821_v35 = vsel %vm6587_vm2, %v3132_v44, %v3126_v43  ;;  %s3826_s27 = sld [smem:[#allocation7 + $0x9]] }
 0x3f1   : > { %6866 = vst [vmem:[#allocation115_spill] sm:$0xff] %v3692_v3  ;;  %6882 = vst [vmem:[#allocation118_spill] sm:$0xff] %v6881_v28  ;;  %v689_v43 = vsel %vm6907_vm1, %v3428_v6, %v3554_v11 }
 0x3f2   : > { %6857 = sst [smem:[#allocation109_spill]] %s3649_s12  ;;  %v3712_v27 = vpop.permute.xlu0 %875  ;;  %1278 = vrot.lane.b32.xlu1 %v3222_v20, %s6818_s9  ;;  %6885 = vst [vmem:[#allocation119_spill] sm:$0xff] %v3805_v36 }
 0x3f3   : > { %s3734_s9 = sld [smem:[#allocation7 + $0x2]]  ;;  %v6889_v48 = vstv %s6883_s25  ;;  %v6899_v44 = vstv %s6883_s25  ;;  %s6903_s25 = smov 83  }
 0x3f4   : > { %1378 = vrot.lane.b32.xlu0 %v3168_v58, %s6872_s21  ;;  %v771_v34 = vpop.permute.xlu1 %770  ;;  %v3830_v36 = vmul.f32 %v6889_v48, %v1538_v39  ;;  %s3848_s12 = sld [smem:[#allocation7 + $0xa]]  ;;  %v6895_v48 = vstv %s6886_s6  ;;  %v3861_v0 = vmul.f32 %v6899_v44, %v1537_v8  ;;  %v662_v8 = vsel %vm6902_vm12, %v3519_v45, %v3412_v16  ;;  %s6617_s6 = smov 80  }
 0x3f5   : > { %v3852_v39 = vmul.f32 %v6895_v48, %v1551_v15  ;;  %v6897_v21 = vmov %v6895_v48  ;;  %v661_v15 = vsel %vm6901_vm13, %v3412_v16, %v3519_v45  ;;  %vm6904_vm13 = vcmp.lt.s32.totalorder %v2957_v42, 48 }
 0x3f6   : > { %v3776_v9 = vpop.permute.xlu0 %892  ;;  %1295 = vrot.lane.b32.xlu1 %v3222_v20, %s6821_s13  ;;  %s3794_s13 = sld [smem:[#allocation7 + $0x6]]  ;;  %6890 = vst [vmem:[#allocation120_spill] sm:$0xff] %v3830_v36  ;;  %v3856_v36 = vmul.f32 %v6897_v21, %v1552_v29  ;;  %6900 = vst [vmem:[#allocation124_spill] sm:$0xff] %v3861_v0  ;;  %v3887_v48 = vsel %vm6904_vm13, %v3134_v46, %v3140_v47  ;;  %vm6905_vm12 = vcmp.lt.s32.totalorder %v2957_v42, 46  ;;  %v679_v44 = vstv %s3720_s1  ;;  %s2739_s1 = smov 82  }
 0x3f7   : > { %6896 = vst [vmem:[#allocation122_spill] sm:$0xff] %v3852_v39  ;;  %v773_v45 = vsel %vm6905_vm12, %v3485_v63, %v771_v34  ;;  %vm6906_vm15 = vmmov %vm6905_vm12 }
 0x3f8   : > { %1395 = vrot.lane.b32.xlu0 %v3168_v58, %s6884_s7  ;;  %v799_v3 = vpop.permute.xlu1 %798  ;;  %6898 = vst [vmem:[#allocation123_spill] sm:$0xff] %v3856_v36  ;;  %v774_v16 = vsel %vm6906_vm15, %v771_v34, %v3485_v63  ;;  %vm6908_vm13 = vmmov %vm6907_vm1  ;;  %v676_v34 = vsel %vm3754_vm7, %v662_v8, 0.0  ;;  %v677_v63 = vsel %vm3637_vm0, %v661_v15, 0.0  ;;  %vm6910_vm1 = vcmp.ge.s32.totalorder %v2957_v42, 48 }
 0x3f9   : > { %v707_v7 = vstv %s3734_s9  ;;  %v690_v21 = vsel %vm6908_vm13, %v3554_v11, %v3428_v6  ;;  %vm3918_vm15 = vmand %vm6910_vm1, %vm3730_vm9  ;;  %v791_v11 = vstv %s3774_s8  ;;  %v789_v8 = vsel %vm3782_vm4, %v773_v45, 0.0  ;;  %s6918_s8 = smov 96   ;;  %s4063_s9 = sld [smem:[#allocation7 + $0x54]] }
 0x3fa   : > { %v3844_v37 = vpop.permute.xlu0 %909  ;;  %1312 = vrot.lane.b32.xlu1 %v3222_v20, %s6894_s22  ;;  %s6909_s22 = smov 97   ;;  %v788_v10 = vsel %vm3918_vm15, %v774_v16, 0.0  ;;  %vm6913_vm7 = vcmp.lt.s32.totalorder %v2957_v42, 45  ;;  %v704_v16 = vsel %vm3813_vm6, %v690_v21, 0.0  ;;  %v705_v45 = vsel %vm3700_vm5, %v689_v43, 0.0 }
 0x3fb   : > { %v801_v15 = vsel %vm6913_vm7, %v3507_v51, %v799_v3  ;;  %vm6914_vm13 = vmmov %vm6913_vm7  ;;  %v680_v22 = vmul.f32 %v679_v44, %v676_v34  ;;  %v681_v32 = vmul.f32 %v679_v44, %v677_v63  ;;  %v870_v21 = vstv %s3826_s27  ;;  %s3981_s27 = sld [smem:[#allocation7 + $0xb]] }
 0x3fc   : > { %1412 = vrot.lane.b32.xlu0 %v3168_v58, %s6903_s25  ;;  %v827_v29 = vpop.permute.xlu1 %826  ;;  %v802_v36 = vsel %vm6914_vm13, %v799_v3, %v3507_v51  ;;  %v819_v0 = vstv %s3794_s13  ;;  %vm3948_vm7 = vmand %vm6910_vm1, %vm3789_vm11  ;;  %v6916_v51 = vmov 0  ;;  %v792_v43 = vmul.f32 %v791_v11, %v788_v10  ;;  %s4073_s13 = sld [smem:[#allocation7 + $0x55]] }
 0x3fd   : > { %v6917_v51 = vsel %vm3948_vm7, 4294967295, %v6916_v51  ;;  %v793_v34 = vmul.f32 %v791_v11, %v789_v8  ;;  %v816_v44 = vsel %vm3948_vm7, %v802_v36, 0.0  ;;  %v817_v63 = vsel %vm3838_vm8, %v801_v15, 0.0 }
 0x3fe   : > { %v3905_v17 = vpop.permute.xlu0 %926  ;;  %1329 = vrot.lane.b32.xlu1 %v3222_v20, %s6909_s22  ;;  %vm3966_vm1 = vcmp.ne.s32.totalorder %v6919_v54, 0  ;;  %v708_v2 = vmul.f32 %v707_v7, %v704_v16  ;;  %v709_v4 = vmul.f32 %v707_v7, %v705_v45  ;;  %vm6922_vm13 = vcmp.lt.s32.totalorder %v2957_v42, 48 }
 0x3ff   : > { %v6921_v25 = vsel %vm3966_vm1, 4294967295, %v6920_v25  ;;  %v717_v11 = vsel %vm6922_vm13, %v3449_v19, %v3632_v31  ;;  %vm6923_vm2 = vmmov %vm6922_vm13  ;;  %v6924_v7 = vrot.slane %v3618_v23, %v2948_v14  ;;  %v6925_v10 = vmov 0 }
 0x400   : > { %1429 = vrot.lane.b32.xlu0 %v3168_v58, %s2739_s1  ;;  %v3936_v39 = vpop.permute.xlu1 %843  ;;  %v718_v36 = vsel %vm6923_vm2, %v3632_v31, %v3449_v19  ;;  %vm6927_vm13 = vcmp.lt.s32.totalorder %v2957_v42, 35  ;;  %vm6929_vm9 = vcmp.ge.s32.totalorder %v2957_v42, 32  ;;  %v6930_v31 = vmov 0 }
 0x401   : > { %6915 = vst [vmem:[#allocation125_spill] sm:$0xff] %v3936_v39  ;;  %v887_v39 = vstv %s3848_s12  ;;  %s6621_s12 = smov 81   ;;  %vm3986_vm12 = vcmp.ne.s32.totalorder %v6924_v7, 0  ;;  %v829_v8 = vsel %vm6927_vm13, %v3533_v38, %v827_v29  ;;  %vm6928_vm2 = vmmov %vm6927_vm13  ;;  %vm6932_vm7 = vcmp.lt.s32.totalorder %v2957_v42, 33 }
 0x402   : > { %v3952_v3 = vpop.permute.xlu0 %943  ;;  %1346 = vrot.lane.b32.xlu1 %v3222_v20, %s6918_s8  ;;  %v6926_v10 = vsel %vm3986_vm12, 4294967295, %v6925_v10  ;;  %v830_v19 = vsel %vm6928_vm2, %v827_v29, %v3533_v38  ;;  %vm4000_vm0 = vmand %vm6929_vm9, %vm3652_vm3  ;;  %vm6934_vm13 = vcmp.ge.s32.totalorder %v2957_v42, 48  ;;  %v820_v29 = vmul.f32 %v819_v0, %v816_v44 }
 0x403   : > { %v6931_v31 = vsel %vm4000_vm0, 4294967295, %v6930_v31  ;;  %vm6933_vm8 = vmmov %vm6932_vm7  ;;  %v821_v15 = vmul.f32 %v819_v0, %v817_v63  ;;  %v6938_v44 = vmov 0  ;;  %vm6941_vm3 = vnez %v6846_v24 }
 0x404   : > { %1446 = vrot.lane.b32.xlu0 %v3168_v58, %s6621_s12  ;;  %v861_v54 = vpop.permute.xlu1 %860  ;;  %vm4014_vm2 = vmand %vm6934_vm13, %vm3524_vm14  ;;  %vm6940_vm13 = vnez %v6830_v33  ;;  %s6625_s12 = smov 79  }
 0x405   : > { %v863_v14 = vsel %vm6932_vm7, %v3659_v60, %v861_v54  ;;  %v864_v23 = vsel %vm6933_vm8, %v861_v54, %v3659_v60  ;;  %v794_v60 = vadd.f32 %v792_v43, %v680_v22  ;;  %v795_v54 = vadd.f32 %v793_v34, %v681_v32  ;;  %vm6937_vm8 = vmmov %vm6929_vm9 }
 0x406   : > { %v867_v16 = vsel %vm4000_vm0, %v864_v23, 0.0  ;;  %v868_v45 = vsel %vm3700_vm5, %v863_v14, 0.0  ;;  %v4022_v7 = vpop.permute.xlu0 %960  ;;  %1363 = vrot.lane.b32.xlu1 %v3222_v20, %s6865_s15  ;;  %vm4030_vm9 = vmand %vm6937_vm8, %vm3584_vm10  ;;  %v732_v14 = vsel %vm4014_vm2, %v718_v36, 0.0  ;;  %v733_v23 = vsel %vm6940_vm13, %v717_v11, 0.0 }
 0x407   : > { %v6939_v44 = vsel %vm4030_vm9, 4294967295, %v6938_v44  ;;  %v871_v0 = vmul.f32 %v870_v21, %v867_v16  ;;  %v872_v63 = vmul.f32 %v870_v21, %v868_v45  ;;  %v833_v32 = vsel %vm4030_vm9, %v830_v19, 0.0  ;;  %vm4053_vm7 = vmand %vm6937_vm8, %vm3524_vm14 }
 0x408   : > { %v834_v22 = vsel %vm6941_vm3, %v829_v8, 0.0  ;;  %1463 = vrot.lane.b32.xlu0 %v3168_v58, %s6617_s6  ;;  %v878_v21 = vpop.permute.xlu1 %877  ;;  %vm6944_vm0 = vcmp.lt.s32.totalorder %v2957_v42, 32  ;;  %v822_v19 = vadd.f32 %v820_v29, %v708_v2  ;;  %v823_v16 = vadd.f32 %v821_v15, %v709_v4  ;;  %s6948_s6 = sld [smem:[#allocation86_spill]] }
 0x409   : > { %v4045_v43 = vadd.f32 %v871_v0, %v794_v60  ;;  %v4047_v34 = vadd.f32 %v872_v63, %v795_v54  ;;  %v880_v36 = vsel %vm6944_vm0, %v3712_v27, %v878_v21  ;;  %vm6945_vm9 = vmmov %vm6944_vm0  ;;  %vm6949_vm0 = vcmp.lt.s32.totalorder %v2957_v42, 48 }
 0x40a   : > { %v881_v8 = vsel %vm6945_vm9, %v878_v21, %v3712_v27  ;;  %v885_v60 = vsel %vm6940_vm13, %v880_v36, 0.0  ;;  %v4069_v54 = vpop.permute.xlu0 %977  ;;  %1380 = vrot.lane.b32.xlu1 %v3222_v20, %s6872_s21  ;;  %v6946_v27 = vstv %s3802_s19  ;;  %v1578_v29 = vsel %vm6949_vm0, %v3140_v47, %v3134_v46  ;;  %s4091_s19 = sld [smem:[#allocation7 + $0xd]]  ;;  %vm4101_vm0 = vmand %vm6937_vm8, %vm3966_vm1 }
 0x40b   : > { %v884_v45 = vsel %vm4053_vm7, %v881_v8, 0.0  ;;  %v837_v0 = vmul.f32 %v6946_v27, %v833_v32  ;;  %v6947_v63 = vmov %v6946_v27  ;;  %v889_v4 = vmul.f32 %v887_v39, %v885_v60 }
 0x40c   : > { %v838_v21 = vmul.f32 %v6947_v63, %v834_v22  ;;  %v888_v2 = vmul.f32 %v887_v39, %v884_v45  ;;  %v6950_v15 = vstv %s3767_s26  ;;  %1480 = vrot.lane.b32.xlu0 %v3168_v58, %s6625_s12  ;;  %v904_v32 = vstv %s3981_s27  ;;  %v895_v22 = vpop.permute.xlu1 %894  ;;  %s6964_s26 = sld [smem:[#allocation87_spill]]  ;;  %s6627_s27 = smov 78  }
 0x40d   : > { %v736_v36 = vmul.f32 %v6950_v15, %v732_v14  ;;  %v6951_v8 = vmov %v6950_v15  ;;  %v4095_v45 = vadd.f32 %v889_v4, %v823_v16  ;;  %vm6954_vm9 = vcmp.lt.s32.totalorder %v2957_v42, 31  ;;  %s4157_s12 = sld [smem:[#allocation7 + $0xe]] }
 0x40e   : > { %v737_v13 = vmul.f32 %v6951_v8, %v733_v23  ;;  %v4093_v39 = vadd.f32 %v888_v2, %v822_v19  ;;  %v897_v47 = vsel %vm6954_vm9, %v3776_v9, %v895_v22  ;;  %vm6955_vm14 = vmmov %vm6954_vm9  ;;  %v6956_v23 = vsel %vm3813_vm6, %v3821_v35, 0.0  ;;  %v4127_v2 = vpop.permute.xlu0 %994  ;;  %1397 = vrot.lane.b32.xlu1 %v3222_v20, %s6884_s7 }
 0x40f   : > { %v898_v14 = vsel %vm6955_vm14, %v895_v22, %v3776_v9  ;;  %v6957_v19 = vstv %s6948_s6  ;;  %vm6959_vm8 = vcmp.lt.s32.totalorder %v2957_v42, 47  ;;  %v902_v63 = vsel %vm3986_vm12, %v897_v47, 0.0  ;;  %s2744_s6 = smov 77  }
 0x410   : > { %v4117_v16 = vmul.f32 %v6957_v19, %v6956_v23  ;;  %v1592_v60 = vsel %vm6959_vm8, %v3148_v50, %v3142_v49  ;;  %v901_v27 = vsel %vm4101_vm0, %v898_v14, 0.0  ;;  %vm6960_vm6 = vcmp.ge.s32.totalorder %v2957_v42, 48  ;;  %1497 = vrot.lane.b32.xlu0 %v3168_v58, %s6627_s27  ;;  %s6971_s27 = sld [smem:[#allocation89_spill]] }
 0x411   : > { %vm4136_vm9 = vmand %vm6960_vm6, %vm3966_vm1  ;;  %v6961_v9 = vmov 0  ;;  %v839_v18 = vadd.f32 %v837_v0, %v736_v36  ;;  %v840_v35 = vadd.f32 %v838_v21, %v737_v13  ;;  %v905_v4 = vmul.f32 %v904_v32, %v901_v27 }
 0x412   : > { %6958 = vst [vmem:[#allocation126_spill] sm:$0xff] %v4117_v16  ;;  %v6962_v9 = vsel %vm4136_vm9, 4294967295, %v6961_v9  ;;  %v906_v15 = vmul.f32 %v904_v32, %v902_v63  ;;  %v1579_v8 = vsel %vm4014_vm2, %v1578_v29, 0.0  ;;  %v1580_v22 = vsel %vm6940_vm13, %v3887_v48, 0.0  ;;  %v912_v48 = vpop.permute.xlu1 %911  ;;  %1414 = vrot.lane.b32.xlu1 %v3222_v20, %s6903_s25 }
 0x413   : > { %v1591_v47 = vsel %vm6959_vm8, %v3142_v49, %v3148_v50  ;;  %vm6963_vm6 = vcmp.lt.s32.totalorder %v2957_v42, 46  ;;  %v4159_v38 = vadd.f32 %v905_v4, %v839_v18  ;;  %vm6965_vm8 = vcmp.lt.s32.totalorder %v2957_v42, 30 }
 0x414   : > { %v1605_v13 = vsel %vm6963_vm6, %v3150_v52, %v3156_v53  ;;  %v4161_v49 = vadd.f32 %v906_v15, %v840_v35  ;;  %v4166_v50 = vsel %vm6965_vm8, %v3844_v37, %v912_v48  ;;  %vm6966_vm6 = vmmov %vm6965_vm8  ;;  %v6967_v21 = vsel %vm3700_vm5, %v3836_v12, 0.0  ;;  %1514 = vrot.lane.b32.xlu0 %v3168_v58, %s2744_s6 }
 0x415   : > { %v4171_v0 = vsel %vm6966_vm6, %v912_v48, %v3844_v37  ;;  %v6968_v29 = vmov %v6957_v19  ;;  %v1593_v32 = vsel %vm4136_vm9, %v1592_v60, 0.0  ;;  %vm6970_vm8 = vcmp.lt.s32.totalorder %v2957_v42, 46  ;;  %v4188_v37 = vpop.permute.xlu0 %1011 }
 0x416   : > { %v4179_v36 = vmul.f32 %v6968_v29, %v6967_v21  ;;  %v1606_v14 = vsel %vm6970_vm8, %v3156_v53, %v3150_v52  ;;  %v6972_v12 = vstv %s6964_s26  ;;  %v1594_v60 = vsel %vm3986_vm12, %v1591_v47, 0.0  ;;  %v929_v15 = vpop.permute.xlu1 %928  ;;  %s4217_s26 = sld [smem:[#allocation7 + $0xf]]  ;;  %1431 = vrot.lane.b32.xlu1 %v3222_v20, %s2739_s1 }
 0x417   : > { %v4194_v19 = vmul.f32 %v6972_v12, %v1579_v8  ;;  %v6974_v27 = vmov %v6972_v12  ;;  %v1608_v52 = vsel %vm3782_vm4, %v1605_v13, 0.0  ;;  %vm6976_vm6 = vcmp.lt.s32.totalorder %v2957_v42, 45 }
 0x418   : > { %6969 = vst [vmem:[#allocation127_spill] sm:$0xff] %v4179_v36  ;;  %v4198_v63 = vmul.f32 %v6974_v27, %v1580_v22  ;;  %v1619_v53 = vsel %vm6976_vm6, %v3158_v55, %v3164_v56  ;;  %vm6977_vm8 = vmmov %vm6976_vm6  ;;  %v938_v4 = vstv %s4091_s19  ;;  %v6978_v8 = vstv %s6971_s27  ;;  %s6995_s19 = smov 51   ;;  %s7037_s27 = sld [smem:[#allocation92_spill]] }
 0x419   : > { %6973 = vst [vmem:[#allocation128_spill] sm:$0xff] %v4194_v19  ;;  %v1620_v18 = vsel %vm6977_vm8, %v3164_v56, %v3158_v55  ;;  %v4221_v22 = vmul.f32 %v6978_v8, %v1593_v32  ;;  %v1607_v47 = vsel %vm3918_vm15, %v1606_v14, 0.0  ;;  %vm6980_vm6 = vcmp.ge.s32.totalorder %v2957_v42, 32  ;;  %v4251_v14 = vpop.permute.xlu0 %1028  ;;  %630 = vrot.lane.b32.xlu0 %v3222_v20, %s6995_s19  ;;  %v7035_v19 = vld [vmem:[#allocation31_spill] sm:$0xff]  ;;  %s7200_s19 = sld [smem:[#allocation99_spill]] }
 0x41a   : > { %6975 = vst [vmem:[#allocation129_spill] sm:$0xff] %v4198_v63  ;;  %vm4229_vm8 = vmand %vm6980_vm6, %vm3789_vm11  ;;  %vm6983_vm14 = vcmp.lt.s32.totalorder %v2957_v42, 29  ;;  %v6985_v6 = vmov %v6978_v8  ;;  %v6987_v48 = vstv %s3447_s2  ;;  %vm6989_vm15 = vnez %v6892_v5  ;;  %s7005_s2 = smov 81  }
 0x41b   : > { %6979 = vst [vmem:[#allocation130_spill] sm:$0xff] %v4221_v22  ;;  %v931_v56 = vsel %vm6983_vm14, %v3905_v17, %v929_v15  ;;  %vm6984_vm2 = vmmov %vm6983_vm14  ;;  %v4241_v13 = vmul.f32 %v6985_v6, %v1594_v60  ;;  %v4245_v21 = vmul.f32 %v6987_v48, %v1608_v52  ;;  %vm6990_vm14 = vnez %v6917_v51 }
 0x41c   : > { %v932_v58 = vsel %vm6984_vm2, %v929_v15, %v3905_v17  ;;  %v936_v32 = vsel %vm6989_vm15, %v931_v56, 0.0  ;;  %v1622_v17 = vsel %vm6989_vm15, %v1619_v53, 0.0  ;;  %v1621_v12 = vsel %vm6990_vm14, %v1620_v18, 0.0  ;;  %v946_v18 = vpop.permute.xlu1 %945  ;;  %1448 = vrot.lane.b32.xlu1 %v3222_v20, %s7005_s2 }
 0x41d   : > { %6986 = vst [vmem:[#allocation131_spill] sm:$0xff] %v4241_v13  ;;  %6988 = vst [vmem:[#allocation132_spill] sm:$0xff] %v4245_v21  ;;  %v935_v29 = vsel %vm4229_vm8, %v932_v58, 0.0  ;;  %v940_v60 = vmul.f32 %v938_v4, %v936_v32  ;;  %vm6991_vm2 = vcmp.lt.s32.totalorder %v2957_v42, 35  ;;  %v6993_v53 = vmov %v6987_v48  ;;  %v4307_v32 = vpop.permute.xlu0 %1045 }
 0x41e   : > { %v939_v27 = vmul.f32 %v938_v4, %v935_v29  ;;  %v1633_v52 = vsel %vm6991_vm2, %v3170_v59, %v3176_v61  ;;  %vm6992_vm6 = vmmov %vm6991_vm2  ;;  %v4270_v8 = vmul.f32 %v6993_v53, %v1607_v47  ;;  %v955_v51 = vstv %s4157_s12  ;;  %v7009_v53 = vld [vmem:[#allocation28_spill] sm:$0xff]  ;;  %s4339_s12 = sld [smem:[#allocation7 + $0x11]] }
 0x41f   : > { %v1634_v15 = vsel %vm6992_vm6, %v3176_v61, %v3170_v59  ;;  %v4279_v56 = vadd.f32 %v940_v60, %v4047_v34  ;;  %vm6996_vm14 = vcmp.ge.s32.totalorder %v2957_v42, 16  ;;  %v6997_v59 = vmov 0 }
 0x420   : > { %6994 = vst [vmem:[#allocation133_spill] sm:$0xff] %v4270_v8  ;;  %v4276_v4 = vadd.f32 %v939_v27, %v4045_v43  ;;  %vm4285_vm2 = vmand %vm6996_vm14, %vm3584_vm10  ;;  %vm6999_vm6 = vcmp.lt.s32.totalorder %v2957_v42, 19  ;;  %v7001_v47 = vstv %s3453_s24  ;;  %s7007_s24 = sld [smem:[#allocation90_spill]]  ;;  %vm7012_vm10 = vnez %v6939_v44 }
 0x421   : > { %v6998_v59 = vsel %vm4285_vm2, 4294967295, %v6997_v59  ;;  %v948_v61 = vsel %vm6999_vm6, %v3952_v3, %v946_v18  ;;  %vm7000_vm9 = vmmov %vm6999_vm6  ;;  %v4297_v34 = vmul.f32 %v7001_v47, %v1622_v17  ;;  %v7003_v58 = vmov %v7001_v47  ;;  %v4371_v63 = vpop.permute.xlu0 %1062 }
 0x422   : > { %v949_v43 = vsel %vm7000_vm9, %v946_v18, %v3952_v3  ;;  %v4301_v6 = vmul.f32 %v7003_v58, %v1621_v12  ;;  %v953_v29 = vsel %vm6941_vm3, %v948_v61, 0.0  ;;  %v1636_v3 = vsel %vm6941_vm3, %v1633_v52, 0.0  ;;  %v7010_v18 = vld [vmem:[#allocation27_spill] sm:$0xff] }
 0x423   : > { %7002 = vst [vmem:[#allocation134_spill] sm:$0xff] %v4297_v34  ;;  %v952_v48 = vsel %vm4285_vm2, %v949_v43, 0.0  ;;  %vm7006_vm9 = vcmp.lt.s32.totalorder %v2957_v42, 34  ;;  %v957_v27 = vmul.f32 %v955_v51, %v953_v29  ;;  %vm7011_vm6 = vcmp.lt.s32.totalorder %v2957_v42, 33  ;;  %v7013_v43 = vld [vmem:[#allocation107_spill] sm:$0xff] }
 0x424   : > { %7004 = vst [vmem:[#allocation135_spill] sm:$0xff] %v4301_v6  ;;  %v1647_v17 = vsel %vm7006_vm9, %v3178_v62, %v3184_v1  ;;  %v956_v12 = vmul.f32 %v955_v51, %v952_v48  ;;  %vm7008_vm14 = vmmov %vm7006_vm9  ;;  %v1661_v61 = vsel %vm7011_vm6, %v7010_v18, %v7009_v53  ;;  %v1635_v52 = vsel %vm7012_vm10, %v1634_v15, 0.0 }
 0x425   : > { %v1648_v60 = vsel %vm7008_vm14, %v3184_v1, %v3178_v62  ;;  %vm7014_vm9 = vnez %v7013_v43  ;;  %vm7015_vm2 = vcmp.ge.s32.totalorder %v2957_v42, 32  ;;  %v7016_v51 = vmov 0  ;;  %v963_v62 = vpop.permute.xlu1 %962  ;;  %v7018_v1 = vld [vmem:[#allocation25_spill] sm:$0xff]  ;;  %v4432_v16 = vpop.permute.xlu0 %1079 }
 0x426   : > { %vm4332_vm3 = vmand %vm7015_vm2, %vm7014_vm9  ;;  %v972_v47 = vstv %s4217_s26  ;;  %2043 = vrot.lane.b32.xlu0 %v7018_v1, %s6909_s22  ;;  %v4342_v58 = vadd.f32 %v956_v12, %v4093_v39  ;;  %v4345_v44 = vadd.f32 %v957_v27, %v4095_v45  ;;  %vm7019_vm10 = vcmp.ge.s32.totalorder %v2957_v42, 16  ;;  %v7026_v45 = vld [vmem:[#allocation108_spill] sm:$0xff]  ;;  %s7028_s22 = smov 80   ;;  %s4398_s26 = sld [smem:[#allocation7 + $0x12]] }
 0x427   : > { %v7017_v51 = vsel %vm4332_vm3, 4294967295, %v7016_v51  ;;  %vm4351_vm2 = vmand %vm7019_vm10, %vm7014_vm9  ;;  %vm7022_vm14 = vcmp.lt.s32.totalorder %v2957_v42, 18  ;;  %v7024_v29 = vstv %s7007_s24  ;;  %vm7027_vm11 = vnez %v7026_v45  ;;  %1465 = vrot.lane.b32.xlu1 %v3222_v20, %s7028_s22 }
 0x428   : > { %v965_v48 = vsel %vm7022_vm14, %v4022_v7, %v963_v62  ;;  %vm7023_vm6 = vmmov %vm7022_vm14  ;;  %v4363_v12 = vmul.f32 %v7024_v29, %v1636_v3  ;;  %v1650_v27 = vsel %vm7027_vm11, %v1647_v17, 0.0  ;;  %vm7029_vm10 = vcmp.lt.s32.totalorder %v2957_v42, 33  ;;  %v7031_v29 = vld [vmem:[#allocation29_spill] sm:$0xff] }
 0x429   : > { %v966_v39 = vsel %vm7023_vm6, %v963_v62, %v4022_v7  ;;  %v970_v23 = vsel %vm7027_vm11, %v965_v48, 0.0  ;;  %v1662_v7 = vsel %vm7029_vm10, %v7009_v53, %v7010_v18  ;;  %v1649_v3 = vsel %vm4332_vm3, %v1648_v60, 0.0  ;;  %v7034_v18 = vld [vmem:[#allocation32_spill] sm:$0xff] }
 0x42a   : > { %7025 = vst [vmem:[#allocation28_spill] sm:$0xff] %v4363_v12  ;;  %v969_v35 = vsel %vm4351_vm2, %v966_v39, 0.0  ;;  %v974_v62 = vmul.f32 %v972_v47, %v970_v23  ;;  %v1664_v48 = vsel %vm3700_vm5, %v1661_v61, 0.0  ;;  %v7030_v39 = vld [vmem:[#allocation30_spill] sm:$0xff]  ;;  %vm7032_vm14 = vcmp.lt.s32.totalorder %v2957_v42, 32  ;;  %2057 = vrot.lane.b32.xlu0 %v7018_v1, %s6918_s8  ;;  %s7047_s8 = smov 79  }
 0x42b   : > { %v973_v17 = vmul.f32 %v972_v47, %v969_v35  ;;  %v1675_v12 = vsel %vm7032_vm14, %v7031_v29, %v7030_v39  ;;  %vm7033_vm6 = vmmov %vm7032_vm14  ;;  %vm7036_vm10 = vcmp.lt.s32.totalorder %v2957_v42, 31  ;;  %v980_v35 = vpop.permute.xlu1 %979  ;;  %vm7038_vm14 = vcmp.lt.s32.totalorder %v2957_v42, 17  ;;  %1482 = vrot.lane.b32.xlu1 %v3222_v20, %s7047_s8 }
 0x42c   : > { %v1676_v53 = vsel %vm7033_vm6, %v7030_v39, %v7031_v29  ;;  %v1689_v23 = vsel %vm7036_vm10, %v7035_v19, %v7034_v18  ;;  %v4404_v61 = vadd.f32 %v974_v62, %v4161_v49  ;;  %v4409_v47 = vsel %vm7038_vm14, %v4069_v54, %v980_v35  ;;  %vm7039_vm6 = vmmov %vm7038_vm14  ;;  %v7042_v49 = vld [vmem:[#allocation34_spill] sm:$0xff] }
 0x42d   : > { %v4401_v60 = vadd.f32 %v973_v17, %v4159_v38  ;;  %v4414_v39 = vsel %vm7039_vm6, %v980_v35, %v4069_v54  ;;  %v7040_v29 = vstv %s3463_s0  ;;  %v1690_v38 = vsel %vm7036_vm10, %v7034_v18, %v7035_v19  ;;  %v7043_v17 = vld [vmem:[#allocation33_spill] sm:$0xff]  ;;  %s4468_s0 = sld [smem:[#allocation7 + $0x13]] }
 0x42e   : > { %v4418_v34 = vmul.f32 %v7040_v29, %v1650_v27  ;;  %vm7044_vm3 = vcmp.lt.s32.totalorder %v2957_v42, 30  ;;  %v7045_v6 = vstv %s7007_s24  ;;  %v7048_v54 = vstv %s7037_s27  ;;  %2071 = vrot.lane.b32.xlu0 %v7018_v1, %s6865_s15  ;;  %s7068_s15 = smov 78   ;;  %s7206_s24 = sld [smem:[#allocation101_spill]] }
 0x42f   : > { %v1703_v62 = vsel %vm7044_vm3, %v7043_v17, %v7042_v49  ;;  %v4430_v36 = vmul.f32 %v7045_v6, %v1635_v52  ;;  %v4438_v27 = vmul.f32 %v7048_v54, %v1664_v48  ;;  %v1678_v35 = vsel %vm6940_vm13, %v1675_v12, 0.0  ;;  %v997_v48 = vpop.permute.xlu1 %996  ;;  %1499 = vrot.lane.b32.xlu1 %v3222_v20, %s7068_s15  ;;  %s5072_s27 = sld [smem:[#allocation7 + $0x1f]] }
 0x430   : > { %7041 = vst [vmem:[#allocation27_spill] sm:$0xff] %v4418_v34  ;;  %v7050_v19 = vmov %v7040_v29  ;;  %vm7052_vm14 = vnez %v6931_v31  ;;  %v1692_v6 = vsel %vm3986_vm12, %v1689_v23, 0.0  ;;  %v1704_v52 = vsel %vm7044_vm3, %v7042_v49, %v7043_v17 }
 0x431   : > { %7046 = vst [vmem:[#allocation107_spill] sm:$0xff] %v4430_v36  ;;  %7049 = vst [vmem:[#allocation25_spill] sm:$0xff] %v4438_v27  ;;  %v4444_v18 = vmul.f32 %v7050_v19, %v1649_v3  ;;  %v1663_v29 = vsel %vm7052_vm14, %v1662_v7, 0.0  ;;  %v1677_v12 = vsel %vm4053_vm7, %v1676_v53, 0.0  ;;  %v7053_v3 = vld [vmem:[#allocation116_spill] sm:$0xff]  ;;  %vm7055_vm9 = vcmp.ge.s32.totalorder %v2957_v42, 32  ;;  %v4500_v27 = vpop.permute.xlu0 %1096 }
 0x432   : > { %vm7054_vm10 = vnez %v7053_v3  ;;  %v7056_v31 = vmov 0  ;;  %v1006_v7 = vstv %s4339_s12  ;;  %v1706_v11 = vsel %vm3782_vm4, %v1703_v62, 0.0  ;;  %2085 = vrot.lane.b32.xlu0 %v7018_v1, %s6872_s21  ;;  %s7122_s21 = sld [smem:[#allocation96_spill]] }
 0x433   : > { %7051 = vst [vmem:[#allocation108_spill] sm:$0xff] %v4444_v18  ;;  %vm4461_vm5 = vmand %vm7055_vm9, %vm7054_vm10  ;;  %v1691_v53 = vsel %vm4101_vm0, %v1690_v38, 0.0  ;;  %vm7058_vm7 = vnez %v6828_v41  ;;  %vm7059_vm9 = vcmp.ge.s32.totalorder %v2957_v42, 16  ;;  %vm7062_vm3 = vcmp.lt.s32.totalorder %v2957_v42, 16  ;;  %1516 = vrot.lane.b32.xlu1 %v3222_v20, %s2744_s6  ;;  %s5013_s12 = sld [smem:[#allocation7 + $0x1e]] }
 0x434   : > { %v7057_v31 = vsel %vm4461_vm5, 4294967295, %v7056_v31  ;;  %vm4478_vm14 = vmand %vm7059_vm9, %vm7058_vm7  ;;  %v999_v49 = vsel %vm7062_vm3, %v4127_v2, %v997_v48  ;;  %v7064_v17 = vstv %s3471_s16  ;;  %v7066_v62 = vmov %v7048_v54  ;;  %s4651_s16 = sld [smem:[#allocation7 + $0x16]] }
 0x435   : > { %vm7063_vm6 = vmmov %vm7062_vm3  ;;  %v4490_v38 = vmul.f32 %v7064_v17, %v1678_v35  ;;  %v4494_v54 = vmul.f32 %v7066_v62, %v1663_v29  ;;  %v1004_v36 = vsel %vm6940_vm13, %v999_v49, 0.0  ;;  %v7069_v21 = vmov %v7064_v17 }
 0x436   : > { %v1000_v46 = vsel %vm7063_vm6, %v997_v48, %v4127_v2  ;;  %v4506_v8 = vmul.f32 %v7069_v21, %v1677_v12  ;;  %v1705_v2 = vsel %vm4461_vm5, %v1704_v52, 0.0  ;;  %v1008_v29 = vmul.f32 %v1006_v7, %v1004_v36  ;;  %v1014_v21 = vpop.permute.xlu1 %1013  ;;  %vm7077_vm6 = vmmov %vm7059_vm9  ;;  %2099 = vrot.lane.b32.xlu0 %v7018_v1, %s6884_s7  ;;  %s4624_s7 = sld [smem:[#allocation7 + $0x8]] }
 0x437   : > { %7065 = vst [vmem:[#allocation30_spill] sm:$0xff] %v4490_v38  ;;  %7067 = vst [vmem:[#allocation29_spill] sm:$0xff] %v4494_v54  ;;  %v1003_v19 = vsel %vm4478_vm14, %v1000_v46, 0.0  ;;  %v7071_v48 = vstv %s3473_s5  ;;  %v7073_v46 = vstv %s3481_s30  ;;  %v1023_v54 = vstv %s4398_s26  ;;  %s4550_s5 = sld [smem:[#allocation7 + $0x4]] }
 0x438   : > { %7070 = vst [vmem:[#allocation32_spill] sm:$0xff] %v4506_v8  ;;  %v1007_v35 = vmul.f32 %v1006_v7, %v1003_v19  ;;  %v4512_v17 = vmul.f32 %v7071_v48, %v1692_v6  ;;  %v4516_v62 = vmul.f32 %v7073_v46, %v1706_v11  ;;  %v7075_v49 = vmov %v7071_v48  ;;  %vm4536_vm9 = vmand %vm7077_vm6, %vm3966_vm1  ;;  %v7082_v7 = vld [vmem:[#allocation36_spill] sm:$0xff]  ;;  %v7083_v11 = vld [vmem:[#allocation35_spill] sm:$0xff]  ;;  %v4560_v48 = vpop.permute.xlu0 %1123  ;;  %s4588_s30 = sld [smem:[#allocation7 + $0x15]] }
 0x439   : > { %v4521_v38 = vmul.f32 %v7075_v49, %v1691_v53  ;;  %v4530_v36 = vadd.f32 %v1008_v29, %v4279_v56  ;;  %vm7080_vm3 = vcmp.lt.s32.totalorder %v2957_v42, 15  ;;  %vm7084_vm5 = vcmp.lt.s32.totalorder %v2957_v42, 29  ;;  %v7088_v49 = vld [vmem:[#allocation37_spill] sm:$0xff]  ;;  %s7234_s26 = sld [smem:[#allocation105_spill]] }
 0x43a   : > { %7072 = vst [vmem:[#allocation31_spill] sm:$0xff] %v4512_v17  ;;  %7074 = vst [vmem:[#allocation34_spill] sm:$0xff] %v4516_v62  ;;  %v4527_v52 = vadd.f32 %v1007_v35, %v4276_v4  ;;  %v1016_v12 = vsel %vm7080_vm3, %v4188_v37, %v1014_v21  ;;  %v1717_v56 = vsel %vm7084_vm5, %v7083_v11, %v7082_v7  ;;  %v7085_v53 = vmov %v7073_v46  ;;  %v7087_v46 = vld [vmem:[#allocation38_spill] sm:$0xff]  ;;  %v7092_v17 = vld [vmem:[#allocation39_spill] sm:$0xff] }
 0x43b   : > { %7076 = vst [vmem:[#allocation33_spill] sm:$0xff] %v4521_v38  ;;  %vm7081_vm0 = vmmov %vm7080_vm3  ;;  %v4554_v19 = vmul.f32 %v7085_v53, %v1705_v2  ;;  %v1021_v29 = vsel %vm3986_vm12, %v1016_v12, 0.0  ;;  %v7091_v53 = vld [vmem:[#allocation40_spill] sm:$0xff]  ;;  %vm7093_vm3 = vcmp.lt.s32.totalorder %v2957_v42, 18  ;;  %v7100_v38 = vld [vmem:[#allocation26_spill] sm:$0xff]  ;;  %vm6644_vm7 = vcmp.lt.s32.totalorder %v2957_v42, 2  ;;  %2113 = vrot.lane.b32.xlu0 %v7018_v1, %s6903_s25 }
 0x43c   : > { %v1017_v4 = vsel %vm7081_vm0, %v1014_v21, %v4188_v37  ;;  %v1718_v37 = vsel %vm7084_vm5, %v7082_v7, %v7083_v11  ;;  %vm7089_vm0 = vcmp.lt.s32.totalorder %v2957_v42, 19  ;;  %v1745_v20 = vsel %vm7093_vm3, %v7092_v17, %v7091_v53  ;;  %vm7094_vm5 = vmmov %vm7093_vm3  ;;  %2129 = vrot.lane.b32.xlu1 %v7100_v38, %s2739_s1  ;;  %s7166_s25 = sld [smem:[#allocation98_spill]] }
 0x43d   : > { %7086 = vst [vmem:[#allocation36_spill] sm:$0xff] %v4554_v19  ;;  %v1020_v35 = vsel %vm4536_vm9, %v1017_v4, 0.0  ;;  %v1731_v2 = vsel %vm7089_vm0, %v7088_v49, %v7087_v46  ;;  %v1025_v4 = vmul.f32 %v1023_v54, %v1021_v29  ;;  %vm7090_vm6 = vmmov %vm7089_vm0  ;;  %v1746_v7 = vsel %vm7094_vm5, %v7091_v53, %v7092_v17  ;;  %v4618_v53 = vpop.permute.xlu0 %1140 }
 0x43e   : > { %v1024_v21 = vmul.f32 %v1023_v54, %v1020_v35  ;;  %v1732_v12 = vsel %vm7090_vm6, %v7087_v46, %v7088_v49  ;;  %v1040_v11 = vstv %s4468_s0  ;;  %v1031_v35 = vpop.permute.xlu1 %1030  ;;  %vm7095_vm0 = vcmp.ge.s32.totalorder %v2957_v42, 16  ;;  %s5186_s0 = sld [smem:[#allocation7 + $0x21]] }
 0x43f   : > { %v4594_v29 = vadd.f32 %v1025_v4, %v4345_v44  ;;  %vm4600_vm6 = vmand %vm7095_vm0, %vm7054_vm10  ;;  %vm7098_vm3 = vcmp.lt.s32.totalorder %v2957_v42, 14  ;;  %v1720_v44 = vsel %vm6989_vm15, %v1717_v56, 0.0  ;;  %v1719_v49 = vsel %vm4229_vm8, %v1718_v37, 0.0  ;;  %2127 = vrot.lane.b32.xlu0 %v7018_v1, %s2739_s1  ;;  %s4865_s1 = sld [smem:[#allocation7 + $0x1b]] }
 0x440   : > { %v4591_v54 = vadd.f32 %v1024_v21, %v4342_v58  ;;  %v1033_v46 = vsel %vm7098_vm3, %v4251_v14, %v1031_v35  ;;  %vm7099_vm5 = vmmov %vm7098_vm3  ;;  %vm7101_vm0 = vnez %v6846_v24  ;;  %vm7102_vm3 = vnez %v6998_v59  ;;  %2143 = vrot.lane.b32.xlu1 %v7100_v38, %s7005_s2 }
 0x441   : > { %v1034_v58 = vsel %vm7099_vm5, %v1031_v35, %v4251_v14  ;;  %v1038_v4 = vsel %vm3782_vm4, %v1033_v46, 0.0  ;;  %v1734_v14 = vsel %vm7101_vm0, %v1731_v2, 0.0  ;;  %v1733_v55 = vsel %vm7102_vm3, %v1732_v12, 0.0  ;;  %v7103_v46 = vld [vmem:[#allocation42_spill] sm:$0xff]  ;;  %v4682_v62 = vpop.permute.xlu0 %1157 }
 0x442   : > { %v1037_v21 = vsel %vm4600_vm6, %v1034_v58, 0.0  ;;  %v1042_v37 = vmul.f32 %v1040_v11, %v1038_v4  ;;  %v1748_v35 = vsel %vm7027_vm11, %v1745_v20, 0.0  ;;  %v7104_v58 = vld [vmem:[#allocation41_spill] sm:$0xff]  ;;  %vm7105_vm8 = vcmp.lt.s32.totalorder %v2957_v42, 17  ;;  %v1048_v20 = vpop.permute.xlu1 %1047 }
 0x443   : > { %v1041_v56 = vmul.f32 %v1040_v11, %v1037_v21  ;;  %v1759_v8 = vsel %vm7105_vm8, %v7104_v58, %v7103_v46  ;;  %vm7106_vm5 = vmmov %vm7105_vm8  ;;  %v1747_v59 = vsel %vm4351_vm2, %v1746_v7, 0.0  ;;  %vm7107_vm3 = vnez %v6859_v30  ;;  %2141 = vrot.lane.b32.xlu0 %v7018_v1, %s7005_s2  ;;  %s7204_s2 = sld [smem:[#allocation100_spill]] }
 0x444   : > { %v1760_v2 = vsel %vm7106_vm5, %v7103_v46, %v7104_v58  ;;  %vm7108_vm10 = vcmp.ge.s32.totalorder %v2957_v42, 16  ;;  %v7109_v12 = vmov 0  ;;  %v4657_v7 = vadd.f32 %v1042_v37, %v4404_v61  ;;  %2157 = vrot.lane.b32.xlu1 %v7100_v38, %s7028_s22 }
 0x445   : > { %vm4645_vm1 = vmand %vm7108_vm10, %vm7107_vm3  ;;  %v4654_v15 = vadd.f32 %v1041_v56, %v4401_v60  ;;  %vm7111_vm2 = vcmp.lt.s32.totalorder %v2957_v42, 13  ;;  %v7113_v4 = vstv %s3483_s18  ;;  %v7115_v60 = vld [vmem:[#allocation44_spill] sm:$0xff]  ;;  %v7116_v56 = vld [vmem:[#allocation43_spill] sm:$0xff]  ;;  %vm7117_vm8 = vcmp.lt.s32.totalorder %v2957_v42, 16  ;;  %s4714_s18 = sld [smem:[#allocation7 + $0x17]] }
 0x446   : > { %v7110_v12 = vsel %vm4645_vm1, 4294967295, %v7109_v12  ;;  %v4662_v11 = vsel %vm7111_vm2, %v4307_v32, %v1048_v20  ;;  %vm7112_vm10 = vmmov %vm7111_vm2  ;;  %v4671_v46 = vmul.f32 %v7113_v4, %v1720_v44  ;;  %v1773_v61 = vsel %vm7117_vm8, %v7116_v56, %v7115_v60 }
 0x447   : > { %v4667_v21 = vsel %vm7112_vm10, %v1048_v20, %v4307_v32  ;;  %vm7118_vm5 = vmmov %vm7117_vm8  ;;  %v7119_v32 = vstv %s3492_s20  ;;  %vm7121_vm2 = vnez %v6868_v57  ;;  %vm7130_vm8 = vcmp.lt.s32.totalorder %v2957_v42, 3  ;;  %2155 = vrot.lane.b32.xlu0 %v7018_v1, %s7028_s22  ;;  %s4813_s20 = sld [smem:[#allocation7 + $0x1a]] }
 0x448   : > { %7114 = vst [vmem:[#allocation35_spill] sm:$0xff] %v4671_v46  ;;  %v1774_v37 = vsel %vm7118_vm5, %v7115_v60, %v7116_v56  ;;  %v4688_v20 = vmul.f32 %v7119_v32, %v1734_v14  ;;  %v1762_v44 = vsel %vm7121_vm2, %v1759_v8, 0.0  ;;  %v4694_v46 = vmul.f32 %v7113_v4, %v1719_v49  ;;  %v1065_v8 = vpop.permute.xlu1 %1064  ;;  %vm7131_vm5 = vmmov %vm7130_vm8  ;;  %2171 = vrot.lane.b32.xlu1 %v7100_v38, %s7047_s8  ;;  %s7212_s22 = sld [smem:[#allocation103_spill]] }
 0x449   : > { %v1761_v60 = vsel %vm4645_vm1, %v1760_v2, 0.0  ;;  %v7124_v56 = vstv %s3494_s10  ;;  %v7126_v19 = vmov %v7119_v32  ;;  %v1776_v49 = vsel %vm6940_vm13, %v1773_v61, 0.0  ;;  %s4763_s10 = sld [smem:[#allocation7 + $0x19]] }
 0x44a   : > { %7120 = vst [vmem:[#allocation38_spill] sm:$0xff] %v4688_v20  ;;  %7123 = vst [vmem:[#allocation37_spill] sm:$0xff] %v4694_v46  ;;  %v4700_v58 = vmul.f32 %v7124_v56, %v1748_v35  ;;  %v4705_v34 = vmul.f32 %v7126_v19, %v1733_v55  ;;  %v7128_v14 = vmov %v7124_v56  ;;  %v1074_v20 = vstv %s4588_s30  ;;  %s7265_s30 = sld [smem:[#allocation109_spill]] }
 0x44b   : > { %v4709_v32 = vmul.f32 %v7128_v14, %v1747_v59  ;;  %v1775_v35 = vsel %vm4478_vm14, %v1774_v37, 0.0  ;;  %v1067_v19 = vsel %vm7130_vm8, %v4371_v63, %v1065_v8  ;;  %v1068_v55 = vsel %vm7131_vm5, %v1065_v8, %v4371_v63  ;;  %v4738_v37 = vpop.permute.xlu0 %1174  ;;  %v7137_v14 = vld [vmem:[#allocation46_spill] sm:$0xff]  ;;  %2169 = vrot.lane.b32.xlu0 %v7018_v1, %s7047_s8  ;;  %s5170_s8 = sld [smem:[#allocation7 + $0x14]] }
 0x44c   : > { %7125 = vst [vmem:[#allocation40_spill] sm:$0xff] %v4700_v58  ;;  %7127 = vst [vmem:[#allocation39_spill] sm:$0xff] %v4705_v34  ;;  %v7132_v2 = vstv %s7122_s21  ;;  %vm7136_vm10 = vnez %v6840_v26  ;;  %v1072_v61 = vsel %vm7101_vm0, %v1067_v19, 0.0  ;;  %v7138_v58 = vld [vmem:[#allocation45_spill] sm:$0xff]  ;;  %vm7139_vm14 = vcmp.lt.s32.totalorder %v2957_v42, 15  ;;  %v1082_v46 = vpop.permute.xlu1 %1081  ;;  %v7156_v19 = vld [vmem:[#allocation52_spill] sm:$0xff]  ;;  %2185 = vrot.lane.b32.xlu1 %v7100_v38, %s7068_s15 }
 0x44d   : > { %7129 = vst [vmem:[#allocation26_spill] sm:$0xff] %v4709_v32  ;;  %v4728_v59 = vmul.f32 %v7132_v2, %v1762_v44  ;;  %v7134_v4 = vmov %v7132_v2  ;;  %v1071_v23 = vsel %vm7136_vm10, %v1068_v55, 0.0  ;;  %v1787_v63 = vsel %vm7139_vm14, %v7138_v58, %v7137_v14  ;;  %vm7140_vm8 = vmmov %vm7139_vm14  ;;  %s5255_s21 = sld [smem:[#allocation7 + $0x22]] }
 0x44e   : > { %v4732_v56 = vmul.f32 %v7134_v4, %v1761_v60  ;;  %v1788_v44 = vsel %vm7140_vm8, %v7137_v14, %v7138_v58  ;;  %v1075_v60 = vmul.f32 %v1074_v20, %v1071_v23  ;;  %v1076_v8 = vmul.f32 %v1074_v20, %v1072_v61 }
 0x44f   : > { %7133 = vst [vmem:[#allocation42_spill] sm:$0xff] %v4728_v59  ;;  %v7141_v55 = vstv %s3505_s29  ;;  %v1091_v34 = vstv %s4651_s16  ;;  %v1790_v23 = vsel %vm3986_vm12, %v1787_v63, 0.0  ;;  %v1789_v61 = vsel %vm4536_vm9, %v1788_v44, 0.0  ;;  %v4785_v14 = vpop.permute.xlu0 %1191  ;;  %s7150_s29 = sld [smem:[#allocation97_spill]]  ;;  %v7151_v44 = vld [vmem:[#allocation50_spill] sm:$0xff]  ;;  %2183 = vrot.lane.b32.xlu0 %v7018_v1, %s7068_s15 }
 0x450   : > { %7135 = vst [vmem:[#allocation41_spill] sm:$0xff] %v4732_v56  ;;  %v4752_v2 = vmul.f32 %v7141_v55, %v1776_v49  ;;  %v7143_v4 = vmov %v7141_v55  ;;  %v4766_v58 = vadd.f32 %v1075_v60, %v4527_v52  ;;  %v4769_v20 = vadd.f32 %v1076_v8, %v4530_v36  ;;  %v7146_v60 = vld [vmem:[#allocation48_spill] sm:$0xff]  ;;  %v7147_v8 = vld [vmem:[#allocation47_spill] sm:$0xff]  ;;  %v7152_v55 = vld [vmem:[#allocation49_spill] sm:$0xff]  ;;  %2199 = vrot.lane.b32.xlu1 %v7100_v38, %s2744_s6  ;;  %s5227_s15 = sld [smem:[#allocation7 + $0x1c]] }
 0x451   : > { %v4758_v32 = vmul.f32 %v7143_v4, %v1775_v35  ;;  %v1084_v49 = vsel %vm6644_vm7, %v4432_v16, %v1082_v46  ;;  %v1085_v35 = vsel %vm6644_vm7, %v1082_v46, %v4432_v16  ;;  %vm7145_vm14 = vnez %v7013_v43  ;;  %s7275_s16 = sld [smem:[#allocation110_spill]] }
 0x452   : > { %7142 = vst [vmem:[#allocation44_spill] sm:$0xff] %v4752_v2  ;;  %v1088_v52 = vsel %vm7145_vm14, %v1085_v35, 0.0  ;;  %v1089_v36 = vsel %vm7027_vm11, %v1084_v49, 0.0  ;;  %vm7148_vm8 = vcmp.lt.s32.totalorder %v2957_v42, 14  ;;  %vm7153_vm7 = vcmp.lt.s32.totalorder %v2957_v42, 13  ;;  %v7155_v35 = vld [vmem:[#allocation51_spill] sm:$0xff] }
 0x453   : > { %7144 = vst [vmem:[#allocation43_spill] sm:$0xff] %v4758_v32  ;;  %v1801_v16 = vsel %vm7148_vm8, %v7147_v8, %v7146_v60  ;;  %vm7149_vm9 = vmmov %vm7148_vm8  ;;  %v1092_v46 = vmul.f32 %v1091_v34, %v1088_v52  ;;  %v1093_v63 = vmul.f32 %v1091_v34, %v1089_v36  ;;  %v1815_v4 = vsel %vm7153_vm7, %v7152_v55, %v7151_v44  ;;  %v1099_v52 = vpop.permute.xlu1 %1098 }
 0x454   : > { %v1802_v6 = vsel %vm7149_vm9, %v7146_v60, %v7147_v8  ;;  %vm7154_vm5 = vmmov %vm7153_vm7  ;;  %vm7157_vm8 = vcmp.lt.s32.totalorder %v2957_v42, 3  ;;  %vm6647_vm9 = vcmp.lt.s32.totalorder %v2957_v42, 126  ;;  %v1108_v60 = vstv %s4714_s18  ;;  %2197 = vrot.lane.b32.xlu0 %v7018_v1, %s2744_s6  ;;  %s4988_s6 = sld [smem:[#allocation7 + $0x10]] }
 0x455   : > { %v1816_v49 = vsel %vm7154_vm5, %v7151_v44, %v7152_v55  ;;  %v1830_v2 = vsel %vm7157_vm8, %v7156_v19, %v7155_v35  ;;  %vm7158_vm7 = vnez %v6881_v28  ;;  %vm7159_vm1 = vcmp.ge.s32.totalorder %v2957_v42, 16  ;;  %s5287_s18 = sld [smem:[#allocation7 + $0x23]] }
 0x456   : > { %vm4819_vm13 = vmand %vm7159_vm1, %vm7158_vm7  ;;  %v7160_v34 = vmov 0  ;;  %v4824_v36 = vadd.f32 %v1092_v46, %v4591_v54  ;;  %v4827_v8 = vadd.f32 %v1093_v63, %v4594_v29  ;;  %vm7162_vm5 = vcmp.lt.s32.totalorder %v2957_v42, 1  ;;  %v4845_v46 = vpop.permute.xlu0 %1208 }
 0x457   : > { %v7161_v34 = vsel %vm4819_vm13, 4294967295, %v7160_v34  ;;  %v1101_v44 = vsel %vm7162_vm5, %v4500_v27, %v1099_v52  ;;  %vm7163_vm8 = vmmov %vm7162_vm5  ;;  %v7164_v32 = vstv %s7150_s29  ;;  %v1804_v56 = vsel %vm3782_vm4, %v1801_v16, 0.0 }
 0x458   : > { %v1102_v55 = vsel %vm7163_vm8, %v1099_v52, %v4500_v27  ;;  %v4837_v59 = vmul.f32 %v7164_v32, %v1790_v23  ;;  %v1106_v29 = vsel %vm7121_vm2, %v1101_v44, 0.0  ;;  %v1818_v27 = vsel %vm6989_vm15, %v1815_v4, 0.0  ;;  %v1126_v44 = vpop.permute.xlu1 %1125 }
 0x459   : > { %v1105_v54 = vsel %vm7107_vm3, %v1102_v55, 0.0  ;;  %v1803_v32 = vsel %vm4600_vm6, %v1802_v6, 0.0  ;;  %v1110_v16 = vmul.f32 %v1108_v60, %v1106_v29  ;;  %vm7167_vm1 = vcmp.lt.s32.totalorder %v2957_v42, 3 }
 0x45a   : > { %7165 = vst [vmem:[#allocation46_spill] sm:$0xff] %v4837_v59  ;;  %v1109_v23 = vmul.f32 %v1108_v60, %v1105_v54  ;;  %v1829_v63 = vsel %vm7167_vm1, %v7155_v35, %v7156_v19  ;;  %v1831_v52 = vsel %vm7136_vm10, %v1830_v2, 0.0  ;;  %v1817_v4 = vsel %vm4819_vm13, %v1816_v49, 0.0  ;;  %v4891_v29 = vpop.permute.xlu0 %1225 }
 0x45b   : > { %v1135_v17 = vstv %s4763_s10  ;;  %v4871_v2 = vadd.f32 %v1110_v16, %v4657_v7  ;;  %vm7168_vm6 = vcmp.lt.s32.totalorder %v2957_v42, 127  ;;  %v7170_v35 = vstv %s7166_s25  ;;  %s5298_s10 = sld [smem:[#allocation7 + $0x24]] }
 0x45c   : > { %v4868_v19 = vadd.f32 %v1109_v23, %v4654_v15  ;;  %v1128_v6 = vsel %vm7168_vm6, %v4560_v48, %v1126_v44  ;;  %vm7169_vm8 = vmmov %vm7168_vm6  ;;  %v4881_v60 = vmul.f32 %v7170_v35, %v1804_v56  ;;  %v7172_v55 = vstv %s7150_s29  ;;  %v1143_v59 = vpop.permute.xlu1 %1142  ;;  %s5321_s29 = sld [smem:[#allocation7 + $0x25]] }
 0x45d   : > { %v1129_v49 = vsel %vm7169_vm8, %v1126_v44, %v4560_v48  ;;  %v4885_v54 = vmul.f32 %v7172_v55, %v1789_v61  ;;  %vm7174_vm1 = vnez %v6921_v25  ;;  %v1832_v48 = vsel %vm7101_vm0, %v1829_v63, 0.0  ;;  %s5382_s25 = sld [smem:[#allocation7 + $0x29]] }
 0x45e   : > { %7171 = vst [vmem:[#allocation45_spill] sm:$0xff] %v4881_v60  ;;  %v1132_v15 = vsel %vm7174_vm1, %v1128_v6, 0.0  ;;  %v1133_v7 = vsel %vm3986_vm12, %v1129_v49, 0.0  ;;  %v7175_v56 = vmov %v7170_v35  ;;  %v7177_v44 = vstv %s3522_s23  ;;  %s4937_s23 = sld [smem:[#allocation7 + $0xc]] }
 0x45f   : > { %7173 = vst [vmem:[#allocation48_spill] sm:$0xff] %v4885_v54  ;;  %v4899_v23 = vmul.f32 %v7175_v56, %v1803_v32  ;;  %v1136_v61 = vmul.f32 %v1135_v17, %v1132_v15  ;;  %v1137_v16 = vmul.f32 %v1135_v17, %v1133_v7  ;;  %v4903_v35 = vmul.f32 %v7177_v44, %v1818_v27  ;;  %v7185_v15 = vld [vmem:[#allocation54_spill] sm:$0xff]  ;;  %v7186_v7 = vld [vmem:[#allocation53_spill] sm:$0xff] }
 0x460   : > { %v7179_v6 = vstv %s3531_s28  ;;  %v7181_v49 = vmov %v7177_v44  ;;  %v1152_v38 = vstv %s4813_s20  ;;  %v1145_v27 = vsel %vm6647_vm9, %v4618_v53, %v1143_v59  ;;  %s4970_s28 = sld [smem:[#allocation7 + $0x1d]] }
 0x461   : > { %7176 = vst [vmem:[#allocation47_spill] sm:$0xff] %v4899_v23  ;;  %7178 = vst [vmem:[#allocation50_spill] sm:$0xff] %v4903_v35  ;;  %v4907_v55 = vmul.f32 %v7179_v6, %v1831_v52  ;;  %v4912_v60 = vmul.f32 %v7181_v49, %v1817_v4  ;;  %v4918_v32 = vadd.f32 %v1136_v61, %v4766_v58  ;;  %v7183_v4 = vmov %v7179_v6  ;;  %v4943_v61 = vpop.permute.xlu0 %1242  ;;  %s5335_s20 = sld [smem:[#allocation7 + $0x26]] }
 0x462   : > { %v4921_v63 = vadd.f32 %v1137_v16, %v4769_v20  ;;  %v1146_v52 = vsel %vm6647_vm9, %v1143_v59, %v4618_v53  ;;  %v4931_v17 = vmul.f32 %v7183_v4, %v1832_v48  ;;  %vm7187_vm8 = vcmp.lt.s32.totalorder %v2957_v42, 2  ;;  %v7190_v59 = vld [vmem:[#allocation56_spill] sm:$0xff]  ;;  %v7191_v48 = vld [vmem:[#allocation55_spill] sm:$0xff] }
 0x463   : > { %7180 = vst [vmem:[#allocation49_spill] sm:$0xff] %v4907_v55  ;;  %7182 = vst [vmem:[#allocation51_spill] sm:$0xff] %v4912_v60  ;;  %v1843_v58 = vsel %vm7187_vm8, %v7186_v7, %v7185_v15  ;;  %vm7188_vm6 = vnez %v7053_v3  ;;  %v1150_v56 = vsel %vm3782_vm4, %v1146_v52, 0.0  ;;  %v1857_v16 = vsel %vm7162_vm5, %v7191_v48, %v7190_v59  ;;  %v7194_v52 = vld [vmem:[#allocation57_spill] sm:$0xff] }
 0x464   : > { %7184 = vst [vmem:[#allocation52_spill] sm:$0xff] %v4931_v17  ;;  %v1149_v20 = vsel %vm7188_vm6, %v1145_v27, 0.0  ;;  %vm7189_vm9 = vmmov %vm7187_vm8  ;;  %v1154_v6 = vmul.f32 %v1152_v38, %v1150_v56  ;;  %v7193_v27 = vld [vmem:[#allocation58_spill] sm:$0xff]  ;;  %vm7195_vm13 = vcmp.lt.s32.totalorder %v2957_v42, 127  ;;  %v7214_v17 = vstv %s7204_s2  ;;  %s5461_s2 = sld [smem:[#allocation7 + $0x2c]] }
 0x465   : > { %v1844_v53 = vsel %vm7189_vm9, %v7185_v15, %v7186_v7  ;;  %v1153_v44 = vmul.f32 %v1152_v38, %v1149_v20  ;;  %vm7192_vm8 = vmmov %vm7162_vm5  ;;  %v1879_v4 = vsel %vm7195_vm13, %v7194_v52, %v7193_v27  ;;  %v1169_v7 = vstv %s4865_s1  ;;  %v1160_v20 = vpop.permute.xlu1 %1159  ;;  %v7197_v38 = vld [vmem:[#allocation119_spill] sm:$0xff]  ;;  %s5396_s1 = sld [smem:[#allocation7 + $0x2a]] }
 0x466   : > { %v1858_v49 = vsel %vm7192_vm8, %v7190_v59, %v7191_v48  ;;  %vm7196_vm9 = vmmov %vm7195_vm13  ;;  %vm6652_vm5 = vcmp.lt.s32.totalorder %v7197_v38, 240  ;;  %v4976_v59 = vadd.f32 %v1154_v6, %v4827_v8  ;;  %vm7198_vm13 = vcmp.lt.s32.totalorder %v2957_v42, 125  ;;  %v7201_v6 = vld [vmem:[#allocation60_spill] sm:$0xff] }
 0x467   : > { %v1880_v15 = vsel %vm7196_vm9, %v7193_v27, %v7194_v52  ;;  %v4973_v56 = vadd.f32 %v1153_v44, %v4824_v36  ;;  %v1162_v48 = vsel %vm7198_vm13, %v4682_v62, %v1160_v20  ;;  %vm7199_vm8 = vmmov %vm7198_vm13  ;;  %v1845_v1 = vsel %vm7145_vm14, %v1844_v53, 0.0  ;;  %v4994_v44 = vpop.permute.xlu0 %1259 }
 0x468   : > { %v1163_v27 = vsel %vm7199_vm8, %v1160_v20, %v4682_v62  ;;  %v1846_v52 = vsel %vm7027_vm11, %v1843_v58, 0.0  ;;  %v1166_v36 = vsel %vm7158_vm7, %v1162_v48, 0.0  ;;  %v1859_v62 = vsel %vm7107_vm3, %v1858_v49, 0.0  ;;  %v7202_v20 = vld [vmem:[#allocation59_spill] sm:$0xff] }
 0x469   : > { %v1167_v8 = vsel %vm6989_vm15, %v1163_v27, 0.0  ;;  %vm7203_vm9 = vcmp.lt.s32.totalorder %v2957_v42, 126  ;;  %v1170_v53 = vmul.f32 %v1169_v7, %v1166_v36  ;;  %v1860_v48 = vsel %vm7121_vm2, %v1857_v16, 0.0 }
 0x46a   : > { %v1893_v58 = vsel %vm7203_vm9, %v7202_v20, %v7201_v6  ;;  %v1171_v23 = vmul.f32 %v1169_v7, %v1167_v8  ;;  %v1881_v27 = vsel %vm7174_vm1, %v1879_v4, 0.0  ;;  %v1882_v49 = vsel %vm3986_vm12, %v1880_v15, 0.0  ;;  %vm7205_vm13 = vmmov %vm7203_vm9  ;;  %v1177_v7 = vpop.permute.xlu1 %1176 }
 0x46b   : > { %v1894_v54 = vsel %vm7205_vm13, %v7201_v6, %v7202_v20  ;;  %v5016_v16 = vadd.f32 %v1170_v53, %v4868_v19  ;;  %vm7207_vm9 = vcmp.lt.s32.totalorder %v2957_v42, 115  ;;  %v7209_v8 = vstv %s7200_s19  ;;  %v5042_v53 = vpop.permute.xlu0 %1276  ;;  %s5439_s19 = sld [smem:[#allocation2]] }
 0x46c   : > { %v5019_v4 = vadd.f32 %v1171_v23, %v4871_v2  ;;  %v5024_v15 = vsel %vm7207_vm9, %v4738_v37, %v1177_v7  ;;  %vm7208_vm13 = vmmov %vm7207_vm9  ;;  %v5033_v6 = vmul.f32 %v7209_v8, %v1845_v1  ;;  %v7211_v20 = vmov %v7209_v8  ;;  %v7222_v8 = vld [vmem:[#allocation62_spill] sm:$0xff] }
 0x46d   : > { %v5029_v36 = vsel %vm7208_vm13, %v1177_v7, %v4738_v37  ;;  %v5037_v19 = vmul.f32 %v7211_v20, %v1846_v52  ;;  %v1895_v2 = vsel %vm7188_vm6, %v1893_v58, 0.0  ;;  %v5046_v55 = vmul.f32 %v7214_v17, %v1859_v62  ;;  %v7223_v20 = vld [vmem:[#allocation61_spill] sm:$0xff]  ;;  %vm7224_vm13 = vmmov %vm7199_vm8 }
 0x46e   : > { %7210 = vst [vmem:[#allocation54_spill] sm:$0xff] %v5033_v6  ;;  %v7216_v35 = vmov %v7214_v17  ;;  %v7218_v37 = vstv %s7206_s24  ;;  %v1896_v52 = vsel %vm3782_vm4, %v1894_v54, 0.0  ;;  %v1907_v17 = vsel %vm7224_vm13, %v7223_v20, %v7222_v8  ;;  %vm5087_vm13 = vmand %vm6652_vm5, %vm7027_vm11  ;;  %s5477_s24 = sld [smem:[#allocation7 + $0x56]] }
 0x46f   : > { %7213 = vst [vmem:[#allocation53_spill] sm:$0xff] %v5037_v19  ;;  %7215 = vst [vmem:[#allocation56_spill] sm:$0xff] %v5046_v55  ;;  %v5050_v60 = vmul.f32 %v7216_v35, %v1860_v48  ;;  %v5054_v1 = vmul.f32 %v7218_v37, %v1881_v27  ;;  %v7220_v58 = vmov %v7218_v37  ;;  %v1908_v35 = vsel %vm7199_vm8, %v7222_v8, %v7223_v20  ;;  %v1194_v48 = vpop.permute.xlu1 %1193  ;;  %v7227_v37 = vld [vmem:[#allocation64_spill] sm:$0xff]  ;;  %v5106_v19 = vpop.permute.xlu0 %1293 }
 0x470   : > { %v5061_v7 = vmul.f32 %v7220_v58, %v1882_v49  ;;  %v1203_v62 = vstv %s4970_s28  ;;  %v7225_v54 = vstv %s7212_s22  ;;  %v7228_v49 = vld [vmem:[#allocation63_spill] sm:$0xff]  ;;  %vm7231_vm8 = vcmp.lt.s32.totalorder %v2957_v42, 114  ;;  %s5410_s28 = sld [smem:[#allocation7 + $0x2b]] }
 0x471   : > { %7217 = vst [vmem:[#allocation55_spill] sm:$0xff] %v5050_v60  ;;  %7219 = vst [vmem:[#allocation58_spill] sm:$0xff] %v5054_v1  ;;  %v5076_v27 = vmul.f32 %v7225_v54, %v1895_v2  ;;  %v1921_v58 = vsel %vm7207_vm9, %v7228_v49, %v7227_v37  ;;  %v1196_v2 = vsel %vm7231_vm8, %v4785_v14, %v1194_v48  ;;  %v1909_v6 = vsel %vm7158_vm7, %v1907_v17, 0.0  ;;  %v7236_v17 = vld [vmem:[#allocation65_spill] sm:$0xff]  ;;  %s5501_s22 = sld [smem:[#allocation7 + $0x57]] }
 0x472   : > { %7221 = vst [vmem:[#allocation57_spill] sm:$0xff] %v5061_v7  ;;  %vm7232_vm6 = vmmov %vm7231_vm8  ;;  %v5099_v23 = vmul.f32 %v7225_v54, %v1896_v52  ;;  %v1200_v55 = vsel %vm7145_vm14, %v1196_v2, 0.0  ;;  %v1910_v7 = vsel %vm6989_vm15, %v1908_v35, 0.0  ;;  %v1923_v2 = vsel %vm7136_vm10, %v1921_v58, 0.0 }
 0x473   : > { %7226 = vst [vmem:[#allocation119_spill] sm:$0xff] %v5076_v27  ;;  %v1197_v20 = vsel %vm7232_vm6, %v1194_v48, %v4785_v14  ;;  %v1204_v14 = vmul.f32 %v1203_v62, %v1200_v55  ;;  %v1922_v48 = vsel %vm7207_vm9, %v7227_v37, %v7228_v49  ;;  %vm7237_vm8 = vmmov %vm7232_vm6  ;;  %v7238_v55 = vmov 0  ;;  %v5164_v18 = vpop.permute.xlu0 %1310 }
 0x474   : > { %7233 = vst [vmem:[#allocation60_spill] sm:$0xff] %v5099_v23  ;;  %v1201_v27 = vsel %vm5087_vm13, %v1197_v20, 0.0  ;;  %v7235_v20 = vld [vmem:[#allocation66_spill] sm:$0xff]  ;;  %vm5127_vm6 = vmand %vm6652_vm5, %vm7101_vm0  ;;  %v1220_v35 = vstv %s5013_s12  ;;  %v7248_v13 = vstv %s3628_s14  ;;  %s5485_s12 = sld [smem:[#allocation7 + $0x2d]] }
 0x475   : > { %v1205_v52 = vmul.f32 %v1203_v62, %v1201_v27  ;;  %v1935_v54 = vsel %vm7237_vm8, %v7236_v17, %v7235_v20  ;;  %v7239_v55 = vsel %vm5127_vm6, 4294967295, %v7238_v55  ;;  %v1211_v62 = vpop.permute.xlu1 %1210  ;;  %v5133_v27 = vadd.f32 %v1204_v14, %v4918_v32  ;;  %vm5142_vm9 = vmand %vm6652_vm5, %vm7121_vm2 }
 0x476   : > { %vm7242_vm8 = vcmp.lt.s32.totalorder %v2957_v42, 113  ;;  %v7244_v14 = vstv %s7234_s26  ;;  %v5168_v22 = vmul.f32 %v7248_v13, %v1923_v2  ;;  %v1237_v2 = vstv %s5072_s27  ;;  %s5530_s27 = sld [smem:[#allocation7 + $0x58]] }
 0x477   : > { %v5136_v37 = vadd.f32 %v1205_v52, %v4921_v63  ;;  %v1213_v58 = vsel %vm7242_vm8, %v4845_v46, %v1211_v62  ;;  %vm7243_vm11 = vmmov %vm7242_vm8  ;;  %v5154_v63 = vmul.f32 %v7244_v14, %v1909_v6  ;;  %v7246_v52 = vmov %v7244_v14  ;;  %v7252_v14 = vld [vmem:[#allocation67_spill] sm:$0xff]  ;;  %s5584_s26 = sld [smem:[#allocation7 + $0x5a]] }
 0x478   : > { %v1214_v32 = vsel %vm7243_vm11, %v1211_v62, %v4845_v46  ;;  %v5158_v60 = vmul.f32 %v7246_v52, %v1910_v7  ;;  %v1217_v23 = vsel %vm7107_vm3, %v1213_v58, 0.0  ;;  %7249 = vst [vmem:[#allocation61_spill] sm:$0xff] %v5168_v22  ;;  %v1924_v46 = vsel %vm5127_vm6, %v1922_v48, 0.0 }
 0x479   : > { %7245 = vst [vmem:[#allocation59_spill] sm:$0xff] %v5154_v63  ;;  %v1218_v1 = vsel %vm5142_vm9, %v1214_v32, 0.0  ;;  %v1221_v6 = vmul.f32 %v1220_v35, %v1217_v23  ;;  %vm7250_vm11 = vcmp.lt.s32.totalorder %v2957_v42, 114  ;;  %v1937_v58 = vsel %vm7145_vm14, %v1935_v54, 0.0  ;;  %v7251_v32 = vld [vmem:[#allocation68_spill] sm:$0xff]  ;;  %v1228_v52 = vpop.permute.xlu1 %1227  ;;  %v7261_v54 = vld [vmem:[#allocation69_spill] sm:$0xff] }
 0x47a   : > { %7247 = vst [vmem:[#allocation62_spill] sm:$0xff] %v5158_v60  ;;  %v1222_v62 = vmul.f32 %v1220_v35, %v1218_v1  ;;  %v1936_v7 = vsel %vm7250_vm11, %v7235_v20, %v7236_v17  ;;  %v1949_v13 = vsel %vm7242_vm8, %v7252_v14, %v7251_v32  ;;  %vm7253_vm11 = vnez %v6830_v33  ;;  %v7260_v17 = vld [vmem:[#allocation70_spill] sm:$0xff]  ;;  %v5221_v60 = vpop.permute.xlu0 %1327  ;;  %v7266_v63 = vld [vmem:[#allocation72_spill] sm:$0xff] }
 0x47b   : > { %v5190_v23 = vadd.f32 %v1221_v6, %v4973_v56  ;;  %vm7254_vm2 = vcmp.lt.s32.totalorder %v7197_v38, 240  ;;  %vm7257_vm8 = vcmp.lt.s32.totalorder %v2957_v42, 112  ;;  %vm7259_vm5 = vcmp.lt.s32.totalorder %v2957_v42, 113 }
 0x47c   : > { %v5193_v1 = vadd.f32 %v1222_v62, %v4976_v59  ;;  %vm5199_vm14 = vmand %vm7254_vm2, %vm7253_vm11  ;;  %v1230_v20 = vsel %vm7257_vm8, %v4891_v29, %v1228_v52  ;;  %v1950_v59 = vsel %vm7259_vm5, %v7251_v32, %v7252_v14  ;;  %vm7263_vm11 = vnez %v6828_v41 }
 0x47d   : > { %vm7258_vm6 = vmmov %vm7257_vm8  ;;  %v1234_v6 = vsel %vm7263_vm11, %v1230_v20, 0.0  ;;  %v1938_v32 = vsel %vm5087_vm13, %v1936_v7, 0.0  ;;  %v1951_v20 = vsel %vm7107_vm3, %v1949_v13, 0.0  ;;  %vm7268_vm5 = vcmp.lt.s32.totalorder %v2957_v42, 111  ;;  %v5253_v13 = vpop.permute.xlu1 %1244 }
 0x47e   : > { %v1231_v56 = vsel %vm7258_vm6, %v1228_v52, %v4891_v29  ;;  %vm7262_vm2 = vmmov %vm7258_vm6  ;;  %v1238_v14 = vmul.f32 %v1237_v2, %v1234_v6  ;;  %vm7272_vm13 = vcmp.lt.s32.totalorder %v7197_v38, 240  ;;  %v7285_v48 = vstv %s3678_s4  ;;  %s5351_s4 = sld [smem:[#allocation7 + $0x27]] }
 0x47f   : > { %v1963_v35 = vsel %vm7262_vm2, %v7261_v54, %v7260_v17  ;;  %v1235_v62 = vsel %vm5199_vm14, %v1231_v56, 0.0  ;;  %vm7264_vm6 = vmmov %vm7262_vm2  ;;  %v7267_v56 = vld [vmem:[#allocation71_spill] sm:$0xff] }
 0x480   : > { %v1964_v29 = vsel %vm7264_vm6, %v7260_v17, %v7261_v54  ;;  %v1239_v52 = vmul.f32 %v1237_v2, %v1235_v62  ;;  %v1977_v22 = vsel %vm7268_vm5, %v7267_v56, %v7266_v63  ;;  %vm7269_vm8 = vmmov %vm7268_vm5  ;;  %v7270_v54 = vstv %s3628_s14  ;;  %s5268_s14 = sld [smem:[#allocation7 + $0x20]] }
 0x481   : > { %v1978_v17 = vsel %vm7269_vm8, %v7266_v63, %v7267_v56  ;;  %v5243_v8 = vmul.f32 %v7270_v54, %v1924_v46  ;;  %vm5249_vm2 = vmand %vm7272_vm13, %vm3986_vm12  ;;  %v1965_v63 = vsel %vm7263_vm11, %v1963_v35, 0.0  ;;  %vm6656_vm6 = vcmp.lt.s32.totalorder %v2957_v42, 98  ;;  %v7278_v56 = vld [vmem:[#allocation74_spill] sm:$0xff]  ;;  %v7279_v54 = vld [vmem:[#allocation73_spill] sm:$0xff] }
 0x482   : > { %v1952_v46 = vsel %vm5142_vm9, %v1950_v59, 0.0  ;;  %v5263_v2 = vadd.f32 %v1238_v14, %v5016_v16  ;;  %v5266_v6 = vadd.f32 %v1239_v52, %v5019_v4  ;;  %v7276_v62 = vstv %s7265_s30  ;;  %v5285_v14 = vpop.permute.xlu0 %1344  ;;  %vm7290_vm8 = vmmov %vm7272_vm13  ;;  %s5611_s30 = sld [smem:[#allocation7 + $0x5c]] }
 0x483   : > { %7271 = vst [vmem:[#allocation64_spill] sm:$0xff] %v5243_v8  ;;  %v5273_v35 = vmul.f32 %v7276_v62, %v1937_v58  ;;  %vm7280_vm9 = vcmp.lt.s32.totalorder %v2957_v42, 110  ;;  %v7281_v59 = vmov %v7276_v62  ;;  %v1966_v4 = vsel %vm5199_vm14, %v1964_v29, 0.0  ;;  %vm5316_vm13 = vmand %vm7290_vm8, %vm3782_vm4  ;;  %v1262_v62 = vpop.permute.xlu1 %1261 }
 0x484   : > { %v1991_v49 = vsel %vm7280_vm9, %v7279_v54, %v7278_v56  ;;  %v5281_v16 = vmul.f32 %v7281_v59, %v1938_v32  ;;  %v7283_v52 = vstv %s7275_s16  ;;  %v1979_v58 = vsel %vm7174_vm1, %v1977_v22, 0.0  ;;  %vm7287_vm14 = vmmov %vm7280_vm9  ;;  %s5635_s16 = sld [smem:[#allocation7 + $0x5e]] }
 0x485   : > { %7277 = vst [vmem:[#allocation63_spill] sm:$0xff] %v5273_v35  ;;  %v5291_v8 = vmul.f32 %v7283_v52, %v1951_v20  ;;  %v1980_v32 = vsel %vm5249_vm2, %v1978_v17, 0.0  ;;  %v5302_v29 = vmul.f32 %v7285_v48, %v1965_v63  ;;  %v1992_v20 = vsel %vm7287_vm14, %v7278_v56, %v7279_v54  ;;  %vm7295_vm8 = vmmov %vm7287_vm14  ;;  %v7307_v35 = vld [vmem:[#allocation77_spill] sm:$0xff] }
 0x486   : > { %7282 = vst [vmem:[#allocation66_spill] sm:$0xff] %v5281_v16  ;;  %v7288_v59 = vmov %v7283_v52  ;;  %v1271_v17 = vstv %s5186_s0  ;;  %vm7293_vm9 = vnez %v7053_v3  ;;  %v5327_v56 = vmul.f32 %v7285_v48, %v1966_v4  ;;  %v7306_v16 = vld [vmem:[#allocation78_spill] sm:$0xff]  ;;  %s5597_s0 = sld [smem:[#allocation7 + $0x5b]] }
 0x487   : > { %7284 = vst [vmem:[#allocation65_spill] sm:$0xff] %v5291_v8  ;;  %7286 = vst [vmem:[#allocation68_spill] sm:$0xff] %v5302_v29  ;;  %v5310_v52 = vmul.f32 %v7288_v59, %v1952_v46  ;;  %v1993_v63 = vsel %vm7293_vm9, %v1991_v49, 0.0  ;;  %v1264_v46 = vsel %vm7287_vm14, %v4994_v44, %v1262_v62  ;;  %v1265_v54 = vsel %vm7295_vm8, %v1262_v62, %v4994_v44  ;;  %v7300_v44 = vld [vmem:[#allocation76_spill] sm:$0xff]  ;;  %v7301_v62 = vld [vmem:[#allocation75_spill] sm:$0xff] }
 0x488   : > { %7294 = vst [vmem:[#allocation70_spill] sm:$0xff] %v5327_v56  ;;  %v7296_v59 = vstv %s3688_s17  ;;  %v1268_v4 = vsel %vm7293_vm9, %v1264_v46, 0.0  ;;  %v1269_v48 = vsel %vm5316_vm13, %v1265_v54, 0.0  ;;  %v5349_v56 = vpop.permute.xlu0 %1361  ;;  %vm7302_vm14 = vcmp.lt.s32.totalorder %v2957_v42, 109  ;;  %s5359_s17 = sld [smem:[#allocation7 + $0x28]] }
 0x489   : > { %7289 = vst [vmem:[#allocation67_spill] sm:$0xff] %v5310_v52  ;;  %v5339_v29 = vmul.f32 %v7296_v59, %v1979_v58  ;;  %v7298_v52 = vmov %v7296_v59  ;;  %v2005_v8 = vsel %vm7302_vm14, %v7301_v62, %v7300_v44  ;;  %v1994_v58 = vsel %vm5316_vm13, %v1992_v20, 0.0  ;;  %vm7305_vm8 = vmmov %vm7302_vm14 }
 0x48a   : > { %v5343_v49 = vmul.f32 %v7298_v52, %v1980_v32  ;;  %v1272_v32 = vmul.f32 %v1271_v17, %v1268_v4  ;;  %v1273_v52 = vmul.f32 %v1271_v17, %v1269_v48  ;;  %v7303_v46 = vstv %s3698_s11  ;;  %v1279_v17 = vpop.permute.xlu1 %1278  ;;  %s5418_s11 = sld [smem:[#allocation7]] }
 0x48b   : > { %7297 = vst [vmem:[#allocation69_spill] sm:$0xff] %v5339_v29  ;;  %v5363_v59 = vmul.f32 %v7303_v46, %v1993_v63  ;;  %v2006_v54 = vsel %vm7305_vm8, %v7300_v44, %v7301_v62  ;;  %vm7308_vm14 = vcmp.lt.s32.totalorder %v2957_v42, 99  ;;  %vm7309_vm13 = vcmp.lt.s32.totalorder %v7197_v38, 240 }
 0x48c   : > { %7299 = vst [vmem:[#allocation72_spill] sm:$0xff] %v5343_v49  ;;  %v2019_v49 = vsel %vm7308_vm14, %v7307_v35, %v7306_v16  ;;  %vm5377_vm5 = vmand %vm7309_vm13, %vm6989_vm15  ;;  %v1288_v22 = vstv %s5255_s21  ;;  %v5385_v63 = vadd.f32 %v1272_v32, %v5133_v27  ;;  %v5388_v4 = vadd.f32 %v1273_v52, %v5136_v37  ;;  %v5408_v52 = vpop.permute.xlu0 %1378  ;;  %s5642_s21 = sld [smem:[#allocation7 + $0x5f]] }
 0x48d   : > { %7304 = vst [vmem:[#allocation71_spill] sm:$0xff] %v5363_v59  ;;  %v1281_v48 = vsel %vm7305_vm8, %v5042_v53, %v1279_v17  ;;  %vm7312_vm14 = vmmov %vm7305_vm8  ;;  %v2007_v62 = vsel %vm7158_vm7, %v2005_v8, 0.0  ;;  %v5402_v27 = vmul.f32 %v7303_v46, %v1994_v58  ;;  %vm7315_vm13 = vcmp.lt.s32.totalorder %v2957_v42, 99  ;;  %v7317_v46 = vld [vmem:[#allocation79_spill] sm:$0xff] }
 0x48e   : > { %v1282_v44 = vsel %vm7312_vm14, %v1279_v17, %v5042_v53  ;;  %v1285_v37 = vsel %vm7158_vm7, %v1281_v48, 0.0  ;;  %7314 = vst [vmem:[#allocation73_spill] sm:$0xff] %v5408_v52  ;;  %v2020_v53 = vsel %vm7315_vm13, %v7306_v16, %v7307_v35  ;;  %v2008_v8 = vsel %vm5377_vm5, %v2006_v54, 0.0  ;;  %v1296_v54 = vpop.permute.xlu1 %1295  ;;  %vm7321_vm14 = vmmov %vm7315_vm13  ;;  %v7339_v16 = vld [vmem:[#allocation104_spill] sm:$0xff] }
 0x48f   : > { %7313 = vst [vmem:[#allocation74_spill] sm:$0xff] %v5402_v27  ;;  %v1286_v32 = vsel %vm5377_vm5, %v1282_v44, 0.0  ;;  %v1289_v58 = vmul.f32 %v1288_v22, %v1285_v37  ;;  %v2021_v48 = vsel %vm7136_vm10, %v2019_v49, 0.0  ;;  %v7316_v44 = vld [vmem:[#allocation80_spill] sm:$0xff]  ;;  %vm7318_vm5 = vcmp.lt.s32.totalorder %v7197_v38, 224 }
 0x490   : > { %v1290_v17 = vmul.f32 %v1288_v22, %v1286_v32  ;;  %v2033_v27 = vsel %vm6656_vm6, %v7317_v46, %v7316_v44  ;;  %v2034_v35 = vsel %vm6656_vm6, %v7316_v44, %v7317_v46  ;;  %vm5434_vm8 = vmand %vm7318_vm5, %vm7101_vm0  ;;  %v1305_v49 = vstv %s5287_s18  ;;  %s5652_s18 = sld [smem:[#allocation7 + $0x60]] }
 0x491   : > { %v5442_v20 = vadd.f32 %v1289_v58, %v5190_v23  ;;  %v1298_v37 = vsel %vm7321_vm14, %v5106_v19, %v1296_v54  ;;  %v1299_v32 = vsel %vm7315_vm13, %v1296_v54, %v5106_v19  ;;  %vm7322_vm5 = vnez %v7026_v45  ;;  %v7327_v58 = vld [vmem:[#allocation93_spill] sm:$0xff]  ;;  %v5475_v54 = vpop.permute.xlu0 %1395 }
 0x492   : > { %v5445_v22 = vadd.f32 %v1290_v17, %v5193_v1  ;;  %vm7323_vm6 = vcmp.lt.s32.totalorder %v7197_v38, 224  ;;  %v7326_v1 = vld [vmem:[#allocation115_spill] sm:$0xff]  ;;  %vm7328_vm7 = vcmp.lt.s32.totalorder %v2957_v42, 47  ;;  %v1302_v44 = vsel %vm7136_vm10, %v1298_v37, 0.0 }
 0x493   : > { %vm5457_vm9 = vmand %vm7323_vm6, %vm7322_vm5  ;;  %v745_v17 = vsel %vm7328_vm7, %v7327_v58, %v7326_v1  ;;  %v1303_v46 = vsel %vm5434_vm8, %v1299_v32, 0.0  ;;  %v7330_v59 = vstv %s3710_s3  ;;  %v2022_v3 = vsel %vm5434_vm8, %v2020_v53, 0.0  ;;  %s5513_s3 = sld [smem:[#allocation7 + $0x2e]] }
 0x494   : > { %vm7329_vm14 = vmmov %vm7328_vm7  ;;  %v5481_v29 = vmul.f32 %v7330_v59, %v2007_v62  ;;  %v1306_v28 = vmul.f32 %v1305_v49, %v1302_v44  ;;  %v1307_v52 = vmul.f32 %v1305_v49, %v1303_v46  ;;  %vm7334_vm7 = vnez %v7013_v43  ;;  %v5499_v62 = vpop.permute.xlu1 %1312 }
 0x495   : > { %v746_v19 = vsel %vm7329_vm14, %v7326_v1, %v7327_v58  ;;  %v7332_v1 = vstv %s4063_s9  ;;  %v2035_v32 = vsel %vm7334_vm7, %v2033_v27, 0.0  ;;  %v7335_v58 = vmov %v7330_v59  ;;  %s5550_s9 = sld [smem:[#allocation7 + $0x2f]] }
 0x496   : > { %7331 = vst [vmem:[#allocation76_spill] sm:$0xff] %v5481_v29  ;;  %v5489_v37 = vmul.f32 %v7332_v1, %v2021_v48  ;;  %v5495_v24 = vmul.f32 %v7335_v58, %v2008_v8  ;;  %v2036_v59 = vsel %vm5457_vm9, %v2034_v35, 0.0  ;;  %vm7337_vm6 = vnez %v6962_v9  ;;  %v7338_v35 = vld [vmem:[#allocation125_spill] sm:$0xff] }
 0x497   : > { %v760_v53 = vsel %vm7337_vm6, %v746_v19, 0.0  ;;  %v761_v27 = vsel %vm3986_vm12, %v745_v17, 0.0  ;;  %v5508_v8 = vadd.f32 %v1306_v28, %v5263_v2  ;;  %v5511_v48 = vadd.f32 %v1307_v52, %v5266_v6  ;;  %v5527_v17 = vpop.permute.xlu0 %1412 }
 0x498   : > { %7333 = vst [vmem:[#allocation75_spill] sm:$0xff] %v5489_v37  ;;  %7336 = vst [vmem:[#allocation78_spill] sm:$0xff] %v5495_v24  ;;  %vm7340_vm8 = vcmp.lt.s32.totalorder %v2957_v42, 34  ;;  %v7342_v28 = vmov %v7332_v1  ;;  %v7344_v6 = vstv %s4073_s13  ;;  %vm7348_vm6 = vnez %v6868_v57  ;;  %s5562_s13 = sld [smem:[#allocation7 + $0x59]] }
 0x499   : > { %v846_v9 = vsel %vm7340_vm8, %v7339_v16, %v7338_v35  ;;  %vm7341_vm13 = vmmov %vm7340_vm8  ;;  %v5525_v2 = vmul.f32 %v7342_v28, %v2022_v3  ;;  %v5534_v52 = vmul.f32 %v7344_v6, %v2035_v32  ;;  %v7346_v46 = vmov %v7344_v6  ;;  %v1330_v6 = vpop.permute.xlu1 %1329 }
 0x49a   : > { %v847_v49 = vsel %vm7341_vm13, %v7338_v35, %v7339_v16  ;;  %v5540_v1 = vmul.f32 %v7346_v46, %v2036_v59  ;;  %vm7349_vm8 = vcmp.lt.s32.totalorder %v7197_v38, 224  ;;  %v7350_v3 = vmov 0 }
 0x49b   : > { %7343 = vst [vmem:[#allocation77_spill] sm:$0xff] %v5525_v2  ;;  %7345 = vst [vmem:[#allocation80_spill] sm:$0xff] %v5534_v52  ;;  %v7352_v58 = vstv %s4550_s5  ;;  %v1339_v59 = vstv %s5321_s29  ;;  %vm7354_vm14 = vnez %v7017_v51  ;;  %v851_v44 = vsel %vm7322_vm5, %v846_v9, 0.0  ;;  %s5574_s5 = sld [smem:[#allocation7 + $0x30]]  ;;  %v5580_v9 = vpop.permute.xlu0 %1429 }
 0x49c   : > { %7347 = vst [vmem:[#allocation79_spill] sm:$0xff] %v5540_v1  ;;  %vm5546_vm13 = vmand %vm7349_vm8, %vm7348_vm6  ;;  %v5554_v35 = vmul.f32 %v7352_v58, %v760_v53  ;;  %v7353_v32 = vmov %v7352_v58  ;;  %v850_v46 = vsel %vm7354_vm14, %v847_v49, 0.0  ;;  %vm7355_vm8 = vcmp.lt.s32.totalorder %v2957_v42, 97  ;;  %s5667_s29 = sld [smem:[#allocation7 + $0x61]] }
 0x49d   : > { %v7351_v3 = vsel %vm5546_vm13, 4294967295, %v7350_v3  ;;  %v5558_v16 = vmul.f32 %v7353_v32, %v761_v27  ;;  %v1332_v53 = vsel %vm7355_vm8, %v5221_v60, %v1330_v6  ;;  %vm7356_vm0 = vmmov %vm7355_vm8  ;;  %vm6668_vm14 = vcmp.lt.s32.totalorder %v2957_v42, 96  ;;  %v1347_v2 = vpop.permute.xlu1 %1346 }
 0x49e   : > { %v1333_v27 = vsel %vm7356_vm0, %v1330_v6, %v5221_v60  ;;  %v1336_v51 = vsel %vm7107_vm3, %v1332_v53, 0.0  ;;  %v1356_v58 = vstv %s5335_s20  ;;  %vm7357_vm0 = vnez %v6830_v33 }
 0x49f   : > { %v1337_v49 = vsel %vm5546_vm13, %v1333_v27, 0.0  ;;  %v1340_v32 = vmul.f32 %v1339_v59, %v1336_v51  ;;  %vm7358_vm8 = vcmp.lt.s32.totalorder %v7197_v38, 224  ;;  %v7359_v60 = vmov 0 }
 0x4a0   : > { %v1341_v28 = vmul.f32 %v1339_v59, %v1337_v49  ;;  %vm5590_vm5 = vmand %vm7358_vm8, %vm7357_vm0  ;;  %vm6670_vm13 = vcmp.lt.s32.totalorder %v2957_v42, 95  ;;  %v7361_v27 = vstv %s4624_s7  ;;  %vm7363_vm8 = vnez %v7057_v31  ;;  %s5625_s7 = sld [smem:[#allocation7 + $0x5d]] }
 0x4a1   : > { %v7360_v60 = vsel %vm5590_vm5, 4294967295, %v7359_v60  ;;  %v5601_v19 = vmul.f32 %v7361_v27, %v850_v46  ;;  %v7362_v59 = vmov %v7361_v27  ;;  %v918_v49 = vsel %vm7363_vm8, %v4171_v0, 0.0 }
 0x4a2   : > { %v5605_v51 = vmul.f32 %v7362_v59, %v851_v44  ;;  %v5614_v53 = vadd.f32 %v1340_v32, %v5385_v63  ;;  %v5617_v6 = vadd.f32 %v1341_v28, %v5388_v4  ;;  %v1349_v44 = vsel %vm6668_vm14, %v5285_v14, %v1347_v2  ;;  %v5631_v4 = vpop.permute.xlu0 %1446 }
 0x4a3   : > { %v1350_v0 = vsel %vm6668_vm14, %v1347_v2, %v5285_v14  ;;  %v1353_v31 = vsel %vm7263_vm11, %v1349_v44, 0.0  ;;  %v919_v14 = vsel %vm3782_vm4, %v4166_v50, 0.0  ;;  %v7364_v59 = vstv %s4937_s23  ;;  %s7617_s23 = sld [smem:[#allocation16_spill]] }
 0x4a4   : > { %v1354_v63 = vsel %vm5590_vm5, %v1350_v0, 0.0  ;;  %v1357_v2 = vmul.f32 %v1356_v58, %v1353_v31  ;;  %v5646_v44 = vmul.f32 %v7364_v59, %v918_v49  ;;  %v1364_v0 = vpop.permute.xlu1 %1363  ;;  %vm7365_vm8 = vnez %v7110_v12 }
 0x4a5   : > { %v1358_v32 = vmul.f32 %v1356_v58, %v1354_v63  ;;  %v986_v58 = vsel %vm7365_vm8, %v4414_v39, 0.0  ;;  %v987_v49 = vsel %vm7348_vm6, %v4409_v47, 0.0  ;;  %v7366_v12 = vmov %v7364_v59 }
 0x4a6   : > { %v5661_v31 = vadd.f32 %v1357_v2, %v5442_v20  ;;  %v5671_v39 = vmul.f32 %v7366_v12, %v919_v14  ;;  %vm7367_vm8 = vnez %v7161_v34  ;;  %v1055_v20 = vsel %vm6989_vm15, %v4662_v11, 0.0 }
 0x4a7   : > { %v5664_v63 = vadd.f32 %v1358_v32, %v5445_v22  ;;  %v1054_v47 = vsel %vm7367_vm8, %v4667_v21, 0.0  ;;  %v5679_v22 = vpop.permute.xlu0 %1463  ;;  %v7368_v50 = vstv %s4988_s6  ;;  %v7370_v37 = vstv %s5170_s8  ;;  %s7618_s6 = sld [smem:[#allocation21_spill]] }
 0x4a8   : > { %v5689_v34 = vmul.f32 %v7368_v50, %v986_v58  ;;  %v7369_v21 = vmov %v7368_v50  ;;  %v1381_v46 = vpop.permute.xlu1 %1380  ;;  %v5699_v24 = vmul.f32 %v7370_v37, %v1054_v47  ;;  %v7371_v32 = vmov %v7370_v37  ;;  %s7619_s8 = sld [smem:[#allocation22_spill]] }
 0x4a9   : > { %v5693_v28 = vmul.f32 %v7369_v21, %v987_v49  ;;  %v5703_v59 = vmul.f32 %v7371_v32, %v1055_v20  ;;  %vm7372_vm8 = vcmp.lt.s32.totalorder %v7197_v38, 224  ;;  %v7373_v50 = vmov 0 }
 0x4aa   : > { %vm5711_vm14 = vmand %vm7372_vm8, %vm3986_vm12  ;;  %v1366_v58 = vsel %vm6670_vm13, %v5349_v56, %v1364_v0  ;;  %v1367_v37 = vsel %vm6670_vm13, %v1364_v0, %v5349_v56  ;;  %v1183_v32 = vsel %vm7136_vm10, %v5024_v15, 0.0  ;;  %vm7375_vm8 = vnez %v7239_v55 }
 0x4ab   : > { %v7374_v50 = vsel %vm5711_vm14, 4294967295, %v7373_v50  ;;  %v5721_v49 = vpop.permute.xlu0 %1480  ;;  %v1184_v21 = vsel %vm7375_vm8, %v5029_v36, 0.0  ;;  %vm7376_vm13 = vcmp.lt.s32.totalorder %v2957_v42, 111  ;;  %vm7378_vm12 = vcmp.lt.s32.totalorder %v2957_v42, 98 }
 0x4ac   : > { %v1247_v0 = vsel %vm7376_vm13, %v4943_v61, %v5253_v13  ;;  %vm7377_vm5 = vmmov %vm7376_vm13  ;;  %v1315_v15 = vsel %vm7378_vm12, %v5164_v18, %v5499_v62  ;;  %v1398_v55 = vpop.permute.xlu1 %1397  ;;  %v1370_v56 = vsel %vm7174_vm1, %v1366_v58, 0.0  ;;  %v1371_v12 = vsel %vm5711_vm14, %v1367_v37, 0.0 }
 0x4ad   : > { %v1248_v20 = vsel %vm7377_vm5, %v5253_v13, %v4943_v61  ;;  %vm7379_vm8 = vmmov %vm7378_vm12  ;;  %v7380_v47 = vstv %s5227_s15  ;;  %vm7382_vm12 = vcmp.lt.s32.totalorder %v7197_v38, 224  ;;  %vm7386_vm13 = vcmp.lt.s32.totalorder %v2957_v42, 93  ;;  %v7388_v13 = vld [vmem:[#allocation106_spill] sm:$0xff]  ;;  %s7621_s15 = sld [smem:[#allocation20_spill]] }
 0x4ae   : > { %v1316_v36 = vsel %vm7379_vm8, %v5499_v62, %v5164_v18  ;;  %v5758_v14 = vmul.f32 %v7380_v47, %v1183_v32  ;;  %v7381_v27 = vmov %v7380_v47  ;;  %vm5768_vm5 = vmand %vm7382_vm12, %vm6989_vm15  ;;  %v7383_v18 = vmov 0 }
 0x4af   : > { %v5762_v11 = vmul.f32 %v7381_v27, %v1184_v21  ;;  %v7384_v18 = vsel %vm5768_vm5, 4294967295, %v7383_v18  ;;  %v1400_v62 = vsel %vm7386_vm13, %v5475_v54, %v1398_v55  ;;  %vm7387_vm8 = vmmov %vm7386_vm13  ;;  %v5778_v37 = vpop.permute.xlu0 %1497  ;;  %v1251_v27 = vsel %vm7174_vm1, %v1247_v0, 0.0 }
 0x4b0   : > { %7385 = vst [vmem:[#allocation115_spill] sm:$0xff] %v7384_v18  ;;  %v1401_v58 = vsel %vm7387_vm8, %v1398_v55, %v5475_v54  ;;  %v1252_v47 = vsel %vm5249_vm2, %v1248_v20, 0.0  ;;  %v1319_v32 = vsel %vm7334_vm7, %v1315_v15, 0.0  ;;  %v1320_v21 = vsel %vm5457_vm9, %v1316_v36, 0.0  ;;  %v7400_v15 = vld [vmem:[#allocation73_spill] sm:$0xff] }
 0x4b1   : > { %vm7389_vm12 = vnez %v7388_v13  ;;  %vm7390_vm13 = vcmp.lt.s32.totalorder %v7197_v38, 208  ;;  %v7391_v54 = vmov 0  ;;  %v7394_v7 = vstv %s5351_s4 }
 0x4b2   : > { %vm5792_vm8 = vmand %vm7390_vm13, %vm7389_vm12  ;;  %v1374_v20 = vmul.f32 %v7394_v7, %v1370_v56  ;;  %v7395_v0 = vmov %v7394_v7  ;;  %vm7396_vm2 = vcmp.lt.s32.totalorder %v7197_v38, 224  ;;  %v7397_v23 = vmov 0  ;;  %v1415_v56 = vpop.permute.xlu1 %1414  ;;  %v7403_v7 = vld [vmem:[#allocation118_spill] sm:$0xff] }
 0x4b3   : > { %v7392_v54 = vsel %vm5792_vm8, 4294967295, %v7391_v54  ;;  %v1375_v55 = vmul.f32 %v7395_v0, %v1371_v12  ;;  %vm5805_vm9 = vmand %vm7396_vm2, %vm3782_vm4  ;;  %vm7401_vm13 = vcmp.lt.s32.totalorder %v2957_v42, 94  ;;  %vm7404_vm14 = vnez %v7403_v7  ;;  %v5837_v18 = vpop.permute.xlu0 %1514  ;;  %p7625_p11 = scmp.ne.s32.totalorder %s7621_s15, 0 }
 0x4b4   : > { %7393 = vst [vmem:[#allocation93_spill] sm:$0xff] %v7392_v54  ;;  %v7398_v23 = vsel %vm5805_vm9, 4294967295, %v7397_v23  ;;  %v1383_v36 = vsel %vm7401_vm13, %v7400_v15, %v1381_v46  ;;  %vm7402_vm15 = vmmov %vm7401_vm13  ;;  %v1404_v12 = vsel %vm7404_vm14, %v1400_v62, 0.0  ;;  %v1405_v0 = vsel %vm5768_vm5, %v1401_v58, 0.0 }
 0x4b5   : > { %7399 = vst [vmem:[#allocation125_spill] sm:$0xff] %v7398_v23  ;;  %v1384_v61 = vsel %vm7402_vm15, %v1381_v46, %v7400_v15  ;;  %vm7405_vm2 = vcmp.lt.s32.totalorder %v2957_v42, 83  ;;  %v7407_v1 = vstv %s5268_s14  ;;  %7409 = vst [vmem:[#allocation104_spill] sm:$0xff] %v5837_v18  ;;  %v7410_v7 = vstv %s5298_s10  ;;  %s2454_s14 = sshll.u32 %s7617_s23, 7  ;;  %s7623_s10 = sshll.u32 %s7618_s6, 3 }
 0x4b6   : > { %v1417_v2 = vsel %vm7405_vm2, %v5527_v17, %v1415_v56  ;;  %vm7406_vm4 = vmmov %vm7405_vm2  ;;  %v5827_v52 = vmul.f32 %v7407_v1, %v1251_v27  ;;  %v7408_v46 = vmov %v7407_v1  ;;  %v5841_v5 = vmul.f32 %v7410_v7, %v1319_v32  ;;  %v7412_v27 = vld [vmem:[#allocation116_spill] sm:$0xff]  ;;  %s336_s20 = scalar_lea.vmem [#allocation8], %s7623_s10 }
 0x4b7   : > { %v1418_v29 = vsel %vm7406_vm4, %v1415_v56, %v5527_v17  ;;  %v5831_v15 = vmul.f32 %v7408_v46, %v1252_v47  ;;  %v1421_v62 = vsel %vm7136_vm10, %v1417_v2, 0.0  ;;  %v7411_v17 = vmov %v7410_v7  ;;  %v1432_v46 = vpop.permute.xlu1 %1431  ;;  %s2258_s4 = sshll.u32 %s336_s20, 4  ;;  %s2259_s4 = int_to_ptr.vmem [resolvable:$true] %s2258_s4 }
 0x4b8   : > { %v1422_v58 = vsel %vm5792_vm8, %v1418_v29, 0.0  ;;  %v5845_v1 = vmul.f32 %v7411_v17, %v1320_v21  ;;  %vm7413_vm4 = vnez %v7412_v27  ;;  %v1388_v56 = vsel %vm5805_vm9, %v1384_v61, 0.0 }
 0x4b9   : > { %v1387_v47 = vsel %vm7413_vm4, %v1383_v36, 0.0  ;;  %vm7414_vm15 = vnez %v7026_v45  ;;  %vm7415_vm13 = vcmp.lt.s32.totalorder %v7197_v38, 208  ;;  %v7416_v29 = vmov 0 }
 0x4ba   : > { %vm5855_vm2 = vmand %vm7415_vm13, %vm7414_vm15  ;;  %v1376_v2 = vadd.f32 %v1374_v20, %v5508_v8  ;;  %v1377_v32 = vadd.f32 %v1375_v55, %v5511_v48  ;;  %v7418_v21 = vstv %s5382_s25  ;;  %v7420_v45 = vstv %s5396_s1  ;;  %s7624_s1 = sld [smem:[#allocation143_spill]] }
 0x4bb   : > { %v7417_v29 = vsel %vm5855_vm2, 4294967295, %v7416_v29  ;;  %v1408_v36 = vmul.f32 %v7418_v21, %v1404_v12  ;;  %v7419_v7 = vmov %v7418_v21  ;;  %v1425_v17 = vmul.f32 %v7420_v45, %v1421_v62 }
 0x4bc   : > { %v1409_v61 = vmul.f32 %v7419_v7, %v1405_v0  ;;  %v7421_v54 = vmov %v7420_v45  ;;  %vm7422_vm15 = vcmp.lt.s32.totalorder %v2957_v42, 82  ;;  %v7424_v8 = vstv %s5359_s17  ;;  %v631_v0 = vpop.permute.xlu0 %630 }
 0x4bd   : > { %v1426_v26 = vmul.f32 %v7421_v54, %v1422_v58  ;;  %v1434_v23 = vsel %vm7422_vm15, %v5580_v9, %v1432_v46  ;;  %vm7423_vm13 = vmmov %vm7422_vm15  ;;  %v5878_v20 = vmul.f32 %v7424_v8, %v1387_v47  ;;  %v7425_v48 = vmov %v7424_v8 }
 0x4be   : > { %v1435_v18 = vsel %vm7423_vm13, %v1432_v46, %v5580_v9  ;;  %v5882_v55 = vmul.f32 %v7425_v48, %v1388_v56  ;;  %v1438_v12 = vsel %vm7334_vm7, %v1434_v23, 0.0  ;;  %v7426_v62 = vstv %s5410_s28  ;;  %v7428_v9 = vld [vmem:[#allocation81_spill] sm:$0xff] }
 0x4bf   : > { %v1439_v54 = vsel %vm5855_vm2, %v1435_v18, 0.0  ;;  %v1442_v58 = vmul.f32 %v7426_v62, %v1438_v12  ;;  %v7427_v21 = vmov %v7426_v62  ;;  %vm7429_vm15 = vcmp.lt.s32.totalorder %v2957_v42, 51  ;;  %v7431_v18 = vld [vmem:[#allocation117_spill] sm:$0xff] }
 0x4c0   : > { %v1443_v7 = vmul.f32 %v7427_v21, %v1439_v54  ;;  %v633_v47 = vsel %vm7429_vm15, %v7428_v9, %v631_v0  ;;  %vm7430_vm13 = vmmov %vm7429_vm15  ;;  %v1410_v23 = vadd.f32 %v1408_v36, %v5614_v53  ;;  %v1411_v46 = vadd.f32 %v1409_v61, %v5617_v6  ;;  %v1449_v53 = vpop.permute.xlu1 %1448  ;;  %s2256_s28 = scalar_lea.hbm %s7624_s1, %s2454_s14 }
 0x4c1   : > { %v634_v56 = vsel %vm7430_vm13, %v631_v0, %v7428_v9  ;;  %vm7432_vm8 = vnez %v7431_v18  ;;  %v649_v8 = vsel %vm7389_vm12, %v633_v47, 0.0  ;;  %vm7433_vm15 = vcmp.lt.s32.totalorder %v7197_v38, 208 }
 0x4c2   : > { %v648_v45 = vsel %vm7432_vm8, %v634_v56, 0.0  ;;  %vm5908_vm2 = vmand %vm7433_vm15, %vm7348_vm6  ;;  %v5914_v6 = vadd.f32 %v1425_v17, %v5661_v31  ;;  %v5917_v36 = vadd.f32 %v1426_v26, %v5664_v63  ;;  %v7436_v13 = vstv %s5418_s11  ;;  %v2044_v17 = vpop.permute.xlu0 %2043  ;;  %s2244_s11 = scalar_lea.sflag [#allocation5], %s7618_s6 }
 0x4c3   : > { %v652_v61 = vmul.f32 %v7436_v13, %v648_v45  ;;  %v7437_v57 = vmov %v7436_v13  ;;  %v5923_v54 = vadd.f32 %v1442_v58, %v1376_v2  ;;  %v5925_v0 = vadd.f32 %v1443_v7, %v1377_v32 }
 0x4c4   : > { %v653_v12 = vmul.f32 %v7437_v57, %v649_v8  ;;  %vm7438_vm6 = vcmp.lt.s32.totalorder %v2957_v42, 81  ;;  %v7440_v26 = vstv %s5439_s19  ;;  %v7442_v58 = vstv %s5461_s2  ;;  %s2622_s19 = scalar_lea.vmem %s2259_s4, 128  ;;  %s2745_s2 = smov [#allocation8]  }
 0x4c5   : > { %v1451_v62 = vsel %vm7438_vm6, %v5631_v4, %v1449_v53  ;;  %vm7439_vm12 = vmmov %vm7438_vm6  ;;  %v654_v63 = vadd.f32 %v652_v61, %v7440_v26  ;;  %v7441_v21 = vmov %v7440_v26  ;;  %v7443_v47 = vmov %v7442_v58  ;;  %p2623_p9 = scmp.ne.s32.totalorder %s2259_s4, %s2622_s19 }
 0x4c6   : > { %v1452_v31 = vsel %vm7439_vm12, %v1449_v53, %v5631_v4  ;;  %v655_v9 = vadd.f32 %v653_v12, %v7441_v21  ;;  %v1455_v2 = vsel %vm7107_vm3, %v1451_v62, 0.0  ;;  %v7444_v4 = vld [vmem:[#allocation82_spill] sm:$0xff]  ;;  %vm7445_vm8 = vcmp.lt.s32.totalorder %v2957_v42, 97  ;;  %v1466_v53 = vpop.permute.xlu1 %1465 }
 0x4c7   : > { %v1456_v32 = vsel %vm5908_vm2, %v1452_v31, 0.0  ;;  %v5943_v7 = vmul.f32 %v7442_v58, %v1455_v2  ;;  %v2047_v18 = vsel %vm7445_vm8, %v2044_v17, %v7444_v4  ;;  %vm7446_vm15 = vmmov %vm7445_vm8  ;;  %vm7447_vm6 = vcmp.lt.s32.totalorder %v7197_v38, 208  ;;  %p2624_p13 = pnand %p2623_p9, %p7625_p11 }
 0x4c8   : > { %v5947_v56 = vmul.f32 %v7443_v47, %v1456_v32  ;;  %v2048_v45 = vsel %vm7446_vm15, %v7444_v4, %v2044_v17  ;;  %vm5959_vm12 = vmand %vm7447_vm6, %vm7357_vm0  ;;  %v766_v13 = vadd.f32 %v5554_v35, %v654_v63  ;;  %v767_v61 = vadd.f32 %v5558_v16, %v655_v9  ;;  %v2058_v16 = vpop.permute.xlu0 %2057  ;;  %v7457_v4 = vld [vmem:[#allocation83_spill] sm:$0xff] }
 0x4c9   : > { %v2049_v57 = vsel %vm7107_vm3, %v2047_v18, 0.0  ;;  %vm7450_vm8 = vnez %v7351_v3  ;;  %v7451_v33 = vstv %s5477_s24  ;;  %vm7453_vm0 = vcmp.lt.s32.totalorder %v2957_v42, 80  ;;  %p2625_p10 = pneg %p2624_p13  ;;  %s2626_s24 = sshll.u32 %s2745_s2, 4  ;;  %s2627_s24 = int_to_ptr.vmem [resolvable:$false] %s2626_s24 }
 0x4ca   : > { %v2050_v12 = vsel %vm7450_vm8, %v2048_v45, 0.0  ;;  %v5971_v62 = vmul.f32 %v7451_v33, %v2049_v57  ;;  %v7452_v31 = vmov %v7451_v33  ;;  %v1468_v26 = vsel %vm7453_vm0, %v5679_v22, %v1466_v53  ;;  %vm7454_vm15 = vmmov %vm7453_vm0  ;;  %p2629_p2 = scmp.lt.s32.totalorder %s2259_s4, %s2627_s24 }
 0x4cb   : > { %v5975_v17 = vmul.f32 %v7452_v31, %v2050_v12  ;;  %v1469_v35 = vsel %vm7454_vm15, %v1466_v53, %v5679_v22  ;;  %v856_v63 = vadd.f32 %v5601_v19, %v766_v13  ;;  %v857_v3 = vadd.f32 %v5605_v51, %v767_v61  ;;  %v1483_v51 = vpop.permute.xlu1 %1482 }
 0x4cc   : > { %v1472_v21 = vsel %vm7263_vm11, %v1468_v26, 0.0  ;;  %v1473_v9 = vsel %vm5959_vm12, %v1469_v35, 0.0  ;;  %v7455_v2 = vstv %s5485_s12  ;;  %vm7458_vm6 = vcmp.lt.s32.totalorder %v2957_v42, 96  ;;  %v2072_v31 = vpop.permute.xlu0 %2071  ;;  %s2628_s12 = scalar_lea.vmem %s2627_s24, 256 }
 0x4cd   : > { %v1476_v32 = vmul.f32 %v7455_v2, %v1472_v21  ;;  %v7456_v58 = vmov %v7455_v2  ;;  %v2061_v22 = vsel %vm7458_vm6, %v2058_v16, %v7457_v4  ;;  %vm7459_vm8 = vmmov %vm7458_vm6  ;;  %v924_v18 = vadd.f32 %v5646_v44, %v856_v63  ;;  %v7470_v63 = vld [vmem:[#allocation120_spill] sm:$0xff]  ;;  %p2630_p1 = scmp.lt.s32.totalorder %s2628_s12, %s2622_s19 }
 0x4ce   : > { %v1477_v47 = vmul.f32 %v7456_v58, %v1473_v9  ;;  %v2062_v19 = vsel %vm7459_vm8, %v7457_v4, %v2058_v16  ;;  %v925_v45 = vadd.f32 %v5671_v39, %v857_v3  ;;  %v2063_v53 = vsel %vm7263_vm11, %v2061_v22, 0.0 }
 0x4cf   : > { %vm7460_vm0 = vnez %v7360_v60  ;;  %vm7461_vm15 = vnez %v6926_v10  ;;  %vm7462_vm13 = vcmp.lt.s32.totalorder %v7197_v38, 208  ;;  %v7463_v61 = vmov 0  ;;  %v1500_v4 = vpop.permute.xlu1 %1499  ;;  %p2631_p0 = por %p2630_p1, %p2629_p2 }
 0x4d0   : > { %v2064_v13 = vsel %vm7460_vm0, %v2062_v19, 0.0  ;;  %vm6009_vm6 = vmand %vm7462_vm13, %vm7461_vm15  ;;  %vm6683_vm8 = vcmp.lt.s32.totalorder %v2957_v42, 78  ;;  %v1478_v44 = vadd.f32 %v1476_v32, %v1410_v23  ;;  %v1479_v39 = vadd.f32 %v1477_v47, %v1411_v46  ;;  %v7469_v46 = vld [vmem:[#allocation124_spill] sm:$0xff]  ;;  %v7474_v19 = vld [vmem:[#allocation131_spill] sm:$0xff] }
 0x4d1   : > { %v7464_v61 = vsel %vm6009_vm6, 4294967295, %v7463_v61  ;;  %v7465_v57 = vstv %s5501_s22  ;;  %v992_v10 = vadd.f32 %v5689_v34, %v924_v18  ;;  %v993_v26 = vadd.f32 %v5693_v28, %v925_v45  ;;  %v7475_v18 = vld [vmem:[#allocation88_spill] sm:$0xff]  ;;  %p2632_p3 = pnand %p2631_p0, %p2625_p10 }
 0x4d2   : > { %v6016_v12 = vmul.f32 %v7465_v57, %v2063_v53  ;;  %v7466_v33 = vmov %v7465_v57  ;;  %vm7467_vm13 = vcmp.lt.s32.totalorder %v2957_v42, 79  ;;  %v1543_v16 = vadd.f32 %v7469_v46, %v1478_v44  ;;  %v7479_v44 = vld [vmem:[#allocation114_spill] sm:$0xff] }
 0x4d3   : > { %v6020_v60 = vmul.f32 %v7466_v33, %v2064_v13  ;;  %v1485_v35 = vsel %vm7467_vm13, %v5721_v49, %v1483_v51  ;;  %vm7468_vm0 = vmmov %vm7467_vm13  ;;  %v1544_v3 = vadd.f32 %v7470_v63, %v1479_v39  ;;  %v1060_v28 = vadd.f32 %v5699_v24, %v992_v10  ;;  %v2086_v24 = vpop.permute.xlu0 %2085  ;;  %v7478_v13 = vld [vmem:[#allocation111_spill] sm:$0xff]  ;;  %v7480_v10 = vld [vmem:[#allocation108_spill] sm:$0xff] }
 0x4d4   : > { %v1486_v23 = vsel %vm7468_vm0, %v1483_v51, %v5721_v49  ;;  %v1489_v21 = vsel %vm7174_vm1, %v1485_v35, 0.0  ;;  %v1061_v9 = vadd.f32 %v5703_v59, %v993_v26  ;;  %v7471_v2 = vstv %s5513_s3  ;;  %v7473_v49 = vld [vmem:[#allocation130_spill] sm:$0xff]  ;;  %v7481_v35 = vld [vmem:[#allocation27_spill] sm:$0xff] }
 0x4d5   : > { %v1490_v34 = vsel %vm6009_vm6, %v1486_v23, 0.0  ;;  %v1493_v32 = vmul.f32 %v7471_v2, %v1489_v21  ;;  %v7472_v58 = vmov %v7471_v2  ;;  %v1599_v22 = vadd.f32 %v7473_v49, %v1543_v16  ;;  %v7484_v21 = vld [vmem:[#allocation123_spill] sm:$0xff] }
 0x4d6   : > { %v1494_v47 = vmul.f32 %v7472_v58, %v1490_v34  ;;  %v1600_v51 = vadd.f32 %v7474_v19, %v1544_v3  ;;  %vm7476_vm15 = vcmp.lt.s32.totalorder %v2957_v42, 95  ;;  %v1121_v59 = vadd.f32 %v7478_v13, %v1060_v28  ;;  %v7483_v3 = vld [vmem:[#allocation122_spill] sm:$0xff]  ;;  %v7485_v34 = vld [vmem:[#allocation36_spill] sm:$0xff] }
 0x4d7   : > { %v2075_v45 = vsel %vm7476_vm15, %v2072_v31, %v7475_v18  ;;  %vm7477_vm13 = vmmov %vm7476_vm15  ;;  %v1122_v39 = vadd.f32 %v7479_v44, %v1061_v9  ;;  %v1495_v57 = vadd.f32 %v1493_v32, %v5914_v6  ;;  %v1655_v26 = vadd.f32 %v7480_v10, %v1599_v22  ;;  %v7486_v9 = vld [vmem:[#allocation34_spill] sm:$0xff]  ;;  %v6075_v49 = vpop.permute.xlu0 %2099  ;;  %v7489_v22 = vld [vmem:[#allocation133_spill] sm:$0xff] }
 0x4d8   : > { %v2076_v53 = vsel %vm7477_vm13, %v7475_v18, %v2072_v31  ;;  %v1496_v33 = vadd.f32 %v1494_v47, %v5917_v36  ;;  %v1656_v23 = vadd.f32 %v7481_v35, %v1600_v51  ;;  %v2077_v46 = vsel %vm7174_vm1, %v2075_v45, 0.0  ;;  %v7490_v51 = vld [vmem:[#allocation132_spill] sm:$0xff]  ;;  %v7495_v13 = vld [vmem:[#allocation41_spill] sm:$0xff]  ;;  %v7496_v44 = vld [vmem:[#allocation42_spill] sm:$0xff] }
 0x4d9   : > { %vm7482_vm0 = vnez %v7374_v50  ;;  %v1189_v16 = vadd.f32 %v5758_v14, %v1121_v59  ;;  %v1190_v63 = vadd.f32 %v5762_v11, %v1122_v39  ;;  %v1557_v6 = vadd.f32 %v7483_v3, %v1495_v57 }
 0x4da   : > { %v2078_v31 = vsel %vm7482_vm0, %v2076_v53, 0.0  ;;  %v1558_v36 = vadd.f32 %v7484_v21, %v1496_v33  ;;  %v1711_v28 = vadd.f32 %v7485_v34, %v1655_v26  ;;  %v1712_v2 = vadd.f32 %v7486_v9, %v1656_v23  ;;  %v1517_v53 = vpop.permute.xlu1 %1516  ;;  %v7497_v33 = vld [vmem:[#allocation29_spill] sm:$0xff]  ;;  %v7502_v21 = vld [vmem:[#allocation35_spill] sm:$0xff] }
 0x4db   : > { %v7487_v32 = vstv %s5530_s27  ;;  %v1257_v14 = vadd.f32 %v5827_v52, %v1189_v16  ;;  %v1258_v11 = vadd.f32 %v5831_v15, %v1190_v63  ;;  %v1613_v19 = vadd.f32 %v7489_v22, %v1557_v6  ;;  %v7498_v26 = vld [vmem:[#allocation25_spill] sm:$0xff]  ;;  %v7500_v63 = vld [vmem:[#allocation50_spill] sm:$0xff]  ;;  %v6107_v6 = vpop.permute.xlu0 %2113 }
 0x4dc   : > { %v6069_v58 = vmul.f32 %v7487_v32, %v2077_v46  ;;  %v7488_v47 = vmov %v7487_v32  ;;  %v1614_v18 = vadd.f32 %v7490_v51, %v1558_v36  ;;  %vm7491_vm13 = vnez %v6879_v40  ;;  %v7505_v32 = vld [vmem:[#allocation112_spill] sm:$0xff] }
 0x4dd   : > { %v6073_v50 = vmul.f32 %v7488_v47, %v2078_v31  ;;  %vm7492_vm0 = vcmp.lt.s32.totalorder %v7197_v38, 208  ;;  %v7493_v45 = vmov 0  ;;  %v1767_v59 = vadd.f32 %v7495_v13, %v1711_v28  ;;  %v7499_v31 = vld [vmem:[#allocation51_spill] sm:$0xff] }
 0x4de   : > { %vm6085_vm15 = vmand %vm7492_vm0, %vm7491_vm13  ;;  %v1768_v39 = vadd.f32 %v7496_v44, %v1712_v2  ;;  %v1502_v52 = vsel %vm6683_vm8, %v5778_v37, %v1500_v4  ;;  %v1503_v40 = vsel %vm6683_vm8, %v1500_v4, %v5778_v37  ;;  %v1325_v15 = vadd.f32 %v5841_v5, %v1257_v14  ;;  %v7506_v14 = vld [vmem:[#allocation113_spill] sm:$0xff]  ;;  %v7507_v51 = vld [vmem:[#allocation43_spill] sm:$0xff]  ;;  %v6123_v13 = vpop.permute.xlu1 %2129 }
 0x4df   : > { %v7494_v45 = vsel %vm6085_vm15, 4294967295, %v7493_v45  ;;  %v1326_v57 = vadd.f32 %v5845_v1, %v1258_v11  ;;  %v1669_v10 = vadd.f32 %v7497_v33, %v1613_v19  ;;  %v1670_v35 = vadd.f32 %v7498_v26, %v1614_v18  ;;  %v7501_v1 = vld [vmem:[#allocation37_spill] sm:$0xff]  ;;  %v7508_v18 = vld [vmem:[#allocation44_spill] sm:$0xff] }
 0x4e0   : > { %v1506_v23 = vsel %vm7413_vm4, %v1502_v52, 0.0  ;;  %v1507_v46 = vsel %vm6085_vm15, %v1503_v40, 0.0  ;;  %v1823_v16 = vadd.f32 %v7499_v31, %v1767_v59  ;;  %v1824_v3 = vadd.f32 %v7500_v63, %v1768_v39  ;;  %v7509_v39 = vld [vmem:[#allocation61_spill] sm:$0xff]  ;;  %v7510_v40 = vld [vmem:[#allocation64_spill] sm:$0xff] }
 0x4e1   : > { %v1393_v5 = vadd.f32 %v5878_v20, %v1325_v15  ;;  %v1394_v37 = vadd.f32 %v5882_v55, %v1326_v57  ;;  %v1725_v4 = vadd.f32 %v7501_v1, %v1669_v10  ;;  %v1726_v36 = vadd.f32 %v7502_v21, %v1670_v35  ;;  %v7511_v57 = vld [vmem:[#allocation121_spill] sm:$0xff]  ;;  %v7515_v33 = vld [vmem:[#allocation91_spill] sm:$0xff]  ;;  %v7518_v10 = vld [vmem:[#allocation104_spill] sm:$0xff] }
 0x4e2   : > { %v7503_v34 = vstv %s5550_s9  ;;  %v1873_v47 = vadd.f32 %v7505_v32, %v1823_v16  ;;  %v1874_v11 = vadd.f32 %v7506_v14, %v1824_v3  ;;  %vm7512_vm13 = vnez %v7511_v57  ;;  %v7521_v35 = vld [vmem:[#allocation126_spill] sm:$0xff]  ;;  %v7524_v3 = vld [vmem:[#allocation72_spill] sm:$0xff]  ;;  %v6177_v57 = vpop.permute.xlu1 %2143 }
 0x4e3   : > { %v1510_v28 = vmul.f32 %v7503_v34, %v1506_v23  ;;  %v7504_v9 = vmov %v7503_v34  ;;  %v1461_v22 = vadd.f32 %v5943_v7, %v1393_v5  ;;  %v1462_v19 = vadd.f32 %v5947_v56, %v1394_v37  ;;  %vm6133_vm8 = vmand %vm7492_vm0, %vm7512_vm13  ;;  %v6137_v56 = vpop.permute.xlu0 %2127  ;;  %v7523_v16 = vld [vmem:[#allocation69_spill] sm:$0xff] }
 0x4e4   : > { %v1511_v2 = vmul.f32 %v7504_v9, %v1507_v46  ;;  %v1781_v20 = vadd.f32 %v7507_v51, %v1725_v4  ;;  %v1782_v55 = vadd.f32 %v7508_v18, %v1726_v36  ;;  %v1929_v52 = vadd.f32 %v7509_v39, %v1873_v47  ;;  %v7522_v46 = vld [vmem:[#allocation127_spill] sm:$0xff]  ;;  %v7530_v47 = vld [vmem:[#allocation79_spill] sm:$0xff] }
 0x4e5   : > { %v1512_v59 = vadd.f32 %v1510_v28, %v5923_v54  ;;  %v1930_v15 = vadd.f32 %v7510_v40, %v1874_v11  ;;  %vm7516_vm15 = vcmp.lt.s32.totalorder %v2957_v42, 94  ;;  %vm7519_vm1 = vcmp.lt.s32.totalorder %v2957_v42, 77  ;;  %v7527_v36 = vld [vmem:[#allocation135_spill] sm:$0xff]  ;;  %v7528_v28 = vld [vmem:[#allocation134_spill] sm:$0xff] }
 0x4e6   : > { %v1513_v44 = vadd.f32 %v1511_v2, %v5925_v0  ;;  %v2089_v54 = vsel %vm7516_vm15, %v2086_v24, %v7515_v33  ;;  %vm7517_vm6 = vmmov %vm7516_vm15  ;;  %v1519_v26 = vsel %vm7519_vm1, %v7518_v10, %v1517_v53  ;;  %v1985_v63 = vadd.f32 %v7523_v16, %v1929_v52  ;;  %v7529_v2 = vld [vmem:[#allocation80_spill] sm:$0xff] }
 0x4e7   : > { %v2090_v0 = vsel %vm7517_vm6, %v7515_v33, %v2086_v24  ;;  %vm7520_vm13 = vmmov %vm7519_vm1  ;;  %v1571_v23 = vadd.f32 %v7521_v35, %v1512_v59  ;;  %v1986_v24 = vadd.f32 %v7524_v3, %v1930_v15  ;;  %v2091_v5 = vsel %vm7413_vm4, %v2089_v54, 0.0  ;;  %v6167_v11 = vpop.permute.xlu0 %2141  ;;  %v7535_v33 = vld [vmem:[#allocation32_spill] sm:$0xff]  ;;  %v7539_v3 = vld [vmem:[#allocation39_spill] sm:$0xff] }
 0x4e8   : > { %v1520_v38 = vsel %vm7520_vm13, %v1517_v53, %v7518_v10  ;;  %v1572_v31 = vadd.f32 %v7522_v46, %v1513_v44  ;;  %v2092_v1 = vsel %vm5805_vm9, %v2090_v0, 0.0  ;;  %v1523_v21 = vsel %vm7404_vm14, %v1519_v26, 0.0  ;;  %v7536_v0 = vld [vmem:[#allocation30_spill] sm:$0xff]  ;;  %v7537_v26 = vld [vmem:[#allocation49_spill] sm:$0xff]  ;;  %v7538_v35 = vld [vmem:[#allocation52_spill] sm:$0xff] }
 0x4e9   : > { %v1524_v53 = vsel %vm6133_vm8, %v1520_v38, 0.0  ;;  %v1627_v34 = vadd.f32 %v7527_v36, %v1571_v23  ;;  %v2041_v32 = vadd.f32 %v7529_v2, %v1985_v63  ;;  %v2042_v14 = vadd.f32 %v7530_v47, %v1986_v24 }
 0x4ea   : > { %v1628_v9 = vadd.f32 %v7528_v28, %v1572_v31  ;;  %v7531_v51 = vstv %s5562_s13  ;;  %v7533_v39 = vstv %s5574_s5  ;;  %v1837_v38 = vadd.f32 %v7537_v26, %v1781_v20  ;;  %v7555_v26 = vld [vmem:[#allocation71_spill] sm:$0xff] }
 0x4eb   : > { %v2095_v18 = vmul.f32 %v7531_v51, %v2091_v5  ;;  %v7532_v59 = vmov %v7531_v51  ;;  %v1527_v52 = vmul.f32 %v7533_v39, %v1523_v21  ;;  %v7534_v40 = vmov %v7533_v39  ;;  %v7540_v5 = vld [vmem:[#allocation38_spill] sm:$0xff]  ;;  %v6201_v2 = vpop.permute.xlu0 %2155 }
 0x4ec   : > { %v2096_v44 = vmul.f32 %v7532_v59, %v2092_v1  ;;  %v1528_v15 = vmul.f32 %v7534_v40, %v1524_v53  ;;  %v1683_v54 = vadd.f32 %v7535_v33, %v1627_v34  ;;  %v1684_v10 = vadd.f32 %v7536_v0, %v1628_v9  ;;  %v7541_v1 = vld [vmem:[#allocation58_spill] sm:$0xff]  ;;  %v7542_v53 = vld [vmem:[#allocation57_spill] sm:$0xff]  ;;  %v7543_v34 = vld [vmem:[#allocation128_spill] sm:$0xff] }
 0x4ed   : > { %v1838_v23 = vadd.f32 %v7538_v35, %v1782_v55  ;;  %v6183_v46 = vadd.f32 %v2095_v18, %v2041_v32  ;;  %v1529_v16 = vadd.f32 %v1527_v52, %v1461_v22  ;;  %v1887_v21 = vadd.f32 %v7541_v1, %v1837_v38  ;;  %v7544_v9 = vld [vmem:[#allocation129_spill] sm:$0xff]  ;;  %v7545_v55 = vld [vmem:[#allocation94_spill] sm:$0xff]  ;;  %v7556_v35 = vld [vmem:[#allocation74_spill] sm:$0xff] }
 0x4ee   : > { %v6185_v31 = vadd.f32 %v2096_v44, %v2042_v14  ;;  %v1530_v63 = vadd.f32 %v1528_v15, %v1462_v19  ;;  %v1739_v24 = vadd.f32 %v7539_v3, %v1683_v54  ;;  %v1740_v37 = vadd.f32 %v7540_v5, %v1684_v10  ;;  %v7548_v32 = vld [vmem:[#allocation48_spill] sm:$0xff]  ;;  %v7549_v14 = vld [vmem:[#allocation46_spill] sm:$0xff]  ;;  %v7550_v18 = vld [vmem:[#allocation63_spill] sm:$0xff]  ;;  %v2158_v10 = vpop.permute.xlu1 %2157 }
 0x4ef   : > { %v1888_v36 = vadd.f32 %v7542_v53, %v1838_v23  ;;  %v1585_v28 = vadd.f32 %v7543_v34, %v1529_v16  ;;  %vm7546_vm1 = vcmp.lt.s32.totalorder %v2957_v42, 93  ;;  %v1943_v59 = vadd.f32 %v7550_v18, %v1887_v21  ;;  %v7551_v44 = vld [vmem:[#allocation66_spill] sm:$0xff]  ;;  %v7552_v52 = vld [vmem:[#allocation107_spill] sm:$0xff]  ;;  %v7559_v5 = vld [vmem:[#allocation33_spill] sm:$0xff] }
 0x4f0   : > { %v1586_v20 = vadd.f32 %v7544_v9, %v1530_v63  ;;  %v2103_v22 = vsel %vm7546_vm1, %v6075_v49, %v7545_v55  ;;  %vm7547_vm9 = vmmov %vm7546_vm1  ;;  %v1795_v47 = vadd.f32 %v7548_v32, %v1739_v24  ;;  %v1796_v51 = vadd.f32 %v7549_v14, %v1740_v37  ;;  %v7553_v15 = vld [vmem:[#allocation28_spill] sm:$0xff]  ;;  %v7560_v1 = vld [vmem:[#allocation31_spill] sm:$0xff] }
 0x4f1   : > { %v2104_v19 = vsel %vm7547_vm9, %v7545_v55, %v6075_v49  ;;  %v1944_v39 = vadd.f32 %v7551_v44, %v1888_v36  ;;  %v1641_v40 = vadd.f32 %v7552_v52, %v1585_v28  ;;  %v2105_v54 = vsel %vm7404_vm14, %v2103_v22, 0.0  ;;  %v7561_v53 = vld [vmem:[#allocation54_spill] sm:$0xff]  ;;  %v7562_v34 = vld [vmem:[#allocation53_spill] sm:$0xff]  ;;  %v7563_v55 = vld [vmem:[#allocation95_spill] sm:$0xff]  ;;  %v2170_v44 = vpop.permute.xlu0 %2169 }
 0x4f2   : > { %v1642_v33 = vadd.f32 %v7553_v15, %v1586_v20  ;;  %v2106_v49 = vsel %vm5768_vm5, %v2104_v19, 0.0  ;;  %v1999_v38 = vadd.f32 %v7555_v26, %v1943_v59  ;;  %v7557_v16 = vstv %s5584_s26  ;;  %v7566_v32 = vld [vmem:[#allocation26_spill] sm:$0xff]  ;;  %v7567_v14 = vld [vmem:[#allocation40_spill] sm:$0xff]  ;;  %v7573_v0 = vld [vmem:[#allocation47_spill] sm:$0xff] }
 0x4f3   : > { %v2000_v23 = vadd.f32 %v7556_v35, %v1944_v39  ;;  %v2109_v63 = vmul.f32 %v7557_v16, %v2105_v54  ;;  %v7558_v3 = vmov %v7557_v16  ;;  %v1697_v37 = vadd.f32 %v7559_v5, %v1641_v40  ;;  %v7568_v18 = vld [vmem:[#allocation119_spill] sm:$0xff]  ;;  %v7569_v59 = vld [vmem:[#allocation60_spill] sm:$0xff] }
 0x4f4   : > { %v2110_v24 = vmul.f32 %v7558_v3, %v2106_v49  ;;  %v1698_v21 = vadd.f32 %v7560_v1, %v1642_v33  ;;  %v1851_v36 = vadd.f32 %v7561_v53, %v1795_v47  ;;  %v1852_v28 = vadd.f32 %v7562_v34, %v1796_v51  ;;  %v7571_v33 = vld [vmem:[#allocation93_spill] sm:$0xff]  ;;  %v7574_v49 = vld [vmem:[#allocation45_spill] sm:$0xff]  ;;  %v2172_v3 = vpop.permute.xlu1 %2171  ;;  %v7581_v53 = vld [vmem:[#allocation76_spill] sm:$0xff] }
 0x4f5   : > { %v2055_v9 = vadd.f32 %v5971_v62, %v1999_v38  ;;  %v2056_v20 = vadd.f32 %v5975_v17, %v2000_v23  ;;  %vm7564_vm5 = vcmp.lt.s32.totalorder %v2957_v42, 83  ;;  %v1753_v47 = vadd.f32 %v7566_v32, %v1697_v37  ;;  %v7575_v38 = vld [vmem:[#allocation65_spill] sm:$0xff]  ;;  %v7576_v23 = vld [vmem:[#allocation67_spill] sm:$0xff]  ;;  %v7582_v34 = vld [vmem:[#allocation78_spill] sm:$0xff] }
 0x4f6   : > { %v2117_v22 = vsel %vm7564_vm5, %v6107_v6, %v7563_v55  ;;  %vm7565_vm6 = vmmov %vm7564_vm5  ;;  %v1754_v51 = vadd.f32 %v7567_v14, %v1698_v21  ;;  %v1901_v62 = vadd.f32 %v7568_v18, %v1851_v36  ;;  %v1902_v17 = vadd.f32 %v7569_v59, %v1852_v28  ;;  %v7588_v14 = vld [vmem:[#allocation59_spill] sm:$0xff] }
 0x4f7   : > { %v2118_v19 = vsel %vm7565_vm6, %v7563_v55, %v6107_v6  ;;  %v2111_v39 = vadd.f32 %v2109_v63, %v2055_v9  ;;  %v2112_v52 = vadd.f32 %v2110_v24, %v2056_v20  ;;  %v2119_v15 = vsel %vm7136_vm10, %v2117_v22, 0.0  ;;  %v7583_v9 = vld [vmem:[#allocation56_spill] sm:$0xff]  ;;  %v7584_v55 = vld [vmem:[#allocation55_spill] sm:$0xff] }
 0x4f8   : > { %vm7572_vm15 = vnez %v7571_v33  ;;  %v1809_v6 = vadd.f32 %v7573_v0, %v1753_v47  ;;  %v1810_v26 = vadd.f32 %v7574_v49, %v1754_v51  ;;  %v1957_v35 = vadd.f32 %v7575_v38, %v1901_v62  ;;  %v2184_v62 = vpop.permute.xlu0 %2183  ;;  %v7593_v0 = vld [vmem:[#allocation70_spill] sm:$0xff]  ;;  %v2186_v49 = vpop.permute.xlu1 %2185 }
 0x4f9   : > { %v2120_v54 = vsel %vm7572_vm15, %v2118_v19, 0.0  ;;  %v1958_v16 = vadd.f32 %v7576_v23, %v1902_v17  ;;  %v7577_v5 = vstv %s5597_s0  ;;  %vm7579_vm10 = vcmp.lt.s32.totalorder %v2957_v42, 82 }
 0x4fa   : > { %v2123_v37 = vmul.f32 %v7577_v5, %v2119_v15  ;;  %v7578_v1 = vmov %v7577_v5  ;;  %v2131_v24 = vsel %vm7579_vm10, %v6137_v56, %v6123_v13  ;;  %vm7580_vm0 = vmmov %vm7579_vm10  ;;  %v2013_v36 = vadd.f32 %v7581_v53, %v1957_v35 }
 0x4fb   : > { %v2124_v63 = vmul.f32 %v7578_v1, %v2120_v54  ;;  %v2132_v21 = vsel %vm7580_vm0, %v6123_v13, %v6137_v56  ;;  %v2014_v28 = vadd.f32 %v7582_v34, %v1958_v16  ;;  %v1865_v20 = vadd.f32 %v7583_v9, %v1809_v6  ;;  %v7598_v16 = vld [vmem:[#allocation75_spill] sm:$0xff] }
 0x4fc   : > { %v1866_v22 = vadd.f32 %v7584_v55, %v1810_v26  ;;  %v2133_v19 = vsel %vm7334_vm7, %v2131_v24, 0.0  ;;  %vm7585_vm13 = vnez %v7417_v29  ;;  %vm7586_vm1 = vcmp.lt.s32.totalorder %v2957_v42, 81  ;;  %v7589_v29 = vld [vmem:[#allocation62_spill] sm:$0xff] }
 0x4fd   : > { %v2134_v32 = vsel %vm7585_vm13, %v2132_v21, 0.0  ;;  %v2145_v47 = vsel %vm7586_vm1, %v6167_v11, %v6177_v57  ;;  %vm7587_vm9 = vmmov %vm7586_vm1  ;;  %v2069_v56 = vadd.f32 %v6016_v12, %v2013_v36  ;;  %v2070_v43 = vadd.f32 %v6020_v60, %v2014_v28  ;;  %v7592_v60 = vld [vmem:[#allocation68_spill] sm:$0xff] }
 0x4fe   : > { %v2146_v13 = vsel %vm7587_vm9, %v6177_v57, %v6167_v11  ;;  %v1915_v51 = vadd.f32 %v7588_v14, %v1865_v20  ;;  %v1916_v18 = vadd.f32 %v7589_v29, %v1866_v22  ;;  %v7590_v59 = vstv %s5611_s30  ;;  %v2198_v20 = vpop.permute.xlu0 %2197 }
 0x4ff   : > { %v2137_v17 = vmul.f32 %v7590_v59, %v2133_v19  ;;  %v7591_v40 = vmov %v7590_v59  ;;  %v2147_v33 = vsel %vm7107_vm3, %v2145_v47, 0.0  ;;  %v2148_v11 = vsel %vm5908_vm2, %v2146_v13, 0.0 }
 0x500   : > { %v2138_v15 = vmul.f32 %v7591_v40, %v2134_v32  ;;  %v2125_v57 = vadd.f32 %v2123_v37, %v2069_v56  ;;  %v2126_v12 = vadd.f32 %v2124_v63, %v2070_v43  ;;  %v1971_v54 = vadd.f32 %v7592_v60, %v1915_v51  ;;  %v7599_v37 = vld [vmem:[#allocation77_spill] sm:$0xff]  ;;  %v2200_v56 = vpop.permute.xlu1 %2199 }
 0x501   : > { %v1972_v6 = vadd.f32 %v7593_v0, %v1916_v18  ;;  %v7594_v26 = vstv %s5625_s7  ;;  %vm7596_vm7 = vcmp.lt.s32.totalorder %v2957_v42, 80  ;;  %v7600_v36 = vstv %s5635_s16 }
 0x502   : > { %v2151_v38 = vmul.f32 %v7594_v26, %v2147_v33  ;;  %v7595_v35 = vmov %v7594_v26  ;;  %v2159_v30 = vsel %vm7596_vm7, %v6201_v2, %v2158_v10  ;;  %vm7597_vm3 = vmmov %vm7596_vm7  ;;  %v2027_v5 = vadd.f32 %v7598_v16, %v1971_v54 }
 0x503   : > { %v2152_v23 = vmul.f32 %v7595_v35, %v2148_v11  ;;  %v2160_v48 = vsel %vm7597_vm3, %v2158_v10, %v6201_v2  ;;  %v2028_v1 = vadd.f32 %v7599_v37, %v1972_v6  ;;  %v2161_v63 = vsel %vm7263_vm11, %v2159_v30, 0.0  ;;  %v7620_v37 = vld [vmem:[#allocation23_spill] sm:$0xff] }
 0x504   : > { %v2162_v24 = vsel %vm5959_vm12, %v2160_v48, 0.0  ;;  %v2153_v21 = vadd.f32 %v2151_v38, %v6183_v46  ;;  %v2165_v34 = vmul.f32 %v7600_v36, %v2161_v63  ;;  %v7601_v28 = vmov %v7600_v36 }
 0x505   : > { %v2154_v53 = vadd.f32 %v2152_v23, %v6185_v31  ;;  %v2166_v2 = vmul.f32 %v7601_v28, %v2162_v24  ;;  %v2083_v10 = vadd.f32 %v6069_v58, %v2027_v5  ;;  %v2084_v9 = vadd.f32 %v6073_v50, %v2028_v1  ;;  %v7622_v24 = vld [vmem:[#allocation24_spill] sm:$0xff] }
 0x506   : > { %vm7602_vm2 = vcmp.lt.s32.totalorder %v2957_v42, 79  ;;  %v2167_v55 = vadd.f32 %v2165_v34, %v2111_v39  ;;  %vm7604_vm12 = vnez %v6921_v25  ;;  %vm7605_vm5 = vnez %v7464_v61  ;;  %v2578_v34 = vld [vmem:[%s7619_s8] sm:$0xff] }
 0x507   : > { %v2173_v41 = vsel %vm7602_vm2, %v2170_v44, %v2172_v3  ;;  %vm7603_vm11 = vmmov %vm7602_vm2  ;;  %v2168_v46 = vadd.f32 %v2166_v2, %v2112_v52  ;;  %v2139_v58 = vadd.f32 %v2137_v17, %v2083_v10  ;;  %v2140_v19 = vadd.f32 %v2138_v15, %v2084_v9 }
 0x508   : > { %v2174_v8 = vsel %vm7603_vm11, %v2172_v3, %v2170_v44  ;;  %v2175_v31 = vsel %vm7604_vm12, %v2173_v41, 0.0  ;;  %v7606_v50 = vstv %s5642_s21  ;;  %vm7608_vm6 = vcmp.lt.s32.totalorder %v2957_v42, 78 }
 0x509   : > { %v2176_v22 = vsel %vm7605_vm5, %v2174_v8, 0.0  ;;  %v2179_v32 = vmul.f32 %v7606_v50, %v2175_v31  ;;  %v7607_v47 = vmov %v7606_v50  ;;  %v2187_v44 = vsel %vm7608_vm6, %v2184_v62, %v2186_v49  ;;  %vm7609_vm15 = vmmov %vm7608_vm6 }
 0x50a   : > { %v2180_v13 = vmul.f32 %v7607_v47, %v2176_v22  ;;  %v2188_v25 = vsel %vm7609_vm15, %v2186_v49, %v2184_v62  ;;  %vm7610_vm10 = vcmp.lt.s32.totalorder %v2957_v42, 77  ;;  %v2189_v43 = vsel %vm7413_vm4, %v2187_v44, 0.0 }
 0x50b   : > { %v2201_v61 = vsel %vm7610_vm10, %v2198_v20, %v2200_v56  ;;  %vm7611_vm0 = vmmov %vm7610_vm10  ;;  %v2181_v52 = vadd.f32 %v2179_v32, %v2125_v57  ;;  %vm7612_vm13 = vnez %v7494_v45  ;;  %v7613_v51 = vstv %s5652_s18 }
 0x50c   : > { %v2202_v39 = vsel %vm7611_vm0, %v2200_v56, %v2198_v20  ;;  %v2182_v3 = vadd.f32 %v2180_v13, %v2126_v12  ;;  %v2190_v14 = vsel %vm7612_vm13, %v2188_v25, 0.0  ;;  %v2193_v29 = vmul.f32 %v7613_v51, %v2189_v43 }
 0x50d   : > { %v7614_v18 = vmov %v7613_v51  ;;  %v2203_v62 = vsel %vm7404_vm14, %v2201_v61, 0.0  ;;  %v2204_v17 = vsel %vm6133_vm8, %v2202_v39, 0.0  ;;  %v2213_v42 = vadd.f32 %v2181_v52, %v2167_v55 }
 0x50e   : > { %v2194_v59 = vmul.f32 %v7614_v18, %v2190_v14  ;;  %v2214_v40 = vadd.f32 %v2182_v3, %v2168_v46  ;;  %v7615_v15 = vstv %s5667_s29  ;;  %v2195_v57 = vadd.f32 %v2193_v29, %v2139_v58 }
 0x50f   : > { %v2207_v33 = vmul.f32 %v7615_v15, %v2203_v62  ;;  %v7616_v11 = vmov %v7615_v15 }
 0x510   : > { %v2208_v27 = vmul.f32 %v7616_v11, %v2204_v17  ;;  %v2196_v12 = vadd.f32 %v2194_v59, %v2140_v19 }
 0x511   : > { %v2209_v45 = vadd.f32 %v2207_v33, %v2153_v21 }
 0x512   : > { %v2210_v60 = vadd.f32 %v2208_v27, %v2154_v53 }
 0x513   : > { %v2211_v54 = vadd.f32 %v2209_v45, %v2195_v57 }
 0x514   : > { %v2212_v0 = vadd.f32 %v2210_v60, %v2196_v12 }
 0x515   : > { %v2215_v6 = vadd.f32 %v2213_v42, %v2211_v54 }
 0x516   : > { %v2216_v49 = vadd.f32 %v2214_v40, %v2212_v0 }
 0x517   : > { %v2217_v26 = vsub.f32 0.0, %v2215_v6 }
 0x518   : > { %v2218_v4 = vsub.f32 0.0, %v2216_v49 }
 0x519   : > { %v2219_v38 = vmul.f32 1.442695, %v2217_v26 }
 0x51a   : > { %v2221_v7 = vmul.f32 1.442695, %v2218_v4 }
 0x51b   : > { %2570 = vpow2.f32 %v2219_v38 }
 0x51c   : > { %2572 = vpow2.f32 %v2221_v7 }
 0x528   : > { %v2571_v35 = vpop.eup %2570 }
 0x529   : > { %v2573_v23 = vpop.eup %2572  ;;  %v2223_v30 = vadd.f32 1.0, %v2571_v35 }
 0x52a   : > { %v2224_v48 = vadd.f32 1.0, %v2573_v23 }
 0x52b   : > { %2574 = vrcp.f32 %v2223_v30 }
 0x52c   : > { %2576 = vrcp.f32 %v2224_v48 }
 0x538   : > { %v2575_v16 = vpop.eup %2574 }
 0x539   : > { %v2577_v5 = vpop.eup %2576  ;;  %v2230_v1 = vrot.slane %v2575_v16, %v7620_v37 }
 0x53a   : > { %v2234_v63 = vrot.slane %v2577_v5, %v7620_v37 }
 0x53b   : > { %v2235_v21 = vmul.f32 %v2230_v1, %v7622_v24 }
 0x53c   : > { %v2236_v53 = vmul.f32 %v2234_v63, %v7622_v24 }
 0x53e   : > { %v2239_v36 = vcombine.low %v2235_v21, %v2236_v53 }
 0x540   : > { %v2241_v28 = vmul.f32 %v2578_v34, %v2239_v36 }
 0x542   : > { %2242 = vst [vmem:[%s336_s20] sm:$0xff] %v2241_v28 }
 0x543   : > { %2635 = shalt.err (!%p2632_p3)
}
 0x544   : > { %s2636_s22 = scalar_lea.hbm %s2256_s28, 128  ;;  %s2640_s9 = scalar_lea.hbm %s7624_s1, 256 }
 0x545   : > { %p2637_p12 = scmp.ne.s32.totalorder %s2256_s28, %s2636_s22  ;;  %p2641_p4 = scmp.lt.s32.totalorder %s2256_s28, %s7624_s1 }
 0x546   : > { %p2642_p6 = scmp.lt.s32.totalorder %s2640_s9, %s2636_s22 }
 0x547   : > { %p2638_p5 = pnand %p2637_p12, %p7625_p11 }
 0x548   : > { %p2643_p8 = por %p2642_p6, %p2641_p4 }
 0x549   : > { %p2639_p7 = pneg %p2638_p5 }
 0x54b   : > { %p2644_p9 = pnand %p2643_p8, %p2639_p7 }
 0x54d   : > { %2647 = shalt.err (!%p2644_p9)
}
 0x54e   : > { %2461 = dma.vmem_to_hbm [thread:$0]  (%p7625_p11), %s2259_s4, 128, %s2256_s28, %s2244_s11  }
 0x54f PF: > { %s7626_s26 = sld [smem:[#allocation12_spill]] }
 0x550   : > { %s7627_s0 = sld [smem:[#allocation17_spill]] }
 0x551   : > { %s7628_s30 = sld [smem:[#allocation15_spill]] }
 0x555   : > { %s2270_s7 = sand.u32 1, %s7626_s26  }
 0x556   : > { %p7629_p13 = scmp.ne.s32.totalorder %s7627_s0, 0  ;;  %s2271_s16 = scalar_lea.sflag [#allocation5], %s2270_s7 }
 0x557   : > { %p7630_p10 = scmp.ge.s32.totalorder %s7628_s30, 2 }
 0x559   : > { %p2472_p2 = pnand %p7630_p10, %p7629_p13 }
 0x55b   : > { %p2473_p1 = pneg %p2472_p2 }
 0x55d   : > { %2673 = dma.done.wait (%p2473_p1), %s2271_s16, 128  }
 0x55e   : > { %2675 = vsyncadd (%p2473_p1), %s2271_s16, 4294967168  ;;  %s7631_s10 = sld [smem:[#allocation18_spill]] }
 0x55f   : > { %s7632_s29 = sld [smem:[#allocation13_spill]] }
 0x560   : > { %s7633_s30 = sld [smem:[#allocation14_spill]] }
 0x561   : > { %s7634_s9 = sld [smem:[#allocation19_spill]] }
 0x564   : > { %p23_p0 = scmp.ge.s32.totalorder %s7631_s10, 4  }
 0x566   :  { %25 = sbr.rel (!%p23_p0) target bundleno = 16 (0x10), region = 102 }
 0x56b   :  { %2276 = vsyncpa [#allocation4], 1 }
 0x56c   :  { %2278 = vsyncpa [#allocation4 + $0x1], 1 }
 0x56d   :  { %2279 = vsyncpa [#allocation5], 1 }
 0x56e   :  { %2281 = vsyncpa [#allocation5 + $0x1], 1 }
 0x56f   :  { %2282 = vsyncpa [#allocation6], 1 }
 0x570   :  { %2284 = vsyncpa [#allocation6 + $0x1], 1 }

</bundles_post_ra>
